<compile_context>
chip_gen: v6e
topology: v6e:2x2x1
jax: 0.10.0
libtpu: 0.0.40
codegen_flags: <defaults>
</compile_context>

<pallas_src>
import functools

import jax
import jax.numpy as jnp
from jax import lax
from jax.experimental import pallas as pl
from jax.experimental.pallas import tpu as pltpu


# Flip to jnp.bfloat16 on v6e / v7x for ~2x MXU rate + half the DMA bytes.
MATMUL_DTYPE = jnp.float32


def _round_up(v, m):
    return (v + m - 1) // m * m


# ------------------------------ fused kernel ------------------------------- #

def _make_fused_kernel(B, H, W, c_in, c1, c2, c3, n_hidden, n_cls, dt):
    """Builds the per-batch-tile fused kernel for static (B, H, W)."""
    Hp1, Wp1 = H // 2, W // 2            # conv2 input spatial size
    Hp2, Wp2 = H // 4, W // 4            # conv3 input spatial size (valid)
    Hp3, Wp3 = H // 8, W // 8            # fc input spatial size
    W3s = _round_up(Wp2, 8)              # conv3 processed width (pad cols never read)
    K1 = 9 * c_in                        # conv1 contraction depth after host im2col

    def kernel(x_ref, w1_ref, b1_ref, w2_ref, b2_ref, w3_ref, b3_ref,
               fw1_ref, fb1_ref, fw2_ref, fb2_ref, o_ref,
               a2_ref, a3_ref, p1_ref, p2_ref, p3_ref):
        f32 = jnp.float32

        # ---- halo / pad-column zeroing (every step; interiors rewritten below).
        # Done every step (not only program_id==0) so it stays correct when the
        # "parallel" batch axis is split across TensorCores (per-core scratches
        # start uninitialized on that core's first step).
        a2_ref[:, 0, :, :] = jnp.zeros((B, Wp1 + 2, c1), dt)
        a2_ref[:, Hp1 + 1, :, :] = jnp.zeros((B, Wp1 + 2, c1), dt)
        a2_ref[:, :, 0, :] = jnp.zeros((B, Hp1 + 2, c1), dt)
        a2_ref[:, :, Wp1 + 1, :] = jnp.zeros((B, Hp1 + 2, c1), dt)
        a3_ref[:, 0, :, :] = jnp.zeros((B, W3s + 2, c2), dt)
        a3_ref[:, Hp2 + 1, :, :] = jnp.zeros((B, W3s + 2, c2), dt)
        a3_ref[:, :, 0, :] = jnp.zeros((B, Hp2 + 2, c2), dt)
        a3_ref[:, :, Wp2 + 1:W3s + 2, :] = jnp.zeros(
            (B, Hp2 + 2, W3s + 1 - Wp2, c2), dt)

        # -------------------- conv1: one K = 9*c_in matmul ---------------------
        xb = x_ref[...].reshape(B * H * W, K1)
        y = jnp.dot(xb, w1_ref[...], preferred_element_type=f32) + b1_ref[...]

        # maxpool 2x2 + ReLU:
        #  - H-parity max via a free leading-dim reshape,
        #  - W decimation via two stride-2 sublane reads of a flat VMEM scratch
        #    (rows are (b, y, x) with W even, so even x == even flat row index).
        y = y.reshape(B * Hp1, 2, W, c1)
        y = jnp.maximum(y[:, 0], y[:, 1])                  # (B*Hp1, W, c1)
        p1_ref[...] = y.reshape(B * Hp1 * W, c1)
        r1 = B * Hp1 * Wp1
        pooled = jnp.maximum(
            jnp.maximum(p1_ref[pl.ds(0, r1, stride=2), :],
                        p1_ref[pl.ds(1, r1, stride=2), :]), 0.0)
        # Wp1 = W//2 is a multiple of 8 -> single aligned-block interior store.
        a2_ref[:, 1:Hp1 + 1, 1:Wp1 + 1, :] = (
            pooled.reshape(B, Hp1, Wp1, c1).astype(dt))

        # ----------- conv2: 9 shifted taps over the zero-padded scratch --------
        M2 = B * Hp1 * Wp1
        acc = jnp.zeros((M2, c2), f32)
        for t in range(9):
            dy, dx = divmod(t, 3)
            patch = a2_ref[:, dy:dy + Hp1, dx:dx + Wp1, :].reshape(M2, c1)
            acc = acc + jnp.dot(patch, w2_ref[t], preferred_element_type=f32)
        y = acc + b2_ref[...]
        y = y.reshape(B * Hp2, 2, Wp1, c2)
        y = jnp.maximum(y[:, 0], y[:, 1])                  # (B*Hp2, Wp1, c2)
        p2_ref[...] = y.reshape(B * Hp2 * Wp1, c2)
        r2 = B * Hp2 * Wp2
        pooled = jnp.maximum(
            jnp.maximum(p2_ref[pl.ds(0, r2, stride=2), :],
                        p2_ref[pl.ds(1, r2, stride=2), :]), 0.0)
        pooled = pooled.reshape(B, Hp2 * Wp2, c2)          # rows (i, j) per image
        # Wp2 = W//4 may be < 8, so store the a3 interior one output row at a time.
        for i in range(Hp2):
            a3_ref[:, 1 + i, 1:Wp2 + 1, :] = (
                pooled[:, i * Wp2:(i + 1) * Wp2, :].astype(dt))

        # ------------- conv3 (width processed padded to W3s) -------------------
        M3 = B * Hp2 * W3s
        acc = jnp.zeros((M3, c3), f32)
        for t in range(9):
            dy, dx = divmod(t, 3)
            patch = a3_ref[:, dy:dy + Hp2, dx:dx + W3s, :].reshape(M3, c2)
            acc = acc + jnp.dot(patch, w3_ref[t], preferred_element_type=f32)
        y = acc + b3_ref[...]
        y = y.reshape(B * Hp3, 2, W3s, c3)
        y = jnp.maximum(y[:, 0], y[:, 1])                  # (B*Hp3, W3s, c3)
        p3_ref[...] = y.reshape(B, Hp3 * W3s, c3)

        # ----- pool3 + ReLU + fc1 (+ReLU) + fc2, fused per valid position ------
        # fw1 is pre-split per spatial position in NCHW-flatten order, so the
        # x.view(-1, 256*s*s) flatten needs no activation transpose; conv3's
        # pad columns (x >= Wp2) are never read here.
        hacc = jnp.zeros((B, n_hidden), f32)
        for q in range(Hp3 * Wp3):
            i, j = divmod(q, Wp3)
            e = p3_ref[:, i * W3s + 2 * j, :]
            o = p3_ref[:, i * W3s + 2 * j + 1, :]
            act = jnp.maximum(jnp.maximum(e, o), 0.0).astype(dt)      # (B, c3)
            hacc = hacc + jnp.dot(act, fw1_ref[q], preferred_element_type=f32)
        h = jnp.maximum(hacc + fb1_ref[...], 0.0).astype(dt)
        out = jnp.dot(h, fw2_ref[...], preferred_element_type=f32) + fb2_ref[...]
        o_ref[0] = out.astype(o_ref.dtype)

    scratch_shapes = [
        pltpu.VMEM((B, Hp1 + 2, Wp1 + 2, c1), dt),          # a2 (padded conv2 input)
        pltpu.VMEM((B, Hp2 + 2, W3s + 2, c2), dt),          # a3 (padded conv3 input)
        pltpu.VMEM((B * Hp1 * W, c1), jnp.float32),         # p1 (H-maxed conv1 out)
        pltpu.VMEM((B * Hp2 * Wp1, c2), jnp.float32),       # p2 (H-maxed conv2 out)
        pltpu.VMEM((B, Hp3 * W3s, c3), jnp.float32),        # p3 (H-maxed conv3 out)
    ]
    return kernel, scratch_shapes


# ------------------------------ JAX wrapper --------------------------------- #

def forward(params, x_nchw, matmul_dtype=MATMUL_DTYPE, batch_tile=8):
    """x_nchw: (N, Cin, H, W) -> logits (N, num_classes)."""
    N, c_in, H, W = x_nchw.shape
    assert H % 8 == 0 and W % 16 == 0, (
        "fused kernel requires H % 8 == 0 and W % 16 == 0 (e.g. 16x16 patches)")
    bt = max(1, min(batch_tile, N))
    while N % bt:
        bt -= 1
    num_tiles = N // bt                    # keep >= 2 on v7x to use both TensorCores

    Hp3, Wp3 = H // 8, W // 8
    n_pos = Hp3 * Wp3
    dt = matmul_dtype

    c1 = params["w1"].shape[-1]
    c2 = params["w2"].shape[-1]
    c3 = params["w3"].shape[-1]
    n_hidden = params["fw1"].shape[-1]
    n_cls = params["fw2"].shape[-1]

    # NCHW -> NHWC, then host-side im2col so conv1 is a single K = 9*c_in matmul.
    x = jnp.transpose(x_nchw, (0, 2, 3, 1))
    xp = jnp.pad(x, ((0, 0), (1, 1), (1, 1), (0, 0)))
    x9 = jnp.concatenate(
        [xp[:, dy:dy + H, dx:dx + W, :] for dy in range(3) for dx in range(3)],
        axis=-1).astype(dt)                                            # (N, H, W, 9*cin)

    w1 = params["w1"].reshape(9 * c_in, c1).astype(dt)                 # (9*cin, c1)
    w2 = params["w2"].reshape(9, c1, c2).astype(dt)
    w3 = params["w3"].reshape(9, c2, c3).astype(dt)
    b1 = params["b1"].reshape(1, c1).astype(jnp.float32)
    b2 = params["b2"].reshape(1, c2).astype(jnp.float32)
    b3 = params["b3"].reshape(1, c3).astype(jnp.float32)
    # fc1 rows are in NCHW flatten order (c, i, j); split per spatial position q.
    fw1 = (params["fw1"].reshape(c3, n_pos, n_hidden)
           .transpose(1, 0, 2).astype(dt))                             # (n_pos, c3, hid)
    fb1 = params["fb1"].reshape(1, n_hidden).astype(jnp.float32)
    fw2 = params["fw2"].astype(dt)                                     # (hid, n_cls)
    fb2 = params["fb2"].reshape(1, n_cls).astype(jnp.float32)

    kernel, scratch_shapes = _make_fused_kernel(
        bt, H, W, c_in, c1, c2, c3, n_hidden, n_cls, dt)

    out = pl.pallas_call(
        kernel,
        out_shape=jax.ShapeDtypeStruct((num_tiles, bt, n_cls), jnp.float32),
        grid_spec=pltpu.PrefetchScalarGridSpec(
            num_scalar_prefetch=0,
            grid=(num_tiles,),
            in_specs=[
                pl.BlockSpec((bt, H, W, 9 * c_in), lambda n: (n, 0, 0, 0)),   # x (im2col)
                pl.BlockSpec((9 * c_in, c1), lambda n: (0, 0)),               # conv1 w
                pl.BlockSpec((1, c1), lambda n: (0, 0)),                      # conv1 b
                pl.BlockSpec((9, c1, c2), lambda n: (0, 0, 0)),               # conv2 w
                pl.BlockSpec((1, c2), lambda n: (0, 0)),                      # conv2 b
                pl.BlockSpec((9, c2, c3), lambda n: (0, 0, 0)),               # conv3 w
                pl.BlockSpec((1, c3), lambda n: (0, 0)),                      # conv3 b
                pl.BlockSpec((n_pos, c3, n_hidden), lambda n: (0, 0, 0)),     # fc1 w
                pl.BlockSpec((1, n_hidden), lambda n: (0, 0)),                # fc1 b
                pl.BlockSpec((n_hidden, n_cls), lambda n: (0, 0)),            # fc2 w
                pl.BlockSpec((1, n_cls), lambda n: (0, 0)),                   # fc2 b
            ],
            out_specs=pl.BlockSpec((1, bt, n_cls), lambda n: (n, 0, 0)),
            scratch_shapes=scratch_shapes,
        ),
        compiler_params=pltpu.CompilerParams(
            dimension_semantics=("parallel",),     # batch tiles shard over v7x's 2 TCs
            vmem_limit_bytes=32 * 1024 * 1024,     # actual use is a few MB
        ),
    )(x9, w1, b1, w2, b2, w3, b3, fw1, fb1, fw2, fb2)
    return out.reshape(N, n_cls)


# ------------------------------- Model setup -------------------------------- #

def init_params(key, input_channels, patch_size):
    fc1_size = patch_size // 8
    ks = jax.random.split(key, 10)

    def conv_w(k, cin, cout):
        return (1.0 / jnp.sqrt(9.0 * cin)) * jax.random.normal(
            k, (3, 3, cin, cout), jnp.float32)

    return {
        "w1": conv_w(ks[0], input_channels, 64),
        "b1": 0.01 * jax.random.normal(ks[1], (64,), jnp.float32),
        "w2": conv_w(ks[2], 64, 128),
        "b2": 0.01 * jax.random.normal(ks[3], (128,), jnp.float32),
        "w3": conv_w(ks[4], 128, 256),
        "b3": 0.01 * jax.random.normal(ks[5], (256,), jnp.float32),
        "fw1": (1.0 / jnp.sqrt(256.0 * fc1_size * fc1_size)) *
               jax.random.normal(ks[6], (256 * fc1_size * fc1_size, 128), jnp.float32),
        "fb1": 0.01 * jax.random.normal(ks[7], (128,), jnp.float32),
        "fw2": (1.0 / jnp.sqrt(128.0)) * jax.random.normal(ks[8], (128, 2), jnp.float32),
        "fb2": 0.01 * jax.random.normal(ks[9], (2,), jnp.float32),
    }


# --------------------------- Pure-JAX reference ------------------------------ #

def reference_forward(params, x_nchw):
    def conv(x, w, b):
        out = lax.conv_general_dilated(
            x, w, window_strides=(1, 1), padding="SAME",
            dimension_numbers=("NCHW", "HWIO", "NCHW"),
            precision=lax.Precision.HIGHEST)
        return out + b[None, :, None, None]

    def pool(x):
        return lax.reduce_window(x, -jnp.inf, lax.max,
                                 (1, 1, 2, 2), (1, 1, 2, 2), "VALID")

    x = jnp.maximum(pool(conv(x_nchw, params["w1"], params["b1"])), 0.0)
    x = jnp.maximum(pool(conv(x, params["w2"], params["b2"])), 0.0)
    x = jnp.maximum(pool(conv(x, params["w3"], params["b3"])), 0.0)
    N = x.shape[0]
    x = x.reshape(N, -1)
    x = jnp.maximum(
        jnp.dot(x, params["fw1"], precision=lax.Precision.HIGHEST) + params["fb1"], 0.0)
    return jnp.dot(x, params["fw2"], precision=lax.Precision.HIGHEST) + params["fb2"]


# ----------------------------------- Main ------------------------------------ #

if __name__ == "__main__":
    # Small shapes; batch_tile=2 -> a 2-step grid, exercising the multi-step path
    # (and both v7x TensorCores via dimension_semantics=("parallel",)).
    batch, input_channels, patch_size = 4, 4, 16
    key = jax.random.PRNGKey(0)
    kp, kx = jax.random.split(key)
    params = init_params(kp, input_channels, patch_size)
    x = jax.random.normal(kx, (batch, input_channels, patch_size, patch_size),
                          jnp.float32)

    fwd = jax.jit(functools.partial(forward, batch_tile=2))
    out = jax.block_until_ready(fwd(params, x))
    assert out.shape == (batch, 2), out.shape

    ref = jax.block_until_ready(reference_forward(params, x))
    if not jnp.allclose(out, ref, rtol=5e-2, atol=5e-2):
        raise AssertionError(f"Pallas/reference mismatch:\n{out}\nvs\n{ref}")

    print("KERNEL_OK")
</pallas_src>

<mosaic_0001>
module attributes {stable_mosaic.version = 11 : i64} {
  func.func @kernel(%arg0: i32, %arg1: memref<2x16x16x36xf32, #tpu.memory_space<vmem>>, %arg2: memref<36x64xf32, #tpu.memory_space<vmem>>, %arg3: memref<1x64xf32, #tpu.memory_space<vmem>>, %arg4: memref<9x64x128xf32, #tpu.memory_space<vmem>>, %arg5: memref<1x128xf32, #tpu.memory_space<vmem>>, %arg6: memref<9x128x256xf32, #tpu.memory_space<vmem>>, %arg7: memref<1x256xf32, #tpu.memory_space<vmem>>, %arg8: memref<4x256x128xf32, #tpu.memory_space<vmem>>, %arg9: memref<1x128xf32, #tpu.memory_space<vmem>>, %arg10: memref<128x2xf32, #tpu.memory_space<vmem>>, %arg11: memref<1x2xf32, #tpu.memory_space<vmem>>, %arg12: memref<1x2x2xf32, #tpu.memory_space<vmem>>, %arg13: memref<2x10x10x64xf32, #tpu.memory_space<vmem>>, %arg14: memref<2x6x10x128xf32, #tpu.memory_space<vmem>>, %arg15: memref<256x64xf32, #tpu.memory_space<vmem>>, %arg16: memref<64x128xf32, #tpu.memory_space<vmem>>, %arg17: memref<2x16x256xf32, #tpu.memory_space<vmem>>) attributes {dimension_semantics = [#tpu.dimension_semantics<parallel>], iteration_bounds = array<i64: 2>, scalar_prefetch = 0 : i64, scratch_operands = 5 : i64, tpu.core_type = #tpu.core_type<tc>, window_params = [{transform_indices = @transform_0, window_bounds = array<i64: 2, 16, 16, 36>}, {pipeline_mode = #tpu.pipeline_mode<synchronous>, transform_indices = @transform_1, window_bounds = array<i64: 36, 64>}, {pipeline_mode = #tpu.pipeline_mode<synchronous>, transform_indices = @transform_2, window_bounds = array<i64: 1, 64>}, {pipeline_mode = #tpu.pipeline_mode<synchronous>, transform_indices = @transform_3, window_bounds = array<i64: 9, 64, 128>}, {pipeline_mode = #tpu.pipeline_mode<synchronous>, transform_indices = @transform_4, window_bounds = array<i64: 1, 128>}, {pipeline_mode = #tpu.pipeline_mode<synchronous>, transform_indices = @transform_5, window_bounds = array<i64: 9, 128, 256>}, {pipeline_mode = #tpu.pipeline_mode<synchronous>, transform_indices = @transform_6, window_bounds = array<i64: 1, 256>}, {pipeline_mode = #tpu.pipeline_mode<synchronous>, transform_indices = @transform_7, window_bounds = array<i64: 4, 256, 128>}, {pipeline_mode = #tpu.pipeline_mode<synchronous>, transform_indices = @transform_8, window_bounds = array<i64: 1, 128>}, {pipeline_mode = #tpu.pipeline_mode<synchronous>, transform_indices = @transform_9, window_bounds = array<i64: 128, 2>}, {pipeline_mode = #tpu.pipeline_mode<synchronous>, transform_indices = @transform_10, window_bounds = array<i64: 1, 2>}, {transform_indices = @transform_11, window_bounds = array<i64: 1, 2, 2>}]} {
    %cst = arith.constant 0.000000e+00 : f32
    %0 = vector.broadcast %cst : f32 to vector<2x10x64xf32>
    %c0 = arith.constant 0 : index
    %c0_0 = arith.constant 0 : index
    %c0_1 = arith.constant 0 : index
    %c0_2 = arith.constant 0 : index
    %1 = vector.load %arg13[%c0, %c0_0, %c0_1, %c0_2] : memref<2x10x10x64xf32, #tpu.memory_space<vmem>>, vector<2x1x10x64xf32>
    %2 = vector.shape_cast %1 : vector<2x1x10x64xf32> to vector<2x10x64xf32>
    %3 = vector.shape_cast %0 : vector<2x10x64xf32> to vector<2x1x10x64xf32>
    tpu.vector_store %arg13[%c0, %c0_0, %c0_1, %c0_2], %3 {strides = array<i32>} : memref<2x10x10x64xf32, #tpu.memory_space<vmem>>, vector<2x1x10x64xf32>,
    %cst_3 = arith.constant 0.000000e+00 : f32
    %4 = vector.broadcast %cst_3 : f32 to vector<2x10x64xf32>
    %c0_4 = arith.constant 0 : index
    %c9 = arith.constant 9 : index
    %c0_5 = arith.constant 0 : index
    %c0_6 = arith.constant 0 : index
    %5 = vector.load %arg13[%c0_4, %c9, %c0_5, %c0_6] : memref<2x10x10x64xf32, #tpu.memory_space<vmem>>, vector<2x1x10x64xf32>
    %6 = vector.shape_cast %5 : vector<2x1x10x64xf32> to vector<2x10x64xf32>
    %7 = vector.shape_cast %4 : vector<2x10x64xf32> to vector<2x1x10x64xf32>
    tpu.vector_store %arg13[%c0_4, %c9, %c0_5, %c0_6], %7 {strides = array<i32>} : memref<2x10x10x64xf32, #tpu.memory_space<vmem>>, vector<2x1x10x64xf32>,
    %cst_7 = arith.constant 0.000000e+00 : f32
    %8 = vector.broadcast %cst_7 : f32 to vector<2x10x64xf32>
    %c0_8 = arith.constant 0 : index
    %c0_9 = arith.constant 0 : index
    %c0_10 = arith.constant 0 : index
    %c0_11 = arith.constant 0 : index
    %9 = vector.load %arg13[%c0_8, %c0_9, %c0_10, %c0_11] : memref<2x10x10x64xf32, #tpu.memory_space<vmem>>, vector<2x10x1x64xf32>
    %10 = vector.shape_cast %9 : vector<2x10x1x64xf32> to vector<2x10x64xf32>
    %11 = vector.shape_cast %8 : vector<2x10x64xf32> to vector<2x10x1x64xf32>
    tpu.vector_store %arg13[%c0_8, %c0_9, %c0_10, %c0_11], %11 {strides = array<i32>} : memref<2x10x10x64xf32, #tpu.memory_space<vmem>>, vector<2x10x1x64xf32>,
    %cst_12 = arith.constant 0.000000e+00 : f32
    %12 = vector.broadcast %cst_12 : f32 to vector<2x10x64xf32>
    %c0_13 = arith.constant 0 : index
    %c0_14 = arith.constant 0 : index
    %c9_15 = arith.constant 9 : index
    %c0_16 = arith.constant 0 : index
    %13 = vector.load %arg13[%c0_13, %c0_14, %c9_15, %c0_16] : memref<2x10x10x64xf32, #tpu.memory_space<vmem>>, vector<2x10x1x64xf32>
    %14 = vector.shape_cast %13 : vector<2x10x1x64xf32> to vector<2x10x64xf32>
    %15 = vector.shape_cast %12 : vector<2x10x64xf32> to vector<2x10x1x64xf32>
    tpu.vector_store %arg13[%c0_13, %c0_14, %c9_15, %c0_16], %15 {strides = array<i32>} : memref<2x10x10x64xf32, #tpu.memory_space<vmem>>, vector<2x10x1x64xf32>,
    %cst_17 = arith.constant 0.000000e+00 : f32
    %16 = vector.broadcast %cst_17 : f32 to vector<2x10x128xf32>
    %c0_18 = arith.constant 0 : index
    %c0_19 = arith.constant 0 : index
    %c0_20 = arith.constant 0 : index
    %c0_21 = arith.constant 0 : index
    %17 = vector.load %arg14[%c0_18, %c0_19, %c0_20, %c0_21] : memref<2x6x10x128xf32, #tpu.memory_space<vmem>>, vector<2x1x10x128xf32>
    %18 = vector.shape_cast %17 : vector<2x1x10x128xf32> to vector<2x10x128xf32>
    %19 = vector.shape_cast %16 : vector<2x10x128xf32> to vector<2x1x10x128xf32>
    tpu.vector_store %arg14[%c0_18, %c0_19, %c0_20, %c0_21], %19 {strides = array<i32>} : memref<2x6x10x128xf32, #tpu.memory_space<vmem>>, vector<2x1x10x128xf32>,
    %cst_22 = arith.constant 0.000000e+00 : f32
    %20 = vector.broadcast %cst_22 : f32 to vector<2x10x128xf32>
    %c0_23 = arith.constant 0 : index
    %c5 = arith.constant 5 : index
    %c0_24 = arith.constant 0 : index
    %c0_25 = arith.constant 0 : index
    %21 = vector.load %arg14[%c0_23, %c5, %c0_24, %c0_25] : memref<2x6x10x128xf32, #tpu.memory_space<vmem>>, vector<2x1x10x128xf32>
    %22 = vector.shape_cast %21 : vector<2x1x10x128xf32> to vector<2x10x128xf32>
    %23 = vector.shape_cast %20 : vector<2x10x128xf32> to vector<2x1x10x128xf32>
    tpu.vector_store %arg14[%c0_23, %c5, %c0_24, %c0_25], %23 {strides = array<i32>} : memref<2x6x10x128xf32, #tpu.memory_space<vmem>>, vector<2x1x10x128xf32>,
    %cst_26 = arith.constant 0.000000e+00 : f32
    %24 = vector.broadcast %cst_26 : f32 to vector<2x6x128xf32>
    %c0_27 = arith.constant 0 : index
    %c0_28 = arith.constant 0 : index
    %c0_29 = arith.constant 0 : index
    %c0_30 = arith.constant 0 : index
    %25 = vector.load %arg14[%c0_27, %c0_28, %c0_29, %c0_30] : memref<2x6x10x128xf32, #tpu.memory_space<vmem>>, vector<2x6x1x128xf32>
    %26 = vector.shape_cast %25 : vector<2x6x1x128xf32> to vector<2x6x128xf32>
    %27 = vector.shape_cast %24 : vector<2x6x128xf32> to vector<2x6x1x128xf32>
    tpu.vector_store %arg14[%c0_27, %c0_28, %c0_29, %c0_30], %27 {strides = array<i32>} : memref<2x6x10x128xf32, #tpu.memory_space<vmem>>, vector<2x6x1x128xf32>,
    %cst_31 = arith.constant 0.000000e+00 : f32
    %28 = vector.broadcast %cst_31 : f32 to vector<2x6x5x128xf32>
    %c0_32 = arith.constant 0 : index
    %c0_33 = arith.constant 0 : index
    %c5_34 = arith.constant 5 : index
    %c0_35 = arith.constant 0 : index
    %29 = vector.load %arg14[%c0_32, %c0_33, %c5_34, %c0_35] : memref<2x6x10x128xf32, #tpu.memory_space<vmem>>, vector<2x6x5x128xf32>
    tpu.vector_store %arg14[%c0_32, %c0_33, %c5_34, %c0_35], %28 {strides = array<i32>} : memref<2x6x10x128xf32, #tpu.memory_space<vmem>>, vector<2x6x5x128xf32>,
    %c0_36 = arith.constant 0 : index
    %c0_37 = arith.constant 0 : index
    %c0_38 = arith.constant 0 : index
    %c0_39 = arith.constant 0 : index
    %30 = vector.load %arg1[%c0_36, %c0_37, %c0_38, %c0_39] : memref<2x16x16x36xf32, #tpu.memory_space<vmem>>, vector<2x16x16x36xf32>
    %31 = vector.shape_cast %30 : vector<2x16x16x36xf32> to vector<512x36xf32>
    %c0_40 = arith.constant 0 : index
    %c0_41 = arith.constant 0 : index
    %32 = vector.load %arg2[%c0_40, %c0_41] : memref<36x64xf32, #tpu.memory_space<vmem>>, vector<36x64xf32>
    %cst_42 = arith.constant dense<0.000000e+00> : vector<512x64xf32>
    %33 = tpu.matmul %31, %32, %cst_42 {dimension_numbers = #tpu.dot_dimension_numbers<[1], [0], [0], [1], [0, 0, 1, 1], [], []>} : vector<512x36xf32>, vector<36x64xf32>, vector<512x64xf32> -> vector<512x64xf32>
    %c0_43 = arith.constant 0 : index
    %c0_44 = arith.constant 0 : index
    %34 = vector.load %arg3[%c0_43, %c0_44] : memref<1x64xf32, #tpu.memory_space<vmem>>, vector<1x64xf32>
    %35 = vector.broadcast %34 : vector<1x64xf32> to vector<512x64xf32>
    %36 = arith.addf %33, %35 : vector<512x64xf32>
    %37 = vector.shape_cast %36 : vector<512x64xf32> to vector<16x2x16x64xf32>
    %38 = vector.extract_strided_slice %37 {offsets = [0, 0, 0, 0], sizes = [16, 1, 16, 64], strides = [1, 1, 1, 1]} : vector<16x2x16x64xf32> to vector<16x1x16x64xf32>
    %39 = vector.shape_cast %38 : vector<16x1x16x64xf32> to vector<16x16x64xf32>
    %40 = vector.extract_strided_slice %37 {offsets = [0, 1, 0, 0], sizes = [16, 1, 16, 64], strides = [1, 1, 1, 1]} : vector<16x2x16x64xf32> to vector<16x1x16x64xf32>
    %41 = vector.shape_cast %40 : vector<16x1x16x64xf32> to vector<16x16x64xf32>
    %42 = arith.maximumf %39, %41 : vector<16x16x64xf32>
    %43 = vector.shape_cast %42 : vector<16x16x64xf32> to vector<256x64xf32>
    %c0_45 = arith.constant 0 : index
    %c0_46 = arith.constant 0 : index
    %44 = vector.load %arg15[%c0_45, %c0_46] : memref<256x64xf32, #tpu.memory_space<vmem>>, vector<256x64xf32>
    tpu.vector_store %arg15[%c0_45, %c0_46], %43 {strides = array<i32>} : memref<256x64xf32, #tpu.memory_space<vmem>>, vector<256x64xf32>,
    %c0_47 = arith.constant 0 : index
    %c0_48 = arith.constant 0 : index
    %45 = tpu.strided_load %arg15[%c0_47, %c0_48] {strides = array<i32: 2, 1>} : memref<256x64xf32, #tpu.memory_space<vmem>>, vector<128x64xf32>
    %c1 = arith.constant 1 : index
    %c0_49 = arith.constant 0 : index
    %46 = tpu.strided_load %arg15[%c1, %c0_49] {strides = array<i32: 2, 1>} : memref<256x64xf32, #tpu.memory_space<vmem>>, vector<128x64xf32>
    %47 = arith.maximumf %45, %46 : vector<128x64xf32>
    %cst_50 = arith.constant 0.000000e+00 : f32
    %48 = vector.broadcast %cst_50 : f32 to vector<128x64xf32>
    %49 = arith.maximumf %47, %48 : vector<128x64xf32>
    %50 = vector.shape_cast %49 : vector<128x64xf32> to vector<2x8x8x64xf32>
    %c0_51 = arith.constant 0 : index
    %c1_52 = arith.constant 1 : index
    %c1_53 = arith.constant 1 : index
    %c0_54 = arith.constant 0 : index
    %51 = vector.load %arg13[%c0_51, %c1_52, %c1_53, %c0_54] : memref<2x10x10x64xf32, #tpu.memory_space<vmem>>, vector<2x8x8x64xf32>
    tpu.vector_store %arg13[%c0_51, %c1_52, %c1_53, %c0_54], %50 {strides = array<i32>} : memref<2x10x10x64xf32, #tpu.memory_space<vmem>>, vector<2x8x8x64xf32>,
    %cst_55 = arith.constant 0.000000e+00 : f32
    %52 = vector.broadcast %cst_55 : f32 to vector<128x128xf32>
    %c0_56 = arith.constant 0 : index
    %c0_57 = arith.constant 0 : index
    %c0_58 = arith.constant 0 : index
    %c0_59 = arith.constant 0 : index
    %53 = vector.load %arg13[%c0_56, %c0_57, %c0_58, %c0_59] : memref<2x10x10x64xf32, #tpu.memory_space<vmem>>, vector<2x8x8x64xf32>
    %54 = vector.shape_cast %53 : vector<2x8x8x64xf32> to vector<128x64xf32>
    %c0_60 = arith.constant 0 : index
    %c0_61 = arith.constant 0 : index
    %c0_62 = arith.constant 0 : index
    %55 = vector.load %arg4[%c0_60, %c0_61, %c0_62] : memref<9x64x128xf32, #tpu.memory_space<vmem>>, vector<1x64x128xf32>
    %56 = vector.shape_cast %55 : vector<1x64x128xf32> to vector<64x128xf32>
    %cst_63 = arith.constant dense<0.000000e+00> : vector<128x128xf32>
    %57 = tpu.matmul %54, %56, %cst_63 {dimension_numbers = #tpu.dot_dimension_numbers<[1], [0], [0], [1], [0, 0, 1, 1], [], []>} : vector<128x64xf32>, vector<64x128xf32>, vector<128x128xf32> -> vector<128x128xf32>
    %58 = arith.addf %52, %57 : vector<128x128xf32>
    %c0_64 = arith.constant 0 : index
    %c0_65 = arith.constant 0 : index
    %c1_66 = arith.constant 1 : index
    %c0_67 = arith.constant 0 : index
    %59 = vector.load %arg13[%c0_64, %c0_65, %c1_66, %c0_67] : memref<2x10x10x64xf32, #tpu.memory_space<vmem>>, vector<2x8x8x64xf32>
    %60 = vector.shape_cast %59 : vector<2x8x8x64xf32> to vector<128x64xf32>
    %c1_68 = arith.constant 1 : index
    %c0_69 = arith.constant 0 : index
    %c0_70 = arith.constant 0 : index
    %61 = vector.load %arg4[%c1_68, %c0_69, %c0_70] : memref<9x64x128xf32, #tpu.memory_space<vmem>>, vector<1x64x128xf32>
    %62 = vector.shape_cast %61 : vector<1x64x128xf32> to vector<64x128xf32>
    %cst_71 = arith.constant dense<0.000000e+00> : vector<128x128xf32>
    %63 = tpu.matmul %60, %62, %cst_71 {dimension_numbers = #tpu.dot_dimension_numbers<[1], [0], [0], [1], [0, 0, 1, 1], [], []>} : vector<128x64xf32>, vector<64x128xf32>, vector<128x128xf32> -> vector<128x128xf32>
    %64 = arith.addf %58, %63 : vector<128x128xf32>
    %c0_72 = arith.constant 0 : index
    %c0_73 = arith.constant 0 : index
    %c2 = arith.constant 2 : index
    %c0_74 = arith.constant 0 : index
    %65 = vector.load %arg13[%c0_72, %c0_73, %c2, %c0_74] : memref<2x10x10x64xf32, #tpu.memory_space<vmem>>, vector<2x8x8x64xf32>
    %66 = vector.shape_cast %65 : vector<2x8x8x64xf32> to vector<128x64xf32>
    %c2_75 = arith.constant 2 : index
    %c0_76 = arith.constant 0 : index
    %c0_77 = arith.constant 0 : index
    %67 = vector.load %arg4[%c2_75, %c0_76, %c0_77] : memref<9x64x128xf32, #tpu.memory_space<vmem>>, vector<1x64x128xf32>
    %68 = vector.shape_cast %67 : vector<1x64x128xf32> to vector<64x128xf32>
    %cst_78 = arith.constant dense<0.000000e+00> : vector<128x128xf32>
    %69 = tpu.matmul %66, %68, %cst_78 {dimension_numbers = #tpu.dot_dimension_numbers<[1], [0], [0], [1], [0, 0, 1, 1], [], []>} : vector<128x64xf32>, vector<64x128xf32>, vector<128x128xf32> -> vector<128x128xf32>
    %70 = arith.addf %64, %69 : vector<128x128xf32>
    %c0_79 = arith.constant 0 : index
    %c1_80 = arith.constant 1 : index
    %c0_81 = arith.constant 0 : index
    %c0_82 = arith.constant 0 : index
    %71 = vector.load %arg13[%c0_79, %c1_80, %c0_81, %c0_82] : memref<2x10x10x64xf32, #tpu.memory_space<vmem>>, vector<2x8x8x64xf32>
    %72 = vector.shape_cast %71 : vector<2x8x8x64xf32> to vector<128x64xf32>
    %c3 = arith.constant 3 : index
    %c0_83 = arith.constant 0 : index
    %c0_84 = arith.constant 0 : index
    %73 = vector.load %arg4[%c3, %c0_83, %c0_84] : memref<9x64x128xf32, #tpu.memory_space<vmem>>, vector<1x64x128xf32>
    %74 = vector.shape_cast %73 : vector<1x64x128xf32> to vector<64x128xf32>
    %cst_85 = arith.constant dense<0.000000e+00> : vector<128x128xf32>
    %75 = tpu.matmul %72, %74, %cst_85 {dimension_numbers = #tpu.dot_dimension_numbers<[1], [0], [0], [1], [0, 0, 1, 1], [], []>} : vector<128x64xf32>, vector<64x128xf32>, vector<128x128xf32> -> vector<128x128xf32>
    %76 = arith.addf %70, %75 : vector<128x128xf32>
    %c0_86 = arith.constant 0 : index
    %c1_87 = arith.constant 1 : index
    %c1_88 = arith.constant 1 : index
    %c0_89 = arith.constant 0 : index
    %77 = vector.load %arg13[%c0_86, %c1_87, %c1_88, %c0_89] : memref<2x10x10x64xf32, #tpu.memory_space<vmem>>, vector<2x8x8x64xf32>
    %78 = vector.shape_cast %77 : vector<2x8x8x64xf32> to vector<128x64xf32>
    %c4 = arith.constant 4 : index
    %c0_90 = arith.constant 0 : index
    %c0_91 = arith.constant 0 : index
    %79 = vector.load %arg4[%c4, %c0_90, %c0_91] : memref<9x64x128xf32, #tpu.memory_space<vmem>>, vector<1x64x128xf32>
    %80 = vector.shape_cast %79 : vector<1x64x128xf32> to vector<64x128xf32>
    %cst_92 = arith.constant dense<0.000000e+00> : vector<128x128xf32>
    %81 = tpu.matmul %78, %80, %cst_92 {dimension_numbers = #tpu.dot_dimension_numbers<[1], [0], [0], [1], [0, 0, 1, 1], [], []>} : vector<128x64xf32>, vector<64x128xf32>, vector<128x128xf32> -> vector<128x128xf32>
    %82 = arith.addf %76, %81 : vector<128x128xf32>
    %c0_93 = arith.constant 0 : index
    %c1_94 = arith.constant 1 : index
    %c2_95 = arith.constant 2 : index
    %c0_96 = arith.constant 0 : index
    %83 = vector.load %arg13[%c0_93, %c1_94, %c2_95, %c0_96] : memref<2x10x10x64xf32, #tpu.memory_space<vmem>>, vector<2x8x8x64xf32>
    %84 = vector.shape_cast %83 : vector<2x8x8x64xf32> to vector<128x64xf32>
    %c5_97 = arith.constant 5 : index
    %c0_98 = arith.constant 0 : index
    %c0_99 = arith.constant 0 : index
    %85 = vector.load %arg4[%c5_97, %c0_98, %c0_99] : memref<9x64x128xf32, #tpu.memory_space<vmem>>, vector<1x64x128xf32>
    %86 = vector.shape_cast %85 : vector<1x64x128xf32> to vector<64x128xf32>
    %cst_100 = arith.constant dense<0.000000e+00> : vector<128x128xf32>
    %87 = tpu.matmul %84, %86, %cst_100 {dimension_numbers = #tpu.dot_dimension_numbers<[1], [0], [0], [1], [0, 0, 1, 1], [], []>} : vector<128x64xf32>, vector<64x128xf32>, vector<128x128xf32> -> vector<128x128xf32>
    %88 = arith.addf %82, %87 : vector<128x128xf32>
    %c0_101 = arith.constant 0 : index
    %c2_102 = arith.constant 2 : index
    %c0_103 = arith.constant 0 : index
    %c0_104 = arith.constant 0 : index
    %89 = vector.load %arg13[%c0_101, %c2_102, %c0_103, %c0_104] : memref<2x10x10x64xf32, #tpu.memory_space<vmem>>, vector<2x8x8x64xf32>
    %90 = vector.shape_cast %89 : vector<2x8x8x64xf32> to vector<128x64xf32>
    %c6 = arith.constant 6 : index
    %c0_105 = arith.constant 0 : index
    %c0_106 = arith.constant 0 : index
    %91 = vector.load %arg4[%c6, %c0_105, %c0_106] : memref<9x64x128xf32, #tpu.memory_space<vmem>>, vector<1x64x128xf32>
    %92 = vector.shape_cast %91 : vector<1x64x128xf32> to vector<64x128xf32>
    %cst_107 = arith.constant dense<0.000000e+00> : vector<128x128xf32>
    %93 = tpu.matmul %90, %92, %cst_107 {dimension_numbers = #tpu.dot_dimension_numbers<[1], [0], [0], [1], [0, 0, 1, 1], [], []>} : vector<128x64xf32>, vector<64x128xf32>, vector<128x128xf32> -> vector<128x128xf32>
    %94 = arith.addf %88, %93 : vector<128x128xf32>
    %c0_108 = arith.constant 0 : index
    %c2_109 = arith.constant 2 : index
    %c1_110 = arith.constant 1 : index
    %c0_111 = arith.constant 0 : index
    %95 = vector.load %arg13[%c0_108, %c2_109, %c1_110, %c0_111] : memref<2x10x10x64xf32, #tpu.memory_space<vmem>>, vector<2x8x8x64xf32>
    %96 = vector.shape_cast %95 : vector<2x8x8x64xf32> to vector<128x64xf32>
    %c7 = arith.constant 7 : index
    %c0_112 = arith.constant 0 : index
    %c0_113 = arith.constant 0 : index
    %97 = vector.load %arg4[%c7, %c0_112, %c0_113] : memref<9x64x128xf32, #tpu.memory_space<vmem>>, vector<1x64x128xf32>
    %98 = vector.shape_cast %97 : vector<1x64x128xf32> to vector<64x128xf32>
    %cst_114 = arith.constant dense<0.000000e+00> : vector<128x128xf32>
    %99 = tpu.matmul %96, %98, %cst_114 {dimension_numbers = #tpu.dot_dimension_numbers<[1], [0], [0], [1], [0, 0, 1, 1], [], []>} : vector<128x64xf32>, vector<64x128xf32>, vector<128x128xf32> -> vector<128x128xf32>
    %100 = arith.addf %94, %99 : vector<128x128xf32>
    %c0_115 = arith.constant 0 : index
    %c2_116 = arith.constant 2 : index
    %c2_117 = arith.constant 2 : index
    %c0_118 = arith.constant 0 : index
    %101 = vector.load %arg13[%c0_115, %c2_116, %c2_117, %c0_118] : memref<2x10x10x64xf32, #tpu.memory_space<vmem>>, vector<2x8x8x64xf32>
    %102 = vector.shape_cast %101 : vector<2x8x8x64xf32> to vector<128x64xf32>
    %c8 = arith.constant 8 : index
    %c0_119 = arith.constant 0 : index
    %c0_120 = arith.constant 0 : index
    %103 = vector.load %arg4[%c8, %c0_119, %c0_120] : memref<9x64x128xf32, #tpu.memory_space<vmem>>, vector<1x64x128xf32>
    %104 = vector.shape_cast %103 : vector<1x64x128xf32> to vector<64x128xf32>
    %cst_121 = arith.constant dense<0.000000e+00> : vector<128x128xf32>
    %105 = tpu.matmul %102, %104, %cst_121 {dimension_numbers = #tpu.dot_dimension_numbers<[1], [0], [0], [1], [0, 0, 1, 1], [], []>} : vector<128x64xf32>, vector<64x128xf32>, vector<128x128xf32> -> vector<128x128xf32>
    %106 = arith.addf %100, %105 : vector<128x128xf32>
    %c0_122 = arith.constant 0 : index
    %c0_123 = arith.constant 0 : index
    %107 = vector.load %arg5[%c0_122, %c0_123] : memref<1x128xf32, #tpu.memory_space<vmem>>, vector<1x128xf32>
    %108 = vector.broadcast %107 : vector<1x128xf32> to vector<128x128xf32>
    %109 = arith.addf %106, %108 : vector<128x128xf32>
    %110 = vector.shape_cast %109 : vector<128x128xf32> to vector<8x2x8x128xf32>
    %111 = vector.extract_strided_slice %110 {offsets = [0, 0, 0, 0], sizes = [8, 1, 8, 128], strides = [1, 1, 1, 1]} : vector<8x2x8x128xf32> to vector<8x1x8x128xf32>
    %112 = vector.shape_cast %111 : vector<8x1x8x128xf32> to vector<8x8x128xf32>
    %113 = vector.extract_strided_slice %110 {offsets = [0, 1, 0, 0], sizes = [8, 1, 8, 128], strides = [1, 1, 1, 1]} : vector<8x2x8x128xf32> to vector<8x1x8x128xf32>
    %114 = vector.shape_cast %113 : vector<8x1x8x128xf32> to vector<8x8x128xf32>
    %115 = arith.maximumf %112, %114 : vector<8x8x128xf32>
    %116 = vector.shape_cast %115 : vector<8x8x128xf32> to vector<64x128xf32>
    %c0_124 = arith.constant 0 : index
    %c0_125 = arith.constant 0 : index
    %117 = vector.load %arg16[%c0_124, %c0_125] : memref<64x128xf32, #tpu.memory_space<vmem>>, vector<64x128xf32>
    tpu.vector_store %arg16[%c0_124, %c0_125], %116 {strides = array<i32>} : memref<64x128xf32, #tpu.memory_space<vmem>>, vector<64x128xf32>,
    %c0_126 = arith.constant 0 : index
    %c0_127 = arith.constant 0 : index
    %118 = tpu.strided_load %arg16[%c0_126, %c0_127] {strides = array<i32: 2, 1>} : memref<64x128xf32, #tpu.memory_space<vmem>>, vector<32x128xf32>
    %c1_128 = arith.constant 1 : index
    %c0_129 = arith.constant 0 : index
    %119 = tpu.strided_load %arg16[%c1_128, %c0_129] {strides = array<i32: 2, 1>} : memref<64x128xf32, #tpu.memory_space<vmem>>, vector<32x128xf32>
    %120 = arith.maximumf %118, %119 : vector<32x128xf32>
    %cst_130 = arith.constant 0.000000e+00 : f32
    %121 = vector.broadcast %cst_130 : f32 to vector<32x128xf32>
    %122 = arith.maximumf %120, %121 : vector<32x128xf32>
    %123 = vector.shape_cast %122 : vector<32x128xf32> to vector<2x16x128xf32>
    %124 = vector.extract_strided_slice %123 {offsets = [0, 0, 0], sizes = [2, 4, 128], strides = [1, 1, 1]} : vector<2x16x128xf32> to vector<2x4x128xf32>
    %c0_131 = arith.constant 0 : index
    %c1_132 = arith.constant 1 : index
    %c1_133 = arith.constant 1 : index
    %c0_134 = arith.constant 0 : index
    %125 = vector.load %arg14[%c0_131, %c1_132, %c1_133, %c0_134] : memref<2x6x10x128xf32, #tpu.memory_space<vmem>>, vector<2x1x4x128xf32>
    %126 = vector.shape_cast %125 : vector<2x1x4x128xf32> to vector<2x4x128xf32>
    %127 = vector.shape_cast %124 : vector<2x4x128xf32> to vector<2x1x4x128xf32>
    tpu.vector_store %arg14[%c0_131, %c1_132, %c1_133, %c0_134], %127 {strides = array<i32>} : memref<2x6x10x128xf32, #tpu.memory_space<vmem>>, vector<2x1x4x128xf32>,
    %128 = vector.extract_strided_slice %123 {offsets = [0, 4, 0], sizes = [2, 4, 128], strides = [1, 1, 1]} : vector<2x16x128xf32> to vector<2x4x128xf32>
    %c0_135 = arith.constant 0 : index
    %c2_136 = arith.constant 2 : index
    %c1_137 = arith.constant 1 : index
    %c0_138 = arith.constant 0 : index
    %129 = vector.load %arg14[%c0_135, %c2_136, %c1_137, %c0_138] : memref<2x6x10x128xf32, #tpu.memory_space<vmem>>, vector<2x1x4x128xf32>
    %130 = vector.shape_cast %129 : vector<2x1x4x128xf32> to vector<2x4x128xf32>
    %131 = vector.shape_cast %128 : vector<2x4x128xf32> to vector<2x1x4x128xf32>
    tpu.vector_store %arg14[%c0_135, %c2_136, %c1_137, %c0_138], %131 {strides = array<i32>} : memref<2x6x10x128xf32, #tpu.memory_space<vmem>>, vector<2x1x4x128xf32>,
    %132 = vector.extract_strided_slice %123 {offsets = [0, 8, 0], sizes = [2, 4, 128], strides = [1, 1, 1]} : vector<2x16x128xf32> to vector<2x4x128xf32>
    %c0_139 = arith.constant 0 : index
    %c3_140 = arith.constant 3 : index
    %c1_141 = arith.constant 1 : index
    %c0_142 = arith.constant 0 : index
    %133 = vector.load %arg14[%c0_139, %c3_140, %c1_141, %c0_142] : memref<2x6x10x128xf32, #tpu.memory_space<vmem>>, vector<2x1x4x128xf32>
    %134 = vector.shape_cast %133 : vector<2x1x4x128xf32> to vector<2x4x128xf32>
    %135 = vector.shape_cast %132 : vector<2x4x128xf32> to vector<2x1x4x128xf32>
    tpu.vector_store %arg14[%c0_139, %c3_140, %c1_141, %c0_142], %135 {strides = array<i32>} : memref<2x6x10x128xf32, #tpu.memory_space<vmem>>, vector<2x1x4x128xf32>,
    %136 = vector.extract_strided_slice %123 {offsets = [0, 12, 0], sizes = [2, 4, 128], strides = [1, 1, 1]} : vector<2x16x128xf32> to vector<2x4x128xf32>
    %c0_143 = arith.constant 0 : index
    %c4_144 = arith.constant 4 : index
    %c1_145 = arith.constant 1 : index
    %c0_146 = arith.constant 0 : index
    %137 = vector.load %arg14[%c0_143, %c4_144, %c1_145, %c0_146] : memref<2x6x10x128xf32, #tpu.memory_space<vmem>>, vector<2x1x4x128xf32>
    %138 = vector.shape_cast %137 : vector<2x1x4x128xf32> to vector<2x4x128xf32>
    %139 = vector.shape_cast %136 : vector<2x4x128xf32> to vector<2x1x4x128xf32>
    tpu.vector_store %arg14[%c0_143, %c4_144, %c1_145, %c0_146], %139 {strides = array<i32>} : memref<2x6x10x128xf32, #tpu.memory_space<vmem>>, vector<2x1x4x128xf32>,
    %cst_147 = arith.constant 0.000000e+00 : f32
    %140 = vector.broadcast %cst_147 : f32 to vector<64x256xf32>
    %c0_148 = arith.constant 0 : index
    %c0_149 = arith.constant 0 : index
    %c0_150 = arith.constant 0 : index
    %c0_151 = arith.constant 0 : index
    %141 = vector.load %arg14[%c0_148, %c0_149, %c0_150, %c0_151] : memref<2x6x10x128xf32, #tpu.memory_space<vmem>>, vector<2x4x8x128xf32>
    %142 = vector.shape_cast %141 : vector<2x4x8x128xf32> to vector<64x128xf32>
    %c0_152 = arith.constant 0 : index
    %c0_153 = arith.constant 0 : index
    %c0_154 = arith.constant 0 : index
    %143 = vector.load %arg6[%c0_152, %c0_153, %c0_154] : memref<9x128x256xf32, #tpu.memory_space<vmem>>, vector<1x128x256xf32>
    %144 = vector.shape_cast %143 : vector<1x128x256xf32> to vector<128x256xf32>
    %cst_155 = arith.constant dense<0.000000e+00> : vector<64x256xf32>
    %145 = tpu.matmul %142, %144, %cst_155 {dimension_numbers = #tpu.dot_dimension_numbers<[1], [0], [0], [1], [0, 0, 1, 1], [], []>} : vector<64x128xf32>, vector<128x256xf32>, vector<64x256xf32> -> vector<64x256xf32>
    %146 = arith.addf %140, %145 : vector<64x256xf32>
    %c0_156 = arith.constant 0 : index
    %c0_157 = arith.constant 0 : index
    %c1_158 = arith.constant 1 : index
    %c0_159 = arith.constant 0 : index
    %147 = vector.load %arg14[%c0_156, %c0_157, %c1_158, %c0_159] : memref<2x6x10x128xf32, #tpu.memory_space<vmem>>, vector<2x4x8x128xf32>
    %148 = vector.shape_cast %147 : vector<2x4x8x128xf32> to vector<64x128xf32>
    %c1_160 = arith.constant 1 : index
    %c0_161 = arith.constant 0 : index
    %c0_162 = arith.constant 0 : index
    %149 = vector.load %arg6[%c1_160, %c0_161, %c0_162] : memref<9x128x256xf32, #tpu.memory_space<vmem>>, vector<1x128x256xf32>
    %150 = vector.shape_cast %149 : vector<1x128x256xf32> to vector<128x256xf32>
    %cst_163 = arith.constant dense<0.000000e+00> : vector<64x256xf32>
    %151 = tpu.matmul %148, %150, %cst_163 {dimension_numbers = #tpu.dot_dimension_numbers<[1], [0], [0], [1], [0, 0, 1, 1], [], []>} : vector<64x128xf32>, vector<128x256xf32>, vector<64x256xf32> -> vector<64x256xf32>
    %152 = arith.addf %146, %151 : vector<64x256xf32>
    %c0_164 = arith.constant 0 : index
    %c0_165 = arith.constant 0 : index
    %c2_166 = arith.constant 2 : index
    %c0_167 = arith.constant 0 : index
    %153 = vector.load %arg14[%c0_164, %c0_165, %c2_166, %c0_167] : memref<2x6x10x128xf32, #tpu.memory_space<vmem>>, vector<2x4x8x128xf32>
    %154 = vector.shape_cast %153 : vector<2x4x8x128xf32> to vector<64x128xf32>
    %c2_168 = arith.constant 2 : index
    %c0_169 = arith.constant 0 : index
    %c0_170 = arith.constant 0 : index
    %155 = vector.load %arg6[%c2_168, %c0_169, %c0_170] : memref<9x128x256xf32, #tpu.memory_space<vmem>>, vector<1x128x256xf32>
    %156 = vector.shape_cast %155 : vector<1x128x256xf32> to vector<128x256xf32>
    %cst_171 = arith.constant dense<0.000000e+00> : vector<64x256xf32>
    %157 = tpu.matmul %154, %156, %cst_171 {dimension_numbers = #tpu.dot_dimension_numbers<[1], [0], [0], [1], [0, 0, 1, 1], [], []>} : vector<64x128xf32>, vector<128x256xf32>, vector<64x256xf32> -> vector<64x256xf32>
    %158 = arith.addf %152, %157 : vector<64x256xf32>
    %c0_172 = arith.constant 0 : index
    %c1_173 = arith.constant 1 : index
    %c0_174 = arith.constant 0 : index
    %c0_175 = arith.constant 0 : index
    %159 = vector.load %arg14[%c0_172, %c1_173, %c0_174, %c0_175] : memref<2x6x10x128xf32, #tpu.memory_space<vmem>>, vector<2x4x8x128xf32>
    %160 = vector.shape_cast %159 : vector<2x4x8x128xf32> to vector<64x128xf32>
    %c3_176 = arith.constant 3 : index
    %c0_177 = arith.constant 0 : index
    %c0_178 = arith.constant 0 : index
    %161 = vector.load %arg6[%c3_176, %c0_177, %c0_178] : memref<9x128x256xf32, #tpu.memory_space<vmem>>, vector<1x128x256xf32>
    %162 = vector.shape_cast %161 : vector<1x128x256xf32> to vector<128x256xf32>
    %cst_179 = arith.constant dense<0.000000e+00> : vector<64x256xf32>
    %163 = tpu.matmul %160, %162, %cst_179 {dimension_numbers = #tpu.dot_dimension_numbers<[1], [0], [0], [1], [0, 0, 1, 1], [], []>} : vector<64x128xf32>, vector<128x256xf32>, vector<64x256xf32> -> vector<64x256xf32>
    %164 = arith.addf %158, %163 : vector<64x256xf32>
    %c0_180 = arith.constant 0 : index
    %c1_181 = arith.constant 1 : index
    %c1_182 = arith.constant 1 : index
    %c0_183 = arith.constant 0 : index
    %165 = vector.load %arg14[%c0_180, %c1_181, %c1_182, %c0_183] : memref<2x6x10x128xf32, #tpu.memory_space<vmem>>, vector<2x4x8x128xf32>
    %166 = vector.shape_cast %165 : vector<2x4x8x128xf32> to vector<64x128xf32>
    %c4_184 = arith.constant 4 : index
    %c0_185 = arith.constant 0 : index
    %c0_186 = arith.constant 0 : index
    %167 = vector.load %arg6[%c4_184, %c0_185, %c0_186] : memref<9x128x256xf32, #tpu.memory_space<vmem>>, vector<1x128x256xf32>
    %168 = vector.shape_cast %167 : vector<1x128x256xf32> to vector<128x256xf32>
    %cst_187 = arith.constant dense<0.000000e+00> : vector<64x256xf32>
    %169 = tpu.matmul %166, %168, %cst_187 {dimension_numbers = #tpu.dot_dimension_numbers<[1], [0], [0], [1], [0, 0, 1, 1], [], []>} : vector<64x128xf32>, vector<128x256xf32>, vector<64x256xf32> -> vector<64x256xf32>
    %170 = arith.addf %164, %169 : vector<64x256xf32>
    %c0_188 = arith.constant 0 : index
    %c1_189 = arith.constant 1 : index
    %c2_190 = arith.constant 2 : index
    %c0_191 = arith.constant 0 : index
    %171 = vector.load %arg14[%c0_188, %c1_189, %c2_190, %c0_191] : memref<2x6x10x128xf32, #tpu.memory_space<vmem>>, vector<2x4x8x128xf32>
    %172 = vector.shape_cast %171 : vector<2x4x8x128xf32> to vector<64x128xf32>
    %c5_192 = arith.constant 5 : index
    %c0_193 = arith.constant 0 : index
    %c0_194 = arith.constant 0 : index
    %173 = vector.load %arg6[%c5_192, %c0_193, %c0_194] : memref<9x128x256xf32, #tpu.memory_space<vmem>>, vector<1x128x256xf32>
    %174 = vector.shape_cast %173 : vector<1x128x256xf32> to vector<128x256xf32>
    %cst_195 = arith.constant dense<0.000000e+00> : vector<64x256xf32>
    %175 = tpu.matmul %172, %174, %cst_195 {dimension_numbers = #tpu.dot_dimension_numbers<[1], [0], [0], [1], [0, 0, 1, 1], [], []>} : vector<64x128xf32>, vector<128x256xf32>, vector<64x256xf32> -> vector<64x256xf32>
    %176 = arith.addf %170, %175 : vector<64x256xf32>
    %c0_196 = arith.constant 0 : index
    %c2_197 = arith.constant 2 : index
    %c0_198 = arith.constant 0 : index
    %c0_199 = arith.constant 0 : index
    %177 = vector.load %arg14[%c0_196, %c2_197, %c0_198, %c0_199] : memref<2x6x10x128xf32, #tpu.memory_space<vmem>>, vector<2x4x8x128xf32>
    %178 = vector.shape_cast %177 : vector<2x4x8x128xf32> to vector<64x128xf32>
    %c6_200 = arith.constant 6 : index
    %c0_201 = arith.constant 0 : index
    %c0_202 = arith.constant 0 : index
    %179 = vector.load %arg6[%c6_200, %c0_201, %c0_202] : memref<9x128x256xf32, #tpu.memory_space<vmem>>, vector<1x128x256xf32>
    %180 = vector.shape_cast %179 : vector<1x128x256xf32> to vector<128x256xf32>
    %cst_203 = arith.constant dense<0.000000e+00> : vector<64x256xf32>
    %181 = tpu.matmul %178, %180, %cst_203 {dimension_numbers = #tpu.dot_dimension_numbers<[1], [0], [0], [1], [0, 0, 1, 1], [], []>} : vector<64x128xf32>, vector<128x256xf32>, vector<64x256xf32> -> vector<64x256xf32>
    %182 = arith.addf %176, %181 : vector<64x256xf32>
    %c0_204 = arith.constant 0 : index
    %c2_205 = arith.constant 2 : index
    %c1_206 = arith.constant 1 : index
    %c0_207 = arith.constant 0 : index
    %183 = vector.load %arg14[%c0_204, %c2_205, %c1_206, %c0_207] : memref<2x6x10x128xf32, #tpu.memory_space<vmem>>, vector<2x4x8x128xf32>
    %184 = vector.shape_cast %183 : vector<2x4x8x128xf32> to vector<64x128xf32>
    %c7_208 = arith.constant 7 : index
    %c0_209 = arith.constant 0 : index
    %c0_210 = arith.constant 0 : index
    %185 = vector.load %arg6[%c7_208, %c0_209, %c0_210] : memref<9x128x256xf32, #tpu.memory_space<vmem>>, vector<1x128x256xf32>
    %186 = vector.shape_cast %185 : vector<1x128x256xf32> to vector<128x256xf32>
    %cst_211 = arith.constant dense<0.000000e+00> : vector<64x256xf32>
    %187 = tpu.matmul %184, %186, %cst_211 {dimension_numbers = #tpu.dot_dimension_numbers<[1], [0], [0], [1], [0, 0, 1, 1], [], []>} : vector<64x128xf32>, vector<128x256xf32>, vector<64x256xf32> -> vector<64x256xf32>
    %188 = arith.addf %182, %187 : vector<64x256xf32>
    %c0_212 = arith.constant 0 : index
    %c2_213 = arith.constant 2 : index
    %c2_214 = arith.constant 2 : index
    %c0_215 = arith.constant 0 : index
    %189 = vector.load %arg14[%c0_212, %c2_213, %c2_214, %c0_215] : memref<2x6x10x128xf32, #tpu.memory_space<vmem>>, vector<2x4x8x128xf32>
    %190 = vector.shape_cast %189 : vector<2x4x8x128xf32> to vector<64x128xf32>
    %c8_216 = arith.constant 8 : index
    %c0_217 = arith.constant 0 : index
    %c0_218 = arith.constant 0 : index
    %191 = vector.load %arg6[%c8_216, %c0_217, %c0_218] : memref<9x128x256xf32, #tpu.memory_space<vmem>>, vector<1x128x256xf32>
    %192 = vector.shape_cast %191 : vector<1x128x256xf32> to vector<128x256xf32>
    %cst_219 = arith.constant dense<0.000000e+00> : vector<64x256xf32>
    %193 = tpu.matmul %190, %192, %cst_219 {dimension_numbers = #tpu.dot_dimension_numbers<[1], [0], [0], [1], [0, 0, 1, 1], [], []>} : vector<64x128xf32>, vector<128x256xf32>, vector<64x256xf32> -> vector<64x256xf32>
    %194 = arith.addf %188, %193 : vector<64x256xf32>
    %c0_220 = arith.constant 0 : index
    %c0_221 = arith.constant 0 : index
    %195 = vector.load %arg7[%c0_220, %c0_221] : memref<1x256xf32, #tpu.memory_space<vmem>>, vector<1x256xf32>
    %196 = vector.broadcast %195 : vector<1x256xf32> to vector<64x256xf32>
    %197 = arith.addf %194, %196 : vector<64x256xf32>
    %198 = vector.shape_cast %197 : vector<64x256xf32> to vector<4x2x8x256xf32>
    %199 = vector.extract_strided_slice %198 {offsets = [0, 0, 0, 0], sizes = [4, 1, 8, 256], strides = [1, 1, 1, 1]} : vector<4x2x8x256xf32> to vector<4x1x8x256xf32>
    %200 = vector.shape_cast %199 : vector<4x1x8x256xf32> to vector<4x8x256xf32>
    %201 = vector.extract_strided_slice %198 {offsets = [0, 1, 0, 0], sizes = [4, 1, 8, 256], strides = [1, 1, 1, 1]} : vector<4x2x8x256xf32> to vector<4x1x8x256xf32>
    %202 = vector.shape_cast %201 : vector<4x1x8x256xf32> to vector<4x8x256xf32>
    %203 = arith.maximumf %200, %202 : vector<4x8x256xf32>
    %204 = vector.shape_cast %203 : vector<4x8x256xf32> to vector<2x16x256xf32>
    %c0_222 = arith.constant 0 : index
    %c0_223 = arith.constant 0 : index
    %c0_224 = arith.constant 0 : index
    %205 = vector.load %arg17[%c0_222, %c0_223, %c0_224] : memref<2x16x256xf32, #tpu.memory_space<vmem>>, vector<2x16x256xf32>
    tpu.vector_store %arg17[%c0_222, %c0_223, %c0_224], %204 {strides = array<i32>} : memref<2x16x256xf32, #tpu.memory_space<vmem>>, vector<2x16x256xf32>,
    %cst_225 = arith.constant 0.000000e+00 : f32
    %206 = vector.broadcast %cst_225 : f32 to vector<2x128xf32>
    %c0_226 = arith.constant 0 : index
    %c0_227 = arith.constant 0 : index
    %c0_228 = arith.constant 0 : index
    %207 = vector.load %arg17[%c0_226, %c0_227, %c0_228] : memref<2x16x256xf32, #tpu.memory_space<vmem>>, vector<2x1x256xf32>
    %208 = vector.shape_cast %207 : vector<2x1x256xf32> to vector<2x256xf32>
    %c0_229 = arith.constant 0 : index
    %c1_230 = arith.constant 1 : index
    %c0_231 = arith.constant 0 : index
    %209 = vector.load %arg17[%c0_229, %c1_230, %c0_231] : memref<2x16x256xf32, #tpu.memory_space<vmem>>, vector<2x1x256xf32>
    %210 = vector.shape_cast %209 : vector<2x1x256xf32> to vector<2x256xf32>
    %211 = arith.maximumf %208, %210 : vector<2x256xf32>
    %cst_232 = arith.constant 0.000000e+00 : f32
    %212 = vector.broadcast %cst_232 : f32 to vector<2x256xf32>
    %213 = arith.maximumf %211, %212 : vector<2x256xf32>
    %c0_233 = arith.constant 0 : index
    %c0_234 = arith.constant 0 : index
    %c0_235 = arith.constant 0 : index
    %214 = vector.load %arg8[%c0_233, %c0_234, %c0_235] : memref<4x256x128xf32, #tpu.memory_space<vmem>>, vector<1x256x128xf32>
    %215 = vector.shape_cast %214 : vector<1x256x128xf32> to vector<256x128xf32>
    %cst_236 = arith.constant dense<0.000000e+00> : vector<2x128xf32>
    %216 = tpu.matmul %213, %215, %cst_236 {dimension_numbers = #tpu.dot_dimension_numbers<[1], [0], [0], [1], [0, 0, 1, 1], [], []>} : vector<2x256xf32>, vector<256x128xf32>, vector<2x128xf32> -> vector<2x128xf32>
    %217 = arith.addf %206, %216 : vector<2x128xf32>
    %c0_237 = arith.constant 0 : index
    %c2_238 = arith.constant 2 : index
    %c0_239 = arith.constant 0 : index
    %218 = vector.load %arg17[%c0_237, %c2_238, %c0_239] : memref<2x16x256xf32, #tpu.memory_space<vmem>>, vector<2x1x256xf32>
    %219 = vector.shape_cast %218 : vector<2x1x256xf32> to vector<2x256xf32>
    %c0_240 = arith.constant 0 : index
    %c3_241 = arith.constant 3 : index
    %c0_242 = arith.constant 0 : index
    %220 = vector.load %arg17[%c0_240, %c3_241, %c0_242] : memref<2x16x256xf32, #tpu.memory_space<vmem>>, vector<2x1x256xf32>
    %221 = vector.shape_cast %220 : vector<2x1x256xf32> to vector<2x256xf32>
    %222 = arith.maximumf %219, %221 : vector<2x256xf32>
    %cst_243 = arith.constant 0.000000e+00 : f32
    %223 = vector.broadcast %cst_243 : f32 to vector<2x256xf32>
    %224 = arith.maximumf %222, %223 : vector<2x256xf32>
    %c1_244 = arith.constant 1 : index
    %c0_245 = arith.constant 0 : index
    %c0_246 = arith.constant 0 : index
    %225 = vector.load %arg8[%c1_244, %c0_245, %c0_246] : memref<4x256x128xf32, #tpu.memory_space<vmem>>, vector<1x256x128xf32>
    %226 = vector.shape_cast %225 : vector<1x256x128xf32> to vector<256x128xf32>
    %cst_247 = arith.constant dense<0.000000e+00> : vector<2x128xf32>
    %227 = tpu.matmul %224, %226, %cst_247 {dimension_numbers = #tpu.dot_dimension_numbers<[1], [0], [0], [1], [0, 0, 1, 1], [], []>} : vector<2x256xf32>, vector<256x128xf32>, vector<2x128xf32> -> vector<2x128xf32>
    %228 = arith.addf %217, %227 : vector<2x128xf32>
    %c0_248 = arith.constant 0 : index
    %c8_249 = arith.constant 8 : index
    %c0_250 = arith.constant 0 : index
    %229 = vector.load %arg17[%c0_248, %c8_249, %c0_250] : memref<2x16x256xf32, #tpu.memory_space<vmem>>, vector<2x1x256xf32>
    %230 = vector.shape_cast %229 : vector<2x1x256xf32> to vector<2x256xf32>
    %c0_251 = arith.constant 0 : index
    %c9_252 = arith.constant 9 : index
    %c0_253 = arith.constant 0 : index
    %231 = vector.load %arg17[%c0_251, %c9_252, %c0_253] : memref<2x16x256xf32, #tpu.memory_space<vmem>>, vector<2x1x256xf32>
    %232 = vector.shape_cast %231 : vector<2x1x256xf32> to vector<2x256xf32>
    %233 = arith.maximumf %230, %232 : vector<2x256xf32>
    %cst_254 = arith.constant 0.000000e+00 : f32
    %234 = vector.broadcast %cst_254 : f32 to vector<2x256xf32>
    %235 = arith.maximumf %233, %234 : vector<2x256xf32>
    %c2_255 = arith.constant 2 : index
    %c0_256 = arith.constant 0 : index
    %c0_257 = arith.constant 0 : index
    %236 = vector.load %arg8[%c2_255, %c0_256, %c0_257] : memref<4x256x128xf32, #tpu.memory_space<vmem>>, vector<1x256x128xf32>
    %237 = vector.shape_cast %236 : vector<1x256x128xf32> to vector<256x128xf32>
    %cst_258 = arith.constant dense<0.000000e+00> : vector<2x128xf32>
    %238 = tpu.matmul %235, %237, %cst_258 {dimension_numbers = #tpu.dot_dimension_numbers<[1], [0], [0], [1], [0, 0, 1, 1], [], []>} : vector<2x256xf32>, vector<256x128xf32>, vector<2x128xf32> -> vector<2x128xf32>
    %239 = arith.addf %228, %238 : vector<2x128xf32>
    %c0_259 = arith.constant 0 : index
    %c10 = arith.constant 10 : index
    %c0_260 = arith.constant 0 : index
    %240 = vector.load %arg17[%c0_259, %c10, %c0_260] : memref<2x16x256xf32, #tpu.memory_space<vmem>>, vector<2x1x256xf32>
    %241 = vector.shape_cast %240 : vector<2x1x256xf32> to vector<2x256xf32>
    %c0_261 = arith.constant 0 : index
    %c11 = arith.constant 11 : index
    %c0_262 = arith.constant 0 : index
    %242 = vector.load %arg17[%c0_261, %c11, %c0_262] : memref<2x16x256xf32, #tpu.memory_space<vmem>>, vector<2x1x256xf32>
    %243 = vector.shape_cast %242 : vector<2x1x256xf32> to vector<2x256xf32>
    %244 = arith.maximumf %241, %243 : vector<2x256xf32>
    %cst_263 = arith.constant 0.000000e+00 : f32
    %245 = vector.broadcast %cst_263 : f32 to vector<2x256xf32>
    %246 = arith.maximumf %244, %245 : vector<2x256xf32>
    %c3_264 = arith.constant 3 : index
    %c0_265 = arith.constant 0 : index
    %c0_266 = arith.constant 0 : index
    %247 = vector.load %arg8[%c3_264, %c0_265, %c0_266] : memref<4x256x128xf32, #tpu.memory_space<vmem>>, vector<1x256x128xf32>
    %248 = vector.shape_cast %247 : vector<1x256x128xf32> to vector<256x128xf32>
    %cst_267 = arith.constant dense<0.000000e+00> : vector<2x128xf32>
    %249 = tpu.matmul %246, %248, %cst_267 {dimension_numbers = #tpu.dot_dimension_numbers<[1], [0], [0], [1], [0, 0, 1, 1], [], []>} : vector<2x256xf32>, vector<256x128xf32>, vector<2x128xf32> -> vector<2x128xf32>
    %250 = arith.addf %239, %249 : vector<2x128xf32>
    %c0_268 = arith.constant 0 : index
    %c0_269 = arith.constant 0 : index
    %251 = vector.load %arg9[%c0_268, %c0_269] : memref<1x128xf32, #tpu.memory_space<vmem>>, vector<1x128xf32>
    %252 = vector.broadcast %251 : vector<1x128xf32> to vector<2x128xf32>
    %253 = arith.addf %250, %252 : vector<2x128xf32>
    %cst_270 = arith.constant 0.000000e+00 : f32
    %254 = vector.broadcast %cst_270 : f32 to vector<2x128xf32>
    %255 = arith.maximumf %253, %254 : vector<2x128xf32>
    %c0_271 = arith.constant 0 : index
    %c0_272 = arith.constant 0 : index
    %256 = vector.load %arg10[%c0_271, %c0_272] : memref<128x2xf32, #tpu.memory_space<vmem>>, vector<128x2xf32>
    %cst_273 = arith.constant dense<0.000000e+00> : vector<2x2xf32>
    %257 = tpu.matmul %255, %256, %cst_273 {dimension_numbers = #tpu.dot_dimension_numbers<[1], [0], [0], [1], [0, 0, 1, 1], [], []>} : vector<2x128xf32>, vector<128x2xf32>, vector<2x2xf32> -> vector<2x2xf32>
    %c0_274 = arith.constant 0 : index
    %c0_275 = arith.constant 0 : index
    %258 = vector.load %arg11[%c0_274, %c0_275] : memref<1x2xf32, #tpu.memory_space<vmem>>, vector<1x2xf32>
    %259 = vector.broadcast %258 : vector<1x2xf32> to vector<2x2xf32>
    %260 = arith.addf %257, %259 : vector<2x2xf32>
    %c0_276 = arith.constant 0 : index
    %c0_277 = arith.constant 0 : index
    %c0_278 = arith.constant 0 : index
    %261 = vector.load %arg12[%c0_276, %c0_277, %c0_278] : memref<1x2x2xf32, #tpu.memory_space<vmem>>, vector<1x2x2xf32>
    %262 = vector.shape_cast %261 : vector<1x2x2xf32> to vector<2x2xf32>
    %263 = vector.shape_cast %260 : vector<2x2xf32> to vector<1x2x2xf32>
    tpu.vector_store %arg12[%c0_276, %c0_277, %c0_278], %263 {strides = array<i32>} : memref<1x2x2xf32, #tpu.memory_space<vmem>>, vector<1x2x2xf32>,
    return
  }
  func.func @transform_0(%arg0: i32) -> (i32, i32, i32, i32) {
    %c0_i32 = arith.constant 0 : i32
    %c0_i32_0 = arith.constant 0 : i32
    %c0_i32_1 = arith.constant 0 : i32
    %c0_i32_2 = arith.constant 0 : i32
    return %arg0, %c0_i32, %c0_i32_0, %c0_i32_1 : i32, i32, i32, i32
  }
  func.func @transform_1(%arg0: i32) -> (i32, i32) {
    %c0_i32 = arith.constant 0 : i32
    %c0_i32_0 = arith.constant 0 : i32
    %c0_i32_1 = arith.constant 0 : i32
    return %c0_i32, %c0_i32_0 : i32, i32
  }
  func.func @transform_2(%arg0: i32) -> (i32, i32) {
    %c0_i32 = arith.constant 0 : i32
    %c0_i32_0 = arith.constant 0 : i32
    %c0_i32_1 = arith.constant 0 : i32
    return %c0_i32, %c0_i32_0 : i32, i32
  }
  func.func @transform_3(%arg0: i32) -> (i32, i32, i32) {
    %c0_i32 = arith.constant 0 : i32
    %c0_i32_0 = arith.constant 0 : i32
    %c0_i32_1 = arith.constant 0 : i32
    %c0_i32_2 = arith.constant 0 : i32
    return %c0_i32, %c0_i32_0, %c0_i32_1 : i32, i32, i32
  }
  func.func @transform_4(%arg0: i32) -> (i32, i32) {
    %c0_i32 = arith.constant 0 : i32
    %c0_i32_0 = arith.constant 0 : i32
    %c0_i32_1 = arith.constant 0 : i32
    return %c0_i32, %c0_i32_0 : i32, i32
  }
  func.func @transform_5(%arg0: i32) -> (i32, i32, i32) {
    %c0_i32 = arith.constant 0 : i32
    %c0_i32_0 = arith.constant 0 : i32
    %c0_i32_1 = arith.constant 0 : i32
    %c0_i32_2 = arith.constant 0 : i32
    return %c0_i32, %c0_i32_0, %c0_i32_1 : i32, i32, i32
  }
  func.func @transform_6(%arg0: i32) -> (i32, i32) {
    %c0_i32 = arith.constant 0 : i32
    %c0_i32_0 = arith.constant 0 : i32
    %c0_i32_1 = arith.constant 0 : i32
    return %c0_i32, %c0_i32_0 : i32, i32
  }
  func.func @transform_7(%arg0: i32) -> (i32, i32, i32) {
    %c0_i32 = arith.constant 0 : i32
    %c0_i32_0 = arith.constant 0 : i32
    %c0_i32_1 = arith.constant 0 : i32
    %c0_i32_2 = arith.constant 0 : i32
    return %c0_i32, %c0_i32_0, %c0_i32_1 : i32, i32, i32
  }
  func.func @transform_8(%arg0: i32) -> (i32, i32) {
    %c0_i32 = arith.constant 0 : i32
    %c0_i32_0 = arith.constant 0 : i32
    %c0_i32_1 = arith.constant 0 : i32
    return %c0_i32, %c0_i32_0 : i32, i32
  }
  func.func @transform_9(%arg0: i32) -> (i32, i32) {
    %c0_i32 = arith.constant 0 : i32
    %c0_i32_0 = arith.constant 0 : i32
    %c0_i32_1 = arith.constant 0 : i32
    return %c0_i32, %c0_i32_0 : i32, i32
  }
  func.func @transform_10(%arg0: i32) -> (i32, i32) {
    %c0_i32 = arith.constant 0 : i32
    %c0_i32_0 = arith.constant 0 : i32
    %c0_i32_1 = arith.constant 0 : i32
    return %c0_i32, %c0_i32_0 : i32, i32
  }
  func.func @transform_11(%arg0: i32) -> (i32, i32, i32) {
    %c0_i32 = arith.constant 0 : i32
    %c0_i32_0 = arith.constant 0 : i32
    %c0_i32_1 = arith.constant 0 : i32
    return %arg0, %c0_i32, %c0_i32_0 : i32, i32, i32
  }
}

</mosaic_0001>

<bundles_post_ra>
// kernel: forward.1
= control target key start
LH: loop header
LB: loop body
LE: loop exit
PB: predicated region body
PF: predicated region fallthrough
CT: control target
= control target key end

     0   :  { %s7399_s17 = smov 0   ;;  %s10542_s0 = inlined_call_operand.vmem [shape: f32[4,16,16,36], index: 0, kind: input, shape index: {}]   ;;  %s10543_s1 = inlined_call_operand.vmem [shape: f32[36,64], index: 1, kind: input, shape index: {}]   ;;  %s10544_s2 = inlined_call_operand.vmem [shape: f32[1,64], index: 2, kind: input, shape index: {}]   ;;  %s10545_s3 = inlined_call_operand.vmem [shape: f32[9,64,128], index: 3, kind: input, shape index: {}]   ;;  %s10546_s4 = inlined_call_operand.vmem [shape: f32[1,128], index: 4, kind: input, shape index: {}]   ;;  %s10547_s5 = inlined_call_operand.vmem [shape: f32[9,128,256], index: 5, kind: input, shape index: {}]   ;;  %s10548_s6 = inlined_call_operand.vmem [shape: f32[1,256], index: 6, kind: input, shape index: {}]   ;;  %s10549_s7 = inlined_call_operand.vmem [shape: f32[4,256,128], index: 7, kind: input, shape index: {}]   ;;  %s10550_s8 = inlined_call_operand.vmem [shape: f32[1,128], index: 8, kind: input, shape index: {}]   ;;  %s10551_s9 = inlined_call_operand.vmem [shape: f32[128,2], index: 9, kind: input, shape index: {}]   ;;  %s10552_s10 = inlined_call_operand.vmem [shape: f32[1,2], index: 10, kind: input, shape index: {}]   ;;  %s10553_s11 = inlined_call_operand.vmem [shape: f32[2,2,2], index: 11, kind: output, shape index: {}]  }
   0x1 LB: > { %s7405_s18 = sadd.s32 4294967295, %s7334_s17   ;;  %p5727_p0 = scmp.ge.s32.totalorder %s7334_s17, 1  ;;  %s7334_s17 = sphi %s7399_s17, %s21_s17  }
   0x2   : > { %p339_p1 = scmp.lt.s32.totalorder %s7334_s17, 3 }
   0x4   : > { %p340_p2 = pnand %p5727_p0, %p339_p1 }
   0x6   : > { %343 = sbr.rel (%p340_p2) target bundleno = 1542 (0x606), region = 64 }
   0xb   : > { %v543_v0 = vld [vmem:[%s10543_s1 + $0x20] sm:$0xf]  ;;  %vm744_vm0 = vcmask 1043456   ;;  %v542_v1 = vld [vmem:[%s10543_s1 + $0x18] sm:$0xff]  ;;  %s5728_s23 = sshll.u32 %s7405_s18, 1  ;;  %v541_v2 = vld [vmem:[%s10543_s1 + $0x10] sm:$0xff] }
   0xc   : > { %6806 = vmatprep.subr.msk.mxu0 %vm744_vm0, %v543_v0  ;;  %p380_p3 = scmp.lt.s32.totalorder %s5728_s23, 3  ;;  %7307 = vmatprep.subr.msk.mxu1 %vm744_vm0, %v543_v0  ;;  %v540_v3 = vld [vmem:[%s10543_s1 + $0x8] sm:$0xff]  ;;  %vm551_vm1 = vcmask 293888   ;;  %v539_v4 = vld [vmem:[%s10543_s1] sm:$0xff]  ;;  %v5805_v56 = vld [vmem:[%s10545_s3 + $0x78] sm:$0xff]  ;;  %vm390_vm2 = vcmask 523264  }
   0xd   : > { %6807 = vmatpush3.msk.msra.mxu0 %vm744_vm0, %v543_v0  ;;  %7312 = vmatpush3.msk.msra.mxu1 %vm744_vm0, %v543_v0  ;;  %v5804_v57 = vld [vmem:[%s10545_s3 + $0x70] sm:$0xff]  ;;  %v5803_v60 = vld [vmem:[%s10545_s3 + $0x68] sm:$0xff]  ;;  %v5802_v61 = vld [vmem:[%s10545_s3 + $0x60] sm:$0xff]  ;;  %vm392_vm3 = vcmask 517120   ;;  %vm401_vm4 = vcmask 516096   ;;  %vm7338_vm5 = vmmov 0  }
   0xe   : > { %6808 = vmatprep.subr.mxu0 %v542_v1  ;;  %s10698_s23 = smov (!%p380_p3, %s5728_s23), 3  ;;  %7308 = vmatprep.subr.mxu1 %v542_v1  ;;  %v7557_v0 = vld [vmem:[%s10545_s3 + $0x58] sm:$0xff]  ;;  %p386_p4 = scmp.lt.s32.totalorder %s7405_s18, 1  ;;  %vm5668_vm6 = vcmask 9216  }
   0xf   : > { %6809 = vmatpush3.msra.mxu0 %v542_v1  ;;  %7313 = vmatpush3.msra.mxu1 %v542_v1  ;;  %s6363_s28 = sshll.u32 %s10698_s23, 8  ;;  %v7562_v1 = vld [vmem:[%s10545_s3 + $0x138] sm:$0xff] }
  0x10   : > { %6810 = vmatprep.subr.mxu0 %v541_v2  ;;  %7309 = vmatprep.subr.mxu1 %v541_v2  ;;  %s7428_s14 = scalar_lea.vmem %s10542_s0, %s6363_s28  ;;  %s10700_s18 = smov (!%p386_p4, %s7405_s18), 1 }
  0x11   : > { %6811 = vmatpush3.msra.mxu0 %v541_v2  ;;  %7314 = vmatpush3.msra.mxu1 %v541_v2  ;;  %v475_v5 = vld [vmem:[%s7428_s14] sm:$0xff]  ;;  %v476_v6 = vld [vmem:[%s7428_s14 + $0x8] sm:$0xff]  ;;  %v477_v7 = vld [vmem:[%s7428_s14 + $0x10] sm:$0xff]  ;;  %v10554_v2 = vmov 0.0   ;;  %s5731_s12 = sshll.u32 %s10700_s18, 1 }
  0x12   : > { %6812 = vmatprep.subr.mxu0 %v540_v3  ;;  %7310 = vmatprep.subr.mxu1 %v540_v3  ;;  %v478_v8 = vld [vmem:[%s7428_s14 + $0x18] sm:$0xff]  ;;  %v479_v9 = vld [vmem:[%s7428_s14 + $0x20] sm:$0xff]  ;;  %v480_v10 = vld [vmem:[%s7428_s14 + $0x28] sm:$0xff]  ;;  %391 = vst.msk [vmem:[#allocation2] sm:$0xff] %vm390_vm2, %v10554_v2  ;;  %s389_s20 = scalar_lea.vmem %s10553_s11, %s5731_s12 }
  0x13   : > { %6813 = vmatpush3.msra.mxu0 %v540_v3  ;;  %6816 = vmatprep.mubr.msk.f32.mxu0 %vm551_vm1, %v475_v5  ;;  %v481_v11 = vld [vmem:[%s7428_s14 + $0x30] sm:$0xff]  ;;  %v482_v12 = vld [vmem:[%s7428_s14 + $0x38] sm:$0xff]  ;;  %v483_v13 = vld [vmem:[%s7428_s14 + $0x40] sm:$0xff]  ;;  %393 = vst.msk [vmem:[#allocation2 + $0x8] sm:$0x3] %vm392_vm3, %v10554_v2 }
  0x14   : > { %6814 = vmatprep.subr.mxu0 %v539_v4  ;;  %7315 = vmatpush3.msra.mxu1 %v540_v3  ;;  %v531_v14 = vld [vmem:[%s7428_s14 + $0x1c0] sm:$0xff]  ;;  %v484_v15 = vld [vmem:[%s7428_s14 + $0x48] sm:$0xff]  ;;  %v485_v17 = vld [vmem:[%s7428_s14 + $0x50] sm:$0xff]  ;;  %394 = vst.msk [vmem:[#allocation2 + $0xa0] sm:$0xff] %vm390_vm2, %v10554_v2 }
  0x15   : > { %6815 = vmatpush3.msra.mxu0 %v539_v4  ;;  %7311 = vmatprep.subr.mxu1 %v539_v4  ;;  %v532_v16 = vld [vmem:[%s7428_s14 + $0x1c8] sm:$0xff]  ;;  %v533_v18 = vld [vmem:[%s7428_s14 + $0x1d0] sm:$0xff]  ;;  %v534_v19 = vld [vmem:[%s7428_s14 + $0x1d8] sm:$0xff]  ;;  %395 = vst.msk [vmem:[#allocation2 + $0xa8] sm:$0x3] %vm392_vm3, %v10554_v2 }
  0x16   : > { %6817 = vmatmul.mubr.msk.f32.vlgmr.msra.gmra.mxu0 %vm551_vm1, %v476_v6  ;;  %7316 = vmatpush3.msra.mxu1 %v539_v4  ;;  %v535_v20 = vld [vmem:[%s7428_s14 + $0x1e0] sm:$0xff]  ;;  %v486_v21 = vld [vmem:[%s7428_s14 + $0x58] sm:$0xff]  ;;  %v536_v23 = vld [vmem:[%s7428_s14 + $0x1e8] sm:$0xff]  ;;  %397 = vst.msk [vmem:[#allocation2 + $0x90] sm:$0xff] %vm390_vm2, %v10554_v2 }
  0x17   : > { %6819 = vmatprep.mubr.msk.f32.mxu0 %vm551_vm1, %v477_v7  ;;  %6900 = vmatprep.mubr.msk.f32.mxu1 %vm551_vm1, %v531_v14  ;;  %v487_v22 = vld [vmem:[%s7428_s14 + $0x60] sm:$0xff]  ;;  %v537_v24 = vld [vmem:[%s7428_s14 + $0x1f0] sm:$0xff]  ;;  %v488_v25 = vld [vmem:[%s7428_s14 + $0x68] sm:$0xff]  ;;  %398 = vst.msk [vmem:[#allocation2 + $0x98] sm:$0x3] %vm392_vm3, %v10554_v2 }
  0x18   : > { %6901 = vmatmul.mubr.msk.f32.vlgmr.msra.gmra.mxu1 %vm551_vm1, %v532_v16  ;;  %v489_v26 = vld [vmem:[%s7428_s14 + $0x70] sm:$0xff]  ;;  %v538_v27 = vld [vmem:[%s7428_s14 + $0x1f8] sm:$0xff]  ;;  %v491_v29 = vld [vmem:[%s7428_s14 + $0x80] sm:$0xff]  ;;  %6912 = vmatprep.subr.mxu1 %v5805_v56  ;;  %399 = vst.msk [vmem:[#allocation2 + $0x130] sm:$0xff] %vm390_vm2, %v10554_v2 }
  0x19   : > { %6903 = vmatprep.mubr.msk.f32.mxu1 %vm551_vm1, %v533_v18  ;;  %v490_v28 = vld [vmem:[%s7428_s14 + $0x78] sm:$0xff]  ;;  %v492_v30 = vld [vmem:[%s7428_s14 + $0x88] sm:$0xff]  ;;  %v493_v31 = vld [vmem:[%s7428_s14 + $0x90] sm:$0xff]  ;;  %6913 = vmatpush3.msra.mxu1 %v5805_v56  ;;  %400 = vst.msk [vmem:[#allocation2 + $0x138] sm:$0x3] %vm392_vm3, %v10554_v2 }
  0x1a   : > { %6820 = vmatmul.mubr.msk.f32.gmra.mxu0 %vm551_vm1, %v478_v8  ;;  %v494_v32 = vld [vmem:[%s7428_s14 + $0x98] sm:$0xff]  ;;  %v495_v33 = vld [vmem:[%s7428_s14 + $0xa0] sm:$0xff]  ;;  %v496_v34 = vld [vmem:[%s7428_s14 + $0xa8] sm:$0xff]  ;;  %6914 = vmatprep.subr.mxu1 %v5804_v57  ;;  %442 = vst [vmem:[#allocation3] sm:$0xff] %v10554_v2 }
  0x1b   : > { %6822 = vmatprep.mubr.msk.f32.mxu0 %vm551_vm1, %v479_v9  ;;  %v497_v35 = vld [vmem:[%s7428_s14 + $0xb0] sm:$0xff]  ;;  %v498_v36 = vld [vmem:[%s7428_s14 + $0xb8] sm:$0xff]  ;;  %v499_v37 = vld [vmem:[%s7428_s14 + $0xc0] sm:$0xff]  ;;  %6915 = vmatpush3.msra.mxu1 %v5804_v57  ;;  %443 = vst [vmem:[#allocation3 + $0x8] sm:$0x3] %v10554_v2 }
  0x1c   : > { %6904 = vmatmul.mubr.msk.f32.gmra.mxu1 %vm551_vm1, %v534_v19  ;;  %v500_v38 = vld [vmem:[%s7428_s14 + $0xc8] sm:$0xff]  ;;  %v501_v39 = vld [vmem:[%s7428_s14 + $0xd0] sm:$0xff]  ;;  %v502_v40 = vld [vmem:[%s7428_s14 + $0xd8] sm:$0xff]  ;;  %6916 = vmatprep.subr.mxu1 %v5803_v60  ;;  %444 = vst [vmem:[#allocation3 + $0x60] sm:$0xff] %v10554_v2 }
  0x1d   : > { %6906 = vmatprep.mubr.msk.f32.mxu1 %vm551_vm1, %v535_v20  ;;  %v503_v41 = vld [vmem:[%s7428_s14 + $0xe0] sm:$0xff]  ;;  %v504_v42 = vld [vmem:[%s7428_s14 + $0xe8] sm:$0xff]  ;;  %v505_v43 = vld [vmem:[%s7428_s14 + $0xf0] sm:$0xff]  ;;  %6917 = vmatpush3.msra.mxu1 %v5803_v60  ;;  %445 = vst [vmem:[#allocation3 + $0x68] sm:$0x3] %v10554_v2 }
  0x1e   : > { %6823 = vmatmul.mubr.msk.f32.gmra.mxu0 %vm551_vm1, %v480_v10  ;;  %v506_v44 = vld [vmem:[%s7428_s14 + $0xf8] sm:$0xff]  ;;  %v507_v45 = vld [vmem:[%s7428_s14 + $0x100] sm:$0xff]  ;;  %v508_v46 = vld [vmem:[%s7428_s14 + $0x108] sm:$0xff]  ;;  %6918 = vmatprep.subr.mxu1 %v5802_v61  ;;  %447 = vst [vmem:[#allocation3 + $0x50] sm:$0xff] %v10554_v2 }
  0x1f   : > { %6825 = vmatprep.mubr.msk.f32.mxu0 %vm551_vm1, %v481_v11  ;;  %v509_v47 = vld [vmem:[%s7428_s14 + $0x110] sm:$0xff]  ;;  %v510_v48 = vld [vmem:[%s7428_s14 + $0x118] sm:$0xff]  ;;  %v511_v49 = vld [vmem:[%s7428_s14 + $0x120] sm:$0xff]  ;;  %6919 = vmatpush3.msra.mxu1 %v5802_v61  ;;  %448 = vst [vmem:[#allocation3 + $0x58] sm:$0x3] %v10554_v2 }
  0x20   : > { %6907 = vmatmul.mubr.msk.f32.gmra.mxu1 %vm551_vm1, %v536_v23  ;;  %v512_v50 = vld [vmem:[%s7428_s14 + $0x128] sm:$0xff]  ;;  %v513_v51 = vld [vmem:[%s7428_s14 + $0x130] sm:$0xff]  ;;  %v514_v52 = vld [vmem:[%s7428_s14 + $0x138] sm:$0xff]  ;;  %449 = vst [vmem:[#allocation3 + $0xb0] sm:$0xff] %v10554_v2  ;;  %6920 = vmatprep.subr.mxu1 %v7557_v0 }
  0x21   : > { %6909 = vmatprep.mubr.msk.f32.mxu1 %vm551_vm1, %v537_v24  ;;  %v515_v53 = vld [vmem:[%s7428_s14 + $0x140] sm:$0xff]  ;;  %v516_v54 = vld [vmem:[%s7428_s14 + $0x148] sm:$0xff]  ;;  %v517_v55 = vld [vmem:[%s7428_s14 + $0x150] sm:$0xff]  ;;  %450 = vst [vmem:[#allocation3 + $0xb8] sm:$0x3] %v10554_v2  ;;  %7072 = vmatprep.subr.mxu0 %v7562_v1 }
  0x22   : > { %6826 = vmatmul.mubr.msk.f32.gmra.mxu0 %vm551_vm1, %v482_v12  ;;  %v518_v58 = vld [vmem:[%s7428_s14 + $0x158] sm:$0xff]  ;;  %v519_v59 = vld [vmem:[%s7428_s14 + $0x160] sm:$0xff]  ;;  %v7549_v62 = vld [vmem:[%s7428_s14 + $0x168] sm:$0xff]  ;;  %452 = vst [vmem:[#allocation3 + $0x10] sm:$0x1] %v10554_v2  ;;  %6921 = vmatpush3.msra.mxu1 %v7557_v0 }
  0x23   : > { %6828 = vmatprep.mubr.msk.f32.mxu0 %vm551_vm1, %v483_v13  ;;  %v7552_v63 = vld [vmem:[%s7428_s14 + $0x170] sm:$0xff]  ;;  %453 = vst [vmem:[#allocation3 + $0x20] sm:$0x1] %v10554_v2  ;;  %454 = vst [vmem:[#allocation3 + $0x30] sm:$0x1] %v10554_v2  ;;  %v522_v5 = vld [vmem:[%s7428_s14 + $0x178] sm:$0xff]  ;;  %7073 = vmatpush3.msra.mxu0 %v7562_v1 }
  0x24   : > { %6910 = vmatmul.mubr.msk.f32.gmra.mxu1 %vm551_vm1, %v538_v27  ;;  %455 = vst [vmem:[#allocation3 + $0x40] sm:$0x1] %v10554_v2  ;;  %458 = vst [vmem:[#allocation3 + $0x70] sm:$0x1] %v10554_v2  ;;  %v5800_v3 = vld [vmem:[%s10545_s3 + $0x50] sm:$0xff]  ;;  %v523_v6 = vld [vmem:[%s7428_s14 + $0x180] sm:$0xff] }
  0x25   : > { %459 = vst [vmem:[#allocation3 + $0x80] sm:$0x1] %v10554_v2  ;;  %460 = vst [vmem:[#allocation3 + $0x90] sm:$0x1] %v10554_v2  ;;  %v5892_v4 = vld [vmem:[%s10545_s3 + $0x130] sm:$0xff]  ;;  %6922 = vmatprep.subr.mxu1 %v5800_v3  ;;  %v5799_v7 = vld [vmem:[%s10545_s3 + $0x48] sm:$0xff] }
  0x26   : > { %6829 = vmatmul.mubr.msk.f32.gmra.mxu0 %vm551_vm1, %v484_v15  ;;  %461 = vst [vmem:[#allocation3 + $0xa0] sm:$0x1] %v10554_v2  ;;  %464 = vst [vmem:[#allocation3 + $0x15] sm:$0x1f] %v10554_v2  ;;  %7074 = vmatprep.subr.mxu0 %v5892_v4  ;;  %v5891_v8 = vld [vmem:[%s10545_s3 + $0x128] sm:$0xff]  ;;  %v5798_v9 = vld [vmem:[%s10545_s3 + $0x40] sm:$0xff] }
  0x27   : > { %6831 = vmatprep.mubr.msk.f32.mxu0 %vm551_vm1, %v485_v17  ;;  %465 = vst [vmem:[#allocation3 + $0x25] sm:$0x1f] %v10554_v2  ;;  %466 = vst [vmem:[#allocation3 + $0x35] sm:$0x1f] %v10554_v2  ;;  %6923 = vmatpush3.msra.mxu1 %v5800_v3  ;;  %v5890_v10 = vld [vmem:[%s10545_s3 + $0x120] sm:$0xff]  ;;  %v524_v11 = vld [vmem:[%s7428_s14 + $0x188] sm:$0xff] }
  0x28   : > { %467 = vst [vmem:[#allocation3 + $0x45] sm:$0x1f] %v10554_v2  ;;  %470 = vst [vmem:[#allocation3 + $0x75] sm:$0x1f] %v10554_v2  ;;  %7075 = vmatpush3.msra.mxu0 %v5892_v4  ;;  %6924 = vmatprep.subr.mxu1 %v5799_v7  ;;  %v525_v12 = vld [vmem:[%s7428_s14 + $0x190] sm:$0xff]  ;;  %v1333_v13 = vld [vmem:[#allocation2 + $0x1] sm:$0xff] }
  0x29   : > { %471 = vst [vmem:[#allocation3 + $0x85] sm:$0x1f] %v10554_v2  ;;  %472 = vst [vmem:[#allocation3 + $0x95] sm:$0x1f] %v10554_v2  ;;  %7076 = vmatprep.subr.mxu0 %v5891_v8  ;;  %6925 = vmatpush3.msra.mxu1 %v5799_v7  ;;  %v5889_v14 = vld [vmem:[%s10545_s3 + $0x118] sm:$0xff]  ;;  %v527_v16 = vld [vmem:[%s7428_s14 + $0x1a0] sm:$0xff] }
  0x2a   : > { %6832 = vmatmul.mubr.msk.f32.gmra.mxu0 %vm551_vm1, %v486_v21  ;;  %473 = vst [vmem:[#allocation3 + $0xa5] sm:$0x1f] %v10554_v2  ;;  %451 = vst [vmem:[#allocation3] sm:$0x1] %v10554_v2  ;;  %6926 = vmatprep.subr.mxu1 %v5798_v9  ;;  %v526_v15 = vld [vmem:[%s7428_s14 + $0x198] sm:$0xff]  ;;  %v5888_v17 = vld [vmem:[%s10545_s3 + $0x110] sm:$0xff] }
  0x2b   : > { %6834 = vmatprep.mubr.msk.f32.mxu0 %vm551_vm1, %v487_v22  ;;  %456 = vst [vmem:[#allocation3 + $0x50] sm:$0x1] %v10554_v2  ;;  %457 = vst [vmem:[#allocation3 + $0x60] sm:$0x1] %v10554_v2  ;;  %7077 = vmatpush3.msra.mxu0 %v5891_v8  ;;  %v528_v18 = vld [vmem:[%s7428_s14 + $0x1a8] sm:$0xff]  ;;  %v529_v20 = vld [vmem:[%s7428_s14 + $0x1b0] sm:$0xff] }
  0x2c   : > { %462 = vst [vmem:[#allocation3 + $0xb0] sm:$0x1] %v10554_v2  ;;  %463 = vst [vmem:[#allocation3 + $0x5] sm:$0x1f] %v10554_v2  ;;  %7078 = vmatprep.subr.mxu0 %v5890_v10  ;;  %6927 = vmatpush3.msra.mxu1 %v5798_v9  ;;  %v5887_v19 = vld [vmem:[%s10545_s3 + $0x108] sm:$0xff]  ;;  %v5886_v21 = vld [vmem:[%s10545_s3 + $0x100] sm:$0xff] }
  0x2d   : > { %468 = vst [vmem:[#allocation3 + $0x55] sm:$0x1f] %v10554_v2  ;;  %469 = vst [vmem:[#allocation3 + $0x65] sm:$0x1f] %v10554_v2  ;;  %6928 = vmatprep.mubr.msk.f32.mxu1 %vm390_vm2, %v1333_v13  ;;  %7079 = vmatpush3.msra.mxu0 %v5890_v10  ;;  %v530_v22 = vld [vmem:[%s7428_s14 + $0x1b8] sm:$0xff] }
  0x2e   : > { %6835 = vmatmul.mubr.msk.f32.gmra.mxu0 %vm551_vm1, %v488_v25  ;;  %474 = vst [vmem:[#allocation3 + $0xb5] sm:$0x1f] %v10554_v2  ;;  %402 = vst.msk [vmem:[#allocation2] sm:$0x1] %vm401_vm4, %v10554_v2  ;;  %7080 = vmatprep.subr.mxu0 %v5889_v14  ;;  %v7748_v23 = vld [vmem:[%s10545_s3 + $0x38] sm:$0xff] }
  0x2f   : > { %6837 = vmatprep.mubr.msk.f32.mxu0 %vm551_vm1, %v489_v26  ;;  %403 = vst.msk [vmem:[#allocation2 + $0x10] sm:$0x1] %vm401_vm4, %v10554_v2  ;;  %404 = vst.msk [vmem:[#allocation2 + $0x20] sm:$0x1] %vm401_vm4, %v10554_v2  ;;  %7081 = vmatpush3.msra.mxu0 %v5889_v14  ;;  %v7754_v24 = vld [vmem:[%s10545_s3 + $0x1b8] sm:$0xff] }
  0x30   : > { %405 = vst.msk [vmem:[#allocation2 + $0x30] sm:$0x1] %vm401_vm4, %v10554_v2  ;;  %406 = vst.msk [vmem:[#allocation2 + $0x40] sm:$0x1] %vm401_vm4, %v10554_v2  ;;  %7082 = vmatprep.subr.mxu0 %v5888_v17  ;;  %6952 = vmatprep.subr.mxu1 %v7748_v23  ;;  %v7760_v26 = vld [vmem:[%s10544_s2] ss:$0 sm:$0xff] }
  0x31   : > { %407 = vst.msk [vmem:[#allocation2 + $0x50] sm:$0x1] %vm401_vm4, %v10554_v2  ;;  %408 = vst.msk [vmem:[#allocation2 + $0x60] sm:$0x1] %vm401_vm4, %v10554_v2  ;;  %7083 = vmatpush3.msra.mxu0 %v5888_v17 }
  0x32   : > { %6838 = vmatmul.mubr.msk.f32.gmra.mxu0 %vm551_vm1, %v490_v28  ;;  %409 = vst.msk [vmem:[#allocation2 + $0x70] sm:$0x1] %vm401_vm4, %v10554_v2  ;;  %410 = vst.msk [vmem:[#allocation2 + $0x80] sm:$0x1] %vm401_vm4, %v10554_v2  ;;  %7084 = vmatprep.subr.mxu0 %v5887_v19 }
  0x33   : > { %6840 = vmatprep.mubr.msk.f32.mxu0 %vm551_vm1, %v491_v29  ;;  %411 = vst.msk [vmem:[#allocation2 + $0x90] sm:$0x1] %vm401_vm4, %v10554_v2  ;;  %412 = vst.msk [vmem:[#allocation2 + $0xa0] sm:$0x1] %vm401_vm4, %v10554_v2  ;;  %7085 = vmatpush3.msra.mxu0 %v5887_v19 }
  0x34   : > { %413 = vst.msk [vmem:[#allocation2 + $0xb0] sm:$0x1] %vm401_vm4, %v10554_v2  ;;  %414 = vst.msk [vmem:[#allocation2 + $0xc0] sm:$0x1] %vm401_vm4, %v10554_v2  ;;  %7086 = vmatprep.subr.mxu0 %v5886_v21 }
  0x35   : > { %415 = vst.msk [vmem:[#allocation2 + $0xd0] sm:$0x1] %vm401_vm4, %v10554_v2  ;;  %416 = vst.msk [vmem:[#allocation2 + $0xe0] sm:$0x1] %vm401_vm4, %v10554_v2  ;;  %7087 = vmatpush3.msra.mxu0 %v5886_v21 }
  0x36   : > { %6841 = vmatmul.mubr.msk.f32.gmra.mxu0 %vm551_vm1, %v492_v30  ;;  %417 = vst.msk [vmem:[#allocation2 + $0xf0] sm:$0x1] %vm401_vm4, %v10554_v2  ;;  %418 = vst.msk [vmem:[#allocation2 + $0x100] sm:$0x1] %vm401_vm4, %v10554_v2  ;;  %7152 = vmatprep.subr.mxu0 %v7754_v24 }
  0x37   : > { %6843 = vmatprep.mubr.msk.f32.mxu0 %vm551_vm1, %v493_v31  ;;  %419 = vst.msk [vmem:[#allocation2 + $0x110] sm:$0x1] %vm401_vm4, %v10554_v2  ;;  %420 = vst.msk [vmem:[#allocation2 + $0x120] sm:$0x1] %vm401_vm4, %v10554_v2 }
  0x38   : > { %421 = vst.msk [vmem:[#allocation2 + $0x130] sm:$0x1] %vm401_vm4, %v10554_v2  ;;  %422 = vst.msk [vmem:[#allocation2 + $0x9] sm:$0x1] %vm401_vm4, %v10554_v2 }
  0x39   : > { %423 = vst.msk [vmem:[#allocation2 + $0x19] sm:$0x1] %vm401_vm4, %v10554_v2  ;;  %424 = vst.msk [vmem:[#allocation2 + $0x29] sm:$0x1] %vm401_vm4, %v10554_v2 }
  0x3a   : > { %6844 = vmatmul.mubr.msk.f32.gmra.mxu0 %vm551_vm1, %v494_v32  ;;  %425 = vst.msk [vmem:[#allocation2 + $0x39] sm:$0x1] %vm401_vm4, %v10554_v2  ;;  %426 = vst.msk [vmem:[#allocation2 + $0x49] sm:$0x1] %vm401_vm4, %v10554_v2 }
  0x3b   : > { %6846 = vmatprep.mubr.msk.f32.mxu0 %vm551_vm1, %v495_v33  ;;  %427 = vst.msk [vmem:[#allocation2 + $0x59] sm:$0x1] %vm401_vm4, %v10554_v2  ;;  %428 = vst.msk [vmem:[#allocation2 + $0x69] sm:$0x1] %vm401_vm4, %v10554_v2 }
  0x3c   : > { %429 = vst.msk [vmem:[#allocation2 + $0x79] sm:$0x1] %vm401_vm4, %v10554_v2  ;;  %430 = vst.msk [vmem:[#allocation2 + $0x89] sm:$0x1] %vm401_vm4, %v10554_v2 }
  0x3d   : > { %431 = vst.msk [vmem:[#allocation2 + $0x99] sm:$0x1] %vm401_vm4, %v10554_v2  ;;  %432 = vst.msk [vmem:[#allocation2 + $0xa9] sm:$0x1] %vm401_vm4, %v10554_v2 }
  0x3e   : > { %6847 = vmatmul.mubr.msk.f32.gmra.mxu0 %vm551_vm1, %v496_v34  ;;  %433 = vst.msk [vmem:[#allocation2 + $0xb9] sm:$0x1] %vm401_vm4, %v10554_v2  ;;  %434 = vst.msk [vmem:[#allocation2 + $0xc9] sm:$0x1] %vm401_vm4, %v10554_v2 }
  0x3f   : > { %6849 = vmatprep.mubr.msk.f32.mxu0 %vm551_vm1, %v497_v35  ;;  %435 = vst.msk [vmem:[#allocation2 + $0xd9] sm:$0x1] %vm401_vm4, %v10554_v2  ;;  %436 = vst.msk [vmem:[#allocation2 + $0xe9] sm:$0x1] %vm401_vm4, %v10554_v2 }
  0x40   : > { %437 = vst.msk [vmem:[#allocation2 + $0xf9] sm:$0x1] %vm401_vm4, %v10554_v2  ;;  %438 = vst.msk [vmem:[#allocation2 + $0x109] sm:$0x1] %vm401_vm4, %v10554_v2 }
  0x41   : > { %439 = vst.msk [vmem:[#allocation2 + $0x119] sm:$0x1] %vm401_vm4, %v10554_v2  ;;  %440 = vst.msk [vmem:[#allocation2 + $0x129] sm:$0x1] %vm401_vm4, %v10554_v2 }
  0x42   : > { %6850 = vmatmul.mubr.msk.f32.gmra.mxu0 %vm551_vm1, %v498_v36  ;;  %441 = vst.msk [vmem:[#allocation2 + $0x139] sm:$0x1] %vm401_vm4, %v10554_v2 }
  0x43   : > { %6852 = vmatprep.mubr.msk.f32.mxu0 %vm551_vm1, %v499_v37 }
  0x46   : > { %6853 = vmatmul.mubr.msk.f32.gmra.mxu0 %vm551_vm1, %v500_v38 }
  0x47   : > { %6855 = vmatprep.mubr.msk.f32.mxu0 %vm551_vm1, %v501_v39 }
  0x4a   : > { %6856 = vmatmul.mubr.msk.f32.gmra.mxu0 %vm551_vm1, %v502_v40 }
  0x4b   : > { %6858 = vmatprep.mubr.msk.f32.mxu0 %vm551_vm1, %v503_v41 }
  0x4e   : > { %6859 = vmatmul.mubr.msk.f32.gmra.mxu0 %vm551_vm1, %v504_v42 }
  0x4f   : > { %6861 = vmatprep.mubr.msk.f32.mxu0 %vm551_vm1, %v505_v43 }
  0x52   : > { %6862 = vmatmul.mubr.msk.f32.gmra.mxu0 %vm551_vm1, %v506_v44 }
  0x53   : > { %6864 = vmatprep.mubr.msk.f32.mxu0 %vm551_vm1, %v507_v45 }
  0x56   : > { %6865 = vmatmul.mubr.msk.f32.gmra.mxu0 %vm551_vm1, %v508_v46 }
  0x57   : > { %6867 = vmatprep.mubr.msk.f32.mxu0 %vm551_vm1, %v509_v47 }
  0x5a   : > { %6868 = vmatmul.mubr.msk.f32.gmra.mxu0 %vm551_vm1, %v510_v48 }
  0x5b   : > { %6870 = vmatprep.mubr.msk.f32.mxu0 %vm551_vm1, %v511_v49 }
  0x5e   : > { %6871 = vmatmul.mubr.msk.f32.gmra.mxu0 %vm551_vm1, %v512_v50 }
  0x5f   : > { %6873 = vmatprep.mubr.msk.f32.mxu0 %vm551_vm1, %v513_v51 }
  0x62   : > { %6874 = vmatmul.mubr.msk.f32.gmra.mxu0 %vm551_vm1, %v514_v52 }
  0x63   : > { %6876 = vmatprep.mubr.msk.f32.mxu0 %vm551_vm1, %v515_v53 }
  0x66   : > { %6877 = vmatmul.mubr.msk.f32.gmra.mxu0 %vm551_vm1, %v516_v54 }
  0x67   : > { %6879 = vmatprep.mubr.msk.f32.mxu0 %vm551_vm1, %v517_v55 }
  0x6a   : > { %6880 = vmatmul.mubr.msk.f32.gmra.mxu0 %vm551_vm1, %v518_v58 }
  0x6b   : > { %6882 = vmatprep.mubr.msk.f32.mxu0 %vm551_vm1, %v519_v59 }
  0x6e   : > { %6883 = vmatmul.mubr.msk.f32.gmra.mxu0 %vm551_vm1, %v7549_v62 }
  0x6f   : > { %6885 = vmatprep.mubr.msk.f32.mxu0 %vm551_vm1, %v7552_v63 }
  0x72   : > { %6886 = vmatmul.mubr.msk.f32.gmra.mxu0 %vm551_vm1, %v522_v5 }
  0x73   : > { %6888 = vmatprep.mubr.msk.f32.mxu0 %vm551_vm1, %v523_v6 }
  0x76   : > { %6889 = vmatmul.mubr.msk.f32.gmra.mxu0 %vm551_vm1, %v524_v11 }
  0x77   : > { %6891 = vmatprep.mubr.msk.f32.mxu0 %vm551_vm1, %v525_v12 }
  0x7a   : > { %6892 = vmatmul.mubr.msk.f32.gmra.mxu0 %vm551_vm1, %v526_v15 }
  0x7b   : > { %6894 = vmatprep.mubr.msk.f32.mxu0 %vm551_vm1, %v527_v16 }
  0x7e   : > { %6895 = vmatmul.mubr.msk.f32.gmra.mxu0 %vm551_vm1, %v528_v18 }
  0x7f   : > { %6897 = vmatprep.mubr.msk.f32.mxu0 %vm551_vm1, %v529_v20 }
  0x82   : > { %6898 = vmatmul.mubr.msk.f32.gmra.mxu0 %vm551_vm1, %v530_v22 }
  0xd6   : > { %v6818_v25 = vpop.f32.mrf.mxu0 }
  0xd7   : > { %v820_v29 = vadd.f32 %v6818_v25, %v7760_v26 }
  0xd8   : > { %v814_v27 = vpop.f32.mrf.mxu0  ;;  %v6902_v42 = vpop.f32.mrf.mxu1 }
  0xd9   : > { %v815_v32 = vadd.f32 %v7760_v26, %v814_v27  ;;  %v1100_v49 = vadd.f32 %v6902_v42, %v7760_v26 }
  0xda   : > { %v6821_v28 = vpop.f32.mrf.mxu0  ;;  %v1094_v47 = vpop.f32.mrf.mxu1 }
  0xdb   : > { %v830_v30 = vadd.f32 %v6821_v28, %v7760_v26  ;;  %v1095_v55 = vadd.f32 %v7760_v26, %v1094_v47 }
  0xdc   : > { %v824_v31 = vpop.f32.mrf.mxu0  ;;  %v6905_v53 = vpop.f32.mrf.mxu1 }
  0xdd   : > { %v1134_v33 = vmax.f32 %v820_v29, %v830_v30  ;;  %v825_v34 = vadd.f32 %v7760_v26, %v824_v31  ;;  %v1110_v56 = vadd.f32 %v6905_v53, %v7760_v26  ;;  %v1331_v31 = vld [vmem:[%s10545_s3 + $0x30] sm:$0xff] }
  0xde   : > { %v6824_v35 = vpop.f32.mrf.mxu0  ;;  %v1104_v59 = vpop.f32.mrf.mxu1  ;;  %v5940_v53 = vld [vmem:[%s10545_s3 + $0x1b0] sm:$0xff] }
  0xdf   : > { %1166 = vst.msk [vmem:[#allocation4 + $0x8] sm:$0xff] %vm390_vm2, %v1134_v33  ;;  %v1133_v36 = vmax.f32 %v815_v32, %v825_v34  ;;  %v840_v39 = vadd.f32 %v6824_v35, %v7760_v26  ;;  %v1162_v62 = vmax.f32 %v1100_v49, %v1110_v56  ;;  %v1105_v63 = vadd.f32 %v7760_v26, %v1104_v59 }
  0xe0   : > { %v834_v37 = vpop.f32.mrf.mxu0  ;;  %v6908_v1 = vpop.f32.mrf.mxu1 }
  0xe1   : > { %1165 = vst.msk [vmem:[#allocation4] sm:$0xff] %vm390_vm2, %v1133_v36  ;;  %v835_v43 = vadd.f32 %v7760_v26, %v834_v37  ;;  %1194 = vst.msk [vmem:[#allocation4 + $0xe8] sm:$0xff] %vm390_vm2, %v1162_v62  ;;  %v1161_v6 = vmax.f32 %v1095_v55, %v1105_v63  ;;  %v1120_v10 = vadd.f32 %v6908_v1, %v7760_v26  ;;  %v1326_v63 = vld [vmem:[%s10545_s3 + $0x8] sm:$0xff] }
  0xe2   : > { %v6827_v38 = vpop.f32.mrf.mxu0  ;;  %v1114_v8 = vpop.f32.mrf.mxu1 }
  0xe3   : > { %v850_v40 = vadd.f32 %v6827_v38, %v7760_v26  ;;  %1193 = vst.msk [vmem:[#allocation4 + $0xe0] sm:$0xff] %vm390_vm2, %v1161_v6  ;;  %v1115_v16 = vadd.f32 %v7760_v26, %v1114_v8  ;;  %v1330_v38 = vld [vmem:[%s10545_s3 + $0x28] sm:$0xff]  ;;  %v1325_v6 = vld [vmem:[%s10545_s3] sm:$0xff] }
  0xe4   : > { %v844_v41 = vpop.f32.mrf.mxu0  ;;  %v6911_v14 = vpop.f32.mrf.mxu1 }
  0xe5   : > { %v1136_v44 = vmax.f32 %v840_v39, %v850_v40  ;;  %v845_v45 = vadd.f32 %v7760_v26, %v844_v41  ;;  %v1130_v17 = vadd.f32 %v6911_v14, %v7760_v26 }
  0xe6   : > { %v6830_v46 = vpop.f32.mrf.mxu0  ;;  %v1124_v20 = vpop.f32.mrf.mxu1 }
  0xe7   : > { %1168 = vst.msk [vmem:[#allocation4 + $0x18] sm:$0xff] %vm390_vm2, %v1136_v44  ;;  %v1135_v48 = vmax.f32 %v835_v43, %v845_v45  ;;  %v860_v57 = vadd.f32 %v6830_v46, %v7760_v26  ;;  %v1164_v25 = vmax.f32 %v1120_v10, %v1130_v17  ;;  %v1125_v27 = vadd.f32 %v7760_v26, %v1124_v20  ;;  %v1329_v44 = vld [vmem:[%s10545_s3 + $0x20] sm:$0xff] }
  0xe8   : > { %v1197_v50 = vld [vmem:[#allocation4] ss:$2 sm:$0xff]  ;;  %v1229_v51 = vld [vmem:[#allocation4 + $0x1] ss:$2 sm:$0xff]  ;;  %v854_v52 = vpop.f32.mrf.mxu0 }
  0xe9   : > { %v1260_v54 = vmax.f32 %v1197_v50, %v1229_v51  ;;  %1167 = vst.msk [vmem:[#allocation4 + $0x10] sm:$0xff] %vm390_vm2, %v1135_v48  ;;  %v855_v3 = vadd.f32 %v7760_v26, %v854_v52  ;;  %1196 = vst.msk [vmem:[#allocation4 + $0xf8] sm:$0xff] %vm390_vm2, %v1164_v25  ;;  %v1163_v34 = vmax.f32 %v1115_v16, %v1125_v27  ;;  %v1328_v50 = vld [vmem:[%s10545_s3 + $0x18] sm:$0xff] }
  0xea   : > { %v6833_v58 = vpop.f32.mrf.mxu0  ;;  %v1225_v36 = vld [vmem:[#allocation4 + $0xe0] ss:$2 sm:$0xff]  ;;  %v1257_v37 = vld [vmem:[#allocation4 + $0xe1] ss:$2 sm:$0xff] }
  0xeb   : > { %v1276_v60 = vmax.f32 %v1260_v54, 0.0  ;;  %v870_v61 = vadd.f32 %v6833_v58, %v7760_v26  ;;  %1195 = vst.msk [vmem:[#allocation4 + $0xf0] sm:$0xff] %vm390_vm2, %v1163_v34  ;;  %v1274_v40 = vmax.f32 %v1225_v36, %v1257_v37  ;;  %v7877_v37 = vld [vmem:[%s10545_s3 + $0x238] sm:$0xff] }
  0xec   : > { %v864_v0 = vpop.f32.mrf.mxu0 }
  0xed   : > { %1293 = vst.msk [vmem:[#allocation2 + $0x11] sm:$0xff] %vm390_vm2, %v1276_v60  ;;  %v1138_v4 = vmax.f32 %v860_v57, %v870_v61  ;;  %v865_v5 = vadd.f32 %v7760_v26, %v864_v0  ;;  %v1290_v45 = vmax.f32 %v1274_v40, 0.0  ;;  %v1327_v57 = vld [vmem:[%s10545_s3 + $0x10] sm:$0xff]  ;;  %v5939_v61 = vld [vmem:[%s10545_s3 + $0x1a8] sm:$0xff] }
  0xee   : > { %v6836_v7 = vpop.f32.mrf.mxu0 }
  0xef   : > { %1170 = vst.msk [vmem:[#allocation4 + $0x28] sm:$0xff] %vm390_vm2, %v1138_v4  ;;  %v1137_v9 = vmax.f32 %v855_v3, %v865_v5  ;;  %v880_v18 = vadd.f32 %v6836_v7, %v7760_v26  ;;  %1307 = vst.msk [vmem:[#allocation2 + $0x111] sm:$0xff] %vm390_vm2, %v1290_v45 }
  0xf0   : > { %v1199_v11 = vld [vmem:[#allocation4 + $0x10] ss:$2 sm:$0xff]  ;;  %v1231_v12 = vld [vmem:[#allocation4 + $0x11] ss:$2 sm:$0xff]  ;;  %v874_v13 = vpop.f32.mrf.mxu0 }
  0xf1   : > { %1169 = vst.msk [vmem:[#allocation4 + $0x20] sm:$0xff] %vm390_vm2, %v1137_v9  ;;  %v1261_v15 = vmax.f32 %v1199_v11, %v1231_v12  ;;  %v875_v28 = vadd.f32 %v7760_v26, %v874_v13  ;;  %v5937_v12 = vld [vmem:[%s10545_s3 + $0x198] sm:$0xff] }
  0xf2   : > { %v6839_v19 = vpop.f32.mrf.mxu0  ;;  %v1227_v59 = vld [vmem:[#allocation4 + $0xf0] ss:$2 sm:$0xff]  ;;  %v1259_v60 = vld [vmem:[#allocation4 + $0xf1] ss:$2 sm:$0xff] }
  0xf3   : > { %v890_v21 = vadd.f32 %v6839_v19, %v7760_v26  ;;  %v1277_v22 = vmax.f32 %v1261_v15, 0.0  ;;  %v1275_v0 = vmax.f32 %v1227_v59, %v1259_v60  ;;  %v7853_v15 = vld [vmem:[%s10545_s3 + $0xb8] sm:$0xff]  ;;  %v5936_v19 = vld [vmem:[%s10545_s3 + $0x190] sm:$0xff] }
  0xf4   : > { %v884_v29 = vpop.f32.mrf.mxu0  ;;  %v1334_v30 = vld [vmem:[#allocation2 + $0x11] sm:$0xff] }
  0xf5   : > { %v1140_v32 = vmax.f32 %v880_v18, %v890_v21  ;;  %v885_v33 = vadd.f32 %v7760_v26, %v884_v29  ;;  %6929 = vmatmul.mubr.msk.f32.vlgmr.msra.gmra.mxu1 %vm390_vm2, %v1334_v30  ;;  %7088 = vmatprep.mubr.msk.f32.mxu0 %vm390_vm2, %v1334_v30  ;;  %1294 = vst.msk [vmem:[#allocation2 + $0x21] sm:$0xff] %vm390_vm2, %v1277_v22  ;;  %v1291_v7 = vmax.f32 %v1275_v0, 0.0  ;;  %v5935_v22 = vld [vmem:[%s10545_s3 + $0x188] sm:$0xff]  ;;  %v5934_v30 = vld [vmem:[%s10545_s3 + $0x180] sm:$0xff] }
  0xf6   : > { %v6842_v35 = vpop.f32.mrf.mxu0  ;;  %6953 = vmatpush3.msra.mxu1 %v7748_v23 }
  0xf7   : > { %1172 = vst.msk [vmem:[#allocation4 + $0x38] sm:$0xff] %vm390_vm2, %v1140_v32  ;;  %v1139_v39 = vmax.f32 %v875_v28, %v885_v33  ;;  %6954 = vmatprep.subr.mxu1 %v1331_v31  ;;  %v900_v47 = vadd.f32 %v6842_v35, %v7760_v26  ;;  %1308 = vst.msk [vmem:[#allocation2 + $0x121] sm:$0xff] %vm390_vm2, %v1291_v7 }
  0xf8   : > { %v1201_v41 = vld [vmem:[#allocation4 + $0x20] ss:$2 sm:$0xff]  ;;  %v1233_v42 = vld [vmem:[#allocation4 + $0x21] ss:$2 sm:$0xff]  ;;  %v894_v43 = vpop.f32.mrf.mxu0  ;;  %6955 = vmatpush3.msra.mxu1 %v1331_v31 }
  0xf9   : > { %1171 = vst.msk [vmem:[#allocation4 + $0x30] sm:$0xff] %vm390_vm2, %v1139_v39  ;;  %v1262_v23 = vmax.f32 %v1201_v41, %v1233_v42  ;;  %6956 = vmatprep.subr.mxu1 %v1330_v38  ;;  %v895_v54 = vadd.f32 %v7760_v26, %v894_v43 }
  0xfa   : > { %v6845_v46 = vpop.f32.mrf.mxu0  ;;  %6957 = vmatpush3.msra.mxu1 %v1330_v38 }
  0xfb   : > { %v910_v48 = vadd.f32 %v6845_v46, %v7760_v26  ;;  %v1278_v49 = vmax.f32 %v1262_v23, 0.0  ;;  %6958 = vmatprep.subr.mxu1 %v1329_v44 }
  0xfc   : > { %v904_v51 = vpop.f32.mrf.mxu0  ;;  %v1335_v52 = vld [vmem:[#allocation2 + $0x21] sm:$0xff]  ;;  %6959 = vmatpush3.msra.mxu1 %v1329_v44 }
  0xfd   : > { %v1142_v55 = vmax.f32 %v900_v47, %v910_v48  ;;  %v905_v56 = vadd.f32 %v7760_v26, %v904_v51  ;;  %6931 = vmatprep.mubr.msk.f32.mxu1 %vm390_vm2, %v1335_v52  ;;  %7089 = vmatmul.mubr.msk.f32.vlgmr.msra.gmra.mxu0 %vm390_vm2, %v1335_v52  ;;  %1295 = vst.msk [vmem:[#allocation2 + $0x31] sm:$0xff] %vm390_vm2, %v1278_v49 }
  0xfe   : > { %v6848_v58 = vpop.f32.mrf.mxu0  ;;  %6960 = vmatprep.subr.mxu1 %v1328_v50  ;;  %7153 = vmatpush3.msra.mxu0 %v7754_v24  ;;  %v5938_v24 = vld [vmem:[%s10545_s3 + $0x1a0] sm:$0xff] }
  0xff   : > { %1174 = vst.msk [vmem:[#allocation4 + $0x48] sm:$0xff] %vm390_vm2, %v1142_v55  ;;  %v1141_v62 = vmax.f32 %v895_v54, %v905_v56  ;;  %6961 = vmatpush3.msra.mxu1 %v1328_v50  ;;  %7154 = vmatprep.subr.mxu0 %v5940_v53  ;;  %v920_v9 = vadd.f32 %v6848_v58, %v7760_v26 }
 0x100   : > { %v1203_v1 = vld [vmem:[#allocation4 + $0x30] ss:$2 sm:$0xff]  ;;  %v1235_v3 = vld [vmem:[#allocation4 + $0x31] ss:$2 sm:$0xff]  ;;  %v914_v4 = vpop.f32.mrf.mxu0  ;;  %6962 = vmatprep.subr.mxu1 %v1327_v57  ;;  %7155 = vmatpush3.msra.mxu0 %v5940_v53 }
 0x101   : > { %1173 = vst.msk [vmem:[#allocation4 + $0x40] sm:$0xff] %vm390_vm2, %v1141_v62  ;;  %v1263_v5 = vmax.f32 %v1203_v1, %v1235_v3  ;;  %6963 = vmatpush3.msra.mxu1 %v1327_v57  ;;  %7156 = vmatprep.subr.mxu0 %v5939_v61  ;;  %v915_v16 = vadd.f32 %v7760_v26, %v914_v4 }
 0x102   : > { %v6851_v8 = vpop.f32.mrf.mxu0  ;;  %6964 = vmatprep.subr.mxu1 %v1326_v63  ;;  %7157 = vmatpush3.msra.mxu0 %v5939_v61 }
 0x103   : > { %v930_v10 = vadd.f32 %v6851_v8, %v7760_v26  ;;  %v1279_v11 = vmax.f32 %v1263_v5, 0.0  ;;  %6965 = vmatpush3.msra.mxu1 %v1326_v63  ;;  %7158 = vmatprep.subr.mxu0 %v5938_v24 }
 0x104   : > { %v924_v13 = vpop.f32.mrf.mxu0  ;;  %v1336_v14 = vld [vmem:[#allocation2 + $0x31] sm:$0xff]  ;;  %7159 = vmatpush3.msra.mxu0 %v5938_v24  ;;  %6966 = vmatprep.subr.mxu1 %v1325_v6 }
 0x105   : > { %v1144_v17 = vmax.f32 %v920_v9, %v930_v10  ;;  %v925_v18 = vadd.f32 %v7760_v26, %v924_v13  ;;  %6932 = vmatmul.mubr.msk.f32.gmra.mxu1 %vm390_vm2, %v1336_v14  ;;  %7091 = vmatprep.mubr.msk.f32.mxu0 %vm390_vm2, %v1336_v14  ;;  %1296 = vst.msk [vmem:[#allocation2 + $0x41] sm:$0xff] %vm390_vm2, %v1279_v11 }
 0x106   : > { %v6854_v20 = vpop.f32.mrf.mxu0  ;;  %7160 = vmatprep.subr.mxu0 %v5937_v12  ;;  %6967 = vmatpush3.msra.mxu1 %v1325_v6 }
 0x107   : > { %1176 = vst.msk [vmem:[#allocation4 + $0x58] sm:$0xff] %vm390_vm2, %v1144_v17  ;;  %v1143_v21 = vmax.f32 %v915_v16, %v925_v18  ;;  %7161 = vmatpush3.msra.mxu0 %v5937_v12  ;;  %6992 = vmatprep.subr.mxu1 %v7853_v15  ;;  %v940_v32 = vadd.f32 %v6854_v20, %v7760_v26  ;;  %v1341_v17 = vld [vmem:[#allocation2 + $0xa1] sm:$0xff] }
 0x108   : > { %v1205_v25 = vld [vmem:[#allocation4 + $0x40] ss:$2 sm:$0xff]  ;;  %v1237_v27 = vld [vmem:[#allocation4 + $0x41] ss:$2 sm:$0xff]  ;;  %v934_v28 = vpop.f32.mrf.mxu0  ;;  %7162 = vmatprep.subr.mxu0 %v5936_v19 }
 0x109   : > { %1175 = vst.msk [vmem:[#allocation4 + $0x50] sm:$0xff] %vm390_vm2, %v1143_v21  ;;  %v1264_v29 = vmax.f32 %v1205_v25, %v1237_v27  ;;  %7163 = vmatpush3.msra.mxu0 %v5936_v19  ;;  %v935_v38 = vadd.f32 %v7760_v26, %v934_v28 }
 0x10a   : > { %v6857_v31 = vpop.f32.mrf.mxu0  ;;  %7164 = vmatprep.subr.mxu0 %v5935_v22 }
 0x10b   : > { %v950_v33 = vadd.f32 %v6857_v31, %v7760_v26  ;;  %v1280_v34 = vmax.f32 %v1264_v29, 0.0  ;;  %7165 = vmatpush3.msra.mxu0 %v5935_v22 }
 0x10c   : > { %v944_v35 = vpop.f32.mrf.mxu0  ;;  %v1337_v36 = vld [vmem:[#allocation2 + $0x41] sm:$0xff]  ;;  %7166 = vmatprep.subr.mxu0 %v5934_v30 }
 0x10d   : > { %v1146_v39 = vmax.f32 %v940_v32, %v950_v33  ;;  %v945_v40 = vadd.f32 %v7760_v26, %v944_v35  ;;  %6934 = vmatprep.mubr.msk.f32.mxu1 %vm390_vm2, %v1337_v36  ;;  %7092 = vmatmul.mubr.msk.f32.gmra.mxu0 %vm390_vm2, %v1337_v36  ;;  %1297 = vst.msk [vmem:[#allocation2 + $0x51] sm:$0xff] %vm390_vm2, %v1280_v34 }
 0x10e   : > { %v6860_v41 = vpop.f32.mrf.mxu0  ;;  %7167 = vmatpush3.msra.mxu0 %v5934_v30 }
 0x10f   : > { %1178 = vst.msk [vmem:[#allocation4 + $0x68] sm:$0xff] %vm390_vm2, %v1146_v39  ;;  %v1145_v42 = vmax.f32 %v935_v38, %v945_v40  ;;  %7232 = vmatprep.subr.mxu0 %v7877_v37  ;;  %v960_v47 = vadd.f32 %v6860_v41, %v7760_v26 }
 0x110   : > { %v1207_v43 = vld [vmem:[#allocation4 + $0x50] ss:$2 sm:$0xff]  ;;  %v1239_v44 = vld [vmem:[#allocation4 + $0x51] ss:$2 sm:$0xff]  ;;  %v954_v23 = vpop.f32.mrf.mxu0 }
 0x111   : > { %1177 = vst.msk [vmem:[#allocation4 + $0x60] sm:$0xff] %vm390_vm2, %v1145_v42  ;;  %v1265_v45 = vmax.f32 %v1207_v43, %v1239_v44  ;;  %v955_v52 = vadd.f32 %v7760_v26, %v954_v23 }
 0x112   : > { %v6863_v46 = vpop.f32.mrf.mxu0 }
 0x113   : > { %v970_v48 = vadd.f32 %v6863_v46, %v7760_v26  ;;  %v1281_v49 = vmax.f32 %v1265_v45, 0.0 }
 0x114   : > { %v964_v50 = vpop.f32.mrf.mxu0  ;;  %v1338_v51 = vld [vmem:[#allocation2 + $0x51] sm:$0xff] }
 0x115   : > { %v1148_v53 = vmax.f32 %v960_v47, %v970_v48  ;;  %v965_v54 = vadd.f32 %v7760_v26, %v964_v50  ;;  %6935 = vmatmul.mubr.msk.f32.gmra.mxu1 %vm390_vm2, %v1338_v51  ;;  %7094 = vmatprep.mubr.msk.f32.mxu0 %vm390_vm2, %v1338_v51  ;;  %1298 = vst.msk [vmem:[#allocation2 + $0x61] sm:$0xff] %vm390_vm2, %v1281_v49 }
 0x116   : > { %v6866_v55 = vpop.f32.mrf.mxu0 }
 0x117   : > { %1180 = vst.msk [vmem:[#allocation4 + $0x78] sm:$0xff] %vm390_vm2, %v1148_v53  ;;  %v1147_v56 = vmax.f32 %v955_v52, %v965_v54  ;;  %v980_v62 = vadd.f32 %v6866_v55, %v7760_v26 }
 0x118   : > { %v1209_v57 = vld [vmem:[#allocation4 + $0x60] ss:$2 sm:$0xff]  ;;  %v1241_v58 = vld [vmem:[#allocation4 + $0x61] ss:$2 sm:$0xff]  ;;  %v974_v59 = vpop.f32.mrf.mxu0 }
 0x119   : > { %1179 = vst.msk [vmem:[#allocation4 + $0x70] sm:$0xff] %vm390_vm2, %v1147_v56  ;;  %v1266_v60 = vmax.f32 %v1209_v57, %v1241_v58  ;;  %v975_v4 = vadd.f32 %v7760_v26, %v974_v59 }
 0x11a   : > { %v6869_v61 = vpop.f32.mrf.mxu0 }
 0x11b   : > { %v990_v63 = vadd.f32 %v6869_v61, %v7760_v26  ;;  %v1282_v0 = vmax.f32 %v1266_v60, 0.0 }
 0x11c   : > { %v984_v1 = vpop.f32.mrf.mxu0  ;;  %v1339_v3 = vld [vmem:[#allocation2 + $0x61] sm:$0xff] }
 0x11d   : > { %v1150_v24 = vmax.f32 %v980_v62, %v990_v63  ;;  %v985_v5 = vadd.f32 %v7760_v26, %v984_v1  ;;  %6937 = vmatprep.mubr.msk.f32.mxu1 %vm390_vm2, %v1339_v3  ;;  %7095 = vmatmul.mubr.msk.f32.gmra.mxu0 %vm390_vm2, %v1339_v3  ;;  %1299 = vst.msk [vmem:[#allocation2 + $0x71] sm:$0xff] %vm390_vm2, %v1282_v0 }
 0x11e   : > { %v6872_v6 = vpop.f32.mrf.mxu0 }
 0x11f   : > { %1182 = vst.msk [vmem:[#allocation4 + $0x88] sm:$0xff] %vm390_vm2, %v1150_v24  ;;  %v1149_v7 = vmax.f32 %v975_v4, %v985_v5  ;;  %v1000_v13 = vadd.f32 %v6872_v6, %v7760_v26 }
 0x120   : > { %v1211_v8 = vld [vmem:[#allocation4 + $0x70] ss:$2 sm:$0xff]  ;;  %v1243_v9 = vld [vmem:[#allocation4 + $0x71] ss:$2 sm:$0xff]  ;;  %v994_v10 = vpop.f32.mrf.mxu0 }
 0x121   : > { %1181 = vst.msk [vmem:[#allocation4 + $0x80] sm:$0xff] %vm390_vm2, %v1149_v7  ;;  %v1267_v11 = vmax.f32 %v1211_v8, %v1243_v9  ;;  %v995_v20 = vadd.f32 %v7760_v26, %v994_v10 }
 0x122   : > { %v6875_v12 = vpop.f32.mrf.mxu0 }
 0x123   : > { %v1010_v14 = vadd.f32 %v6875_v12, %v7760_v26  ;;  %v1283_v16 = vmax.f32 %v1267_v11, 0.0 }
 0x124   : > { %v1004_v18 = vpop.f32.mrf.mxu0  ;;  %v1340_v19 = vld [vmem:[#allocation2 + $0x71] sm:$0xff] }
 0x125   : > { %v1152_v21 = vmax.f32 %v1000_v13, %v1010_v14  ;;  %v1005_v22 = vadd.f32 %v7760_v26, %v1004_v18  ;;  %6938 = vmatmul.mubr.msk.f32.gmra.mxu1 %vm390_vm2, %v1340_v19  ;;  %7097 = vmatprep.mubr.msk.f32.mxu0 %vm390_vm2, %v1340_v19  ;;  %1300 = vst.msk [vmem:[#allocation2 + $0x81] sm:$0xff] %vm390_vm2, %v1283_v16 }
 0x126   : > { %v6878_v25 = vpop.f32.mrf.mxu0  ;;  %6940 = vmatprep.mubr.msk.f32.mxu1 %vm390_vm2, %v1341_v17 }
 0x127   : > { %1184 = vst.msk [vmem:[#allocation4 + $0x98] sm:$0xff] %vm390_vm2, %v1152_v21  ;;  %v1151_v27 = vmax.f32 %v995_v20, %v1005_v22  ;;  %v1020_v33 = vadd.f32 %v6878_v25, %v7760_v26 }
 0x128   : > { %v1213_v28 = vld [vmem:[#allocation4 + $0x80] ss:$2 sm:$0xff]  ;;  %v1245_v29 = vld [vmem:[#allocation4 + $0x81] ss:$2 sm:$0xff]  ;;  %v1014_v30 = vpop.f32.mrf.mxu0 }
 0x129   : > { %1183 = vst.msk [vmem:[#allocation4 + $0x90] sm:$0xff] %vm390_vm2, %v1151_v27  ;;  %v1268_v31 = vmax.f32 %v1213_v28, %v1245_v29  ;;  %v1015_v39 = vadd.f32 %v7760_v26, %v1014_v30 }
 0x12a   : > { %v6881_v32 = vpop.f32.mrf.mxu0 }
 0x12b   : > { %v1030_v34 = vadd.f32 %v6881_v32, %v7760_v26  ;;  %v1284_v35 = vmax.f32 %v1268_v31, 0.0 }
 0x12c   : > { %v1024_v36 = vpop.f32.mrf.mxu0  ;;  %v2219_v38 = vld [vmem:[#allocation2 + $0x81] sm:$0xff] }
 0x12d   : > { %v1154_v40 = vmax.f32 %v1020_v33, %v1030_v34  ;;  %v1025_v41 = vadd.f32 %v7760_v26, %v1024_v36  ;;  %7098 = vmatmul.mubr.msk.f32.gmra.mxu0 %vm390_vm2, %v2219_v38  ;;  %1301 = vst.msk [vmem:[#allocation2 + $0xb1] sm:$0xff] %vm390_vm2, %v1284_v35  ;;  %v1309_v38 = vld [vmem:[#allocation2] sm:$0xff] }
 0x12e   : > { %v6884_v42 = vpop.f32.mrf.mxu0 }
 0x12f   : > { %1186 = vst.msk [vmem:[#allocation4 + $0xa8] sm:$0xff] %vm390_vm2, %v1154_v40  ;;  %v1153_v43 = vmax.f32 %v1015_v39, %v1025_v41  ;;  %v1040_v48 = vadd.f32 %v6884_v42, %v7760_v26  ;;  %v7978_v39 = vld [vmem:[#allocation2 + $0x111] sm:$0xff]  ;;  %v7984_v40 = vld [vmem:[#allocation2 + $0x121] sm:$0xff] }
 0x130   : > { %v1215_v44 = vld [vmem:[#allocation4 + $0x90] ss:$2 sm:$0xff]  ;;  %v1247_v23 = vld [vmem:[#allocation4 + $0x91] ss:$2 sm:$0xff]  ;;  %v1034_v45 = vpop.f32.mrf.mxu0  ;;  %v7991_v42 = vld [vmem:[#allocation2 + $0x20] sm:$0xff] }
 0x131   : > { %1185 = vst.msk [vmem:[#allocation4 + $0xa0] sm:$0xff] %vm390_vm2, %v1153_v43  ;;  %v1269_v46 = vmax.f32 %v1215_v44, %v1247_v23  ;;  %v1035_v53 = vadd.f32 %v7760_v26, %v1034_v45  ;;  %v7989_v41 = vld [vmem:[#allocation2 + $0x10] sm:$0xff]  ;;  %v5843_v23 = vld [vmem:[%s10545_s3 + $0xa8] sm:$0xff]  ;;  %v8010_v45 = vld [vmem:[#allocation2 + $0x40] sm:$0xff] }
 0x132   : > { %v6887_v47 = vpop.f32.mrf.mxu0  ;;  %v5844_v43 = vld [vmem:[%s10545_s3 + $0xb0] sm:$0xff] }
 0x133   : > { %v1050_v49 = vadd.f32 %v6887_v47, %v7760_v26  ;;  %v1285_v50 = vmax.f32 %v1269_v46, 0.0  ;;  %v8003_v44 = vld [vmem:[#allocation2 + $0x30] sm:$0xff]  ;;  %v8026_v47 = vld [vmem:[#allocation2 + $0x60] sm:$0xff] }
 0x134   : > { %v1044_v51 = vpop.f32.mrf.mxu0  ;;  %v1342_v52 = vld [vmem:[#allocation2 + $0xb1] sm:$0xff] }
 0x135   : > { %v1156_v54 = vmax.f32 %v1040_v48, %v1050_v49  ;;  %v1045_v55 = vadd.f32 %v7760_v26, %v1044_v51  ;;  %6941 = vmatmul.mubr.msk.f32.gmra.mxu1 %vm390_vm2, %v1342_v52  ;;  %7100 = vmatprep.mubr.msk.f32.mxu0 %vm390_vm2, %v1342_v52  ;;  %1302 = vst.msk [vmem:[#allocation2 + $0xc1] sm:$0xff] %vm390_vm2, %v1285_v50  ;;  %v8021_v46 = vld [vmem:[#allocation2 + $0x50] sm:$0xff]  ;;  %v5841_v48 = vld [vmem:[%s10545_s3 + $0x98] sm:$0xff]  ;;  %v1317_v50 = vld [vmem:[#allocation2 + $0xa0] sm:$0xff] }
 0x136   : > { %v6890_v56 = vpop.f32.mrf.mxu0  ;;  %v5988_v49 = vld [vmem:[%s10545_s3 + $0x230] sm:$0xff]  ;;  %v8047_v52 = vld [vmem:[#allocation2 + $0x80] sm:$0xff] }
 0x137   : > { %1188 = vst.msk [vmem:[#allocation4 + $0xb8] sm:$0xff] %vm390_vm2, %v1156_v54  ;;  %v1155_v57 = vmax.f32 %v1035_v53, %v1045_v55  ;;  %v1060_v63 = vadd.f32 %v6890_v56, %v7760_v26  ;;  %v5840_v51 = vld [vmem:[%s10545_s3 + $0x90] sm:$0xff]  ;;  %v5839_v54 = vld [vmem:[%s10545_s3 + $0x88] sm:$0xff] }
 0x138   : > { %v1217_v58 = vld [vmem:[#allocation4 + $0xa0] ss:$2 sm:$0xff]  ;;  %v1249_v59 = vld [vmem:[#allocation4 + $0xa1] ss:$2 sm:$0xff]  ;;  %v1054_v60 = vpop.f32.mrf.mxu0  ;;  %v2688_v53 = vld [vmem:[#allocation2 + $0x90] sm:$0xff] }
 0x139   : > { %1187 = vst.msk [vmem:[#allocation4 + $0xb0] sm:$0xff] %vm390_vm2, %v1155_v57  ;;  %v1270_v61 = vmax.f32 %v1217_v58, %v1249_v59  ;;  %v1055_v24 = vadd.f32 %v7760_v26, %v1054_v60  ;;  %v5987_v55 = vld [vmem:[%s10545_s3 + $0x228] sm:$0xff]  ;;  %v8061_v56 = vld [vmem:[#allocation2 + $0xb0] sm:$0xff]  ;;  %v5986_v58 = vld [vmem:[%s10545_s3 + $0x220] sm:$0xff] }
 0x13a   : > { %v6893_v62 = vpop.f32.mrf.mxu0 }
 0x13b   : > { %v1070_v0 = vadd.f32 %v6893_v62, %v7760_v26  ;;  %v1286_v1 = vmax.f32 %v1270_v61, 0.0  ;;  %v5838_v61 = vld [vmem:[%s10545_s3 + $0x80] sm:$0xff]  ;;  %v5985_v62 = vld [vmem:[%s10545_s3 + $0x218] sm:$0xff] }
 0x13c   : > { %v1064_v3 = vpop.f32.mrf.mxu0  ;;  %v7934_v4 = vld [vmem:[#allocation2 + $0xc1] sm:$0xff] }
 0x13d   : > { %v1158_v5 = vmax.f32 %v1060_v63, %v1070_v0  ;;  %v1065_v6 = vadd.f32 %v7760_v26, %v1064_v3  ;;  %6943 = vmatprep.mubr.msk.f32.mxu1 %vm390_vm2, %v7934_v4  ;;  %7101 = vmatmul.mubr.msk.f32.gmra.mxu0 %vm390_vm2, %v7934_v4  ;;  %1303 = vst.msk [vmem:[#allocation2 + $0xd1] sm:$0xff] %vm390_vm2, %v1286_v1  ;;  %v8063_v57 = vld [vmem:[#allocation2 + $0xc0] sm:$0xff]  ;;  %v5984_v1 = vld [vmem:[%s10545_s3 + $0x210] sm:$0xff]  ;;  %v5869_v3 = vld [vmem:[%s10545_s3 + $0xf8] sm:$0xff] }
 0x13e   : > { %v6896_v7 = vpop.f32.mrf.mxu0 }
 0x13f   : > { %1190 = vst.msk [vmem:[#allocation4 + $0xc8] sm:$0xff] %vm390_vm2, %v1158_v5  ;;  %v1157_v8 = vmax.f32 %v1055_v24, %v1065_v6  ;;  %v1080_v14 = vadd.f32 %v6896_v7, %v7760_v26  ;;  %v8110_v24 = vld [vmem:[#allocation2 + $0x120] sm:$0xff]  ;;  %v8112_v5 = vld [vmem:[#allocation2 + $0x110] sm:$0xff]  ;;  %v5983_v7 = vld [vmem:[%s10545_s3 + $0x208] sm:$0xff] }
 0x140   : > { %v1219_v9 = vld [vmem:[#allocation4 + $0xb0] ss:$2 sm:$0xff]  ;;  %v1251_v10 = vld [vmem:[#allocation4 + $0xb1] ss:$2 sm:$0xff]  ;;  %v1074_v11 = vpop.f32.mrf.mxu0  ;;  %v1744_v6 = vld [vmem:[#allocation2 + $0x2] sm:$0xff] }
 0x141   : > { %1189 = vst.msk [vmem:[#allocation4 + $0xc0] sm:$0xff] %vm390_vm2, %v1157_v8  ;;  %v1271_v12 = vmax.f32 %v1219_v9, %v1251_v10  ;;  %v1075_v20 = vadd.f32 %v7760_v26, %v1074_v11  ;;  %v2696_v8 = vld [vmem:[#allocation2 + $0x130] sm:$0xff]  ;;  %v5982_v10 = vld [vmem:[%s10545_s3 + $0x200] sm:$0xff] }
 0x142   : > { %v6899_v13 = vpop.f32.mrf.mxu0  ;;  %v8125_v9 = vld [vmem:[#allocation2 + $0x12] sm:$0xff]  ;;  %v8132_v11 = vld [vmem:[#allocation2 + $0x22] sm:$0xff] }
 0x143   : > { %v1090_v16 = vadd.f32 %v6899_v13, %v7760_v26  ;;  %v1287_v17 = vmax.f32 %v1271_v12, 0.0  ;;  %v5868_v12 = vld [vmem:[%s10545_s3 + $0xf0] sm:$0xff] }
 0x144   : > { %v1084_v18 = vpop.f32.mrf.mxu0  ;;  %v7947_v19 = vld [vmem:[#allocation2 + $0xd1] sm:$0xff] }
 0x145   : > { %v1160_v21 = vmax.f32 %v1080_v14, %v1090_v16  ;;  %v1085_v22 = vadd.f32 %v7760_v26, %v1084_v18  ;;  %6944 = vmatmul.mubr.msk.f32.gmra.mxu1 %vm390_vm2, %v7947_v19  ;;  %7103 = vmatprep.mubr.msk.f32.mxu0 %vm390_vm2, %v7947_v19  ;;  %1304 = vst.msk [vmem:[#allocation2 + $0xe1] sm:$0xff] %vm390_vm2, %v1287_v17  ;;  %v8074_v59 = vld [vmem:[#allocation2 + $0xd0] sm:$0xff]  ;;  %v5867_v14 = vld [vmem:[%s10545_s3 + $0xe8] sm:$0xff]  ;;  %v5866_v18 = vld [vmem:[%s10545_s3 + $0xe0] sm:$0xff] }
 0x146   : > { %v8141_v13 = vld [vmem:[#allocation2 + $0x32] sm:$0xff]  ;;  %v8150_v16 = vld [vmem:[#allocation2 + $0x42] sm:$0xff] }
 0x147   : > { %1192 = vst.msk [vmem:[#allocation4 + $0xd8] sm:$0xff] %vm390_vm2, %v1160_v21  ;;  %v1159_v25 = vmax.f32 %v1075_v20, %v1085_v22  ;;  %v8156_v17 = vld [vmem:[#allocation2 + $0x52] sm:$0xff]  ;;  %v8165_v20 = vld [vmem:[#allocation2 + $0x62] sm:$0xff] }
 0x148   : > { %v1221_v27 = vld [vmem:[#allocation4 + $0xc0] ss:$2 sm:$0xff]  ;;  %v1253_v28 = vld [vmem:[#allocation4 + $0xc1] ss:$2 sm:$0xff]  ;;  %v8171_v22 = vld [vmem:[#allocation2 + $0x72] sm:$0xff] }
 0x149   : > { %1191 = vst.msk [vmem:[#allocation4 + $0xd0] sm:$0xff] %vm390_vm2, %v1159_v25  ;;  %v1272_v29 = vmax.f32 %v1221_v27, %v1253_v28  ;;  %v1752_v21 = vld [vmem:[#allocation2 + $0xa2] sm:$0xff]  ;;  %v5865_v25 = vld [vmem:[%s10545_s3 + $0xd8] sm:$0xff] }
 0x14a   : > { %v8180_v27 = vld [vmem:[#allocation2 + $0x82] sm:$0xff]  ;;  %v3156_v28 = vld [vmem:[#allocation2 + $0x92] sm:$0xff] }
 0x14b   : > { %v1288_v30 = vmax.f32 %v1272_v29, 0.0  ;;  %v8185_v29 = vld [vmem:[#allocation2 + $0xb2] sm:$0xff] }
 0x14c   : > { %v7958_v31 = vld [vmem:[#allocation2 + $0xe1] sm:$0xff] }
 0x14d   : > { %6946 = vmatprep.mubr.msk.f32.mxu1 %vm390_vm2, %v7958_v31  ;;  %7104 = vmatmul.mubr.msk.f32.gmra.mxu0 %vm390_vm2, %v7958_v31  ;;  %1305 = vst.msk [vmem:[#allocation2 + $0xf1] sm:$0xff] %vm390_vm2, %v1288_v30  ;;  %v8078_v60 = vld [vmem:[#allocation2 + $0xe0] sm:$0xff]  ;;  %v5864_v30 = vld [vmem:[%s10545_s3 + $0xd0] sm:$0xff] }
 0x150   : > { %v1223_v26 = vld [vmem:[#allocation4 + $0xd0] ss:$2 sm:$0xff]  ;;  %v1255_v32 = vld [vmem:[#allocation4 + $0xd1] ss:$2 sm:$0xff] }
 0x151   : > { %v1273_v33 = vmax.f32 %v1223_v26, %v1255_v32  ;;  %v8193_v26 = vld [vmem:[#allocation2 + $0xc2] sm:$0xff]  ;;  %v8199_v32 = vld [vmem:[#allocation2 + $0xd2] sm:$0xff] }
 0x153   : > { %v1289_v34 = vmax.f32 %v1273_v33, 0.0  ;;  %v5863_v33 = vld [vmem:[%s10545_s3 + $0xc8] sm:$0xff] }
 0x154   : > { %v7965_v35 = vld [vmem:[#allocation2 + $0xf1] sm:$0xff] }
 0x155   : > { %6947 = vmatmul.mubr.msk.f32.gmra.mxu1 %vm390_vm2, %v7965_v35  ;;  %7106 = vmatprep.mubr.msk.f32.mxu0 %vm390_vm2, %v7965_v35  ;;  %1306 = vst.msk [vmem:[#allocation2 + $0x101] sm:$0xff] %vm390_vm2, %v1289_v34  ;;  %v8092_v63 = vld [vmem:[#allocation2 + $0xf0] sm:$0xff]  ;;  %v8208_v34 = vld [vmem:[#allocation2 + $0xe2] sm:$0xff] }
 0x15c   : > { %v7972_v36 = vld [vmem:[#allocation2 + $0x101] sm:$0xff] }
 0x15d   : > { %6949 = vmatprep.mubr.msk.f32.mxu1 %vm390_vm2, %v7972_v36  ;;  %7107 = vmatmul.mubr.msk.f32.gmra.mxu0 %vm390_vm2, %v7972_v36  ;;  %v8096_v0 = vld [vmem:[#allocation2 + $0x100] sm:$0xff] }
 0x15e   : > { %6950 = vmatmul.mubr.msk.f32.gmra.mxu1 %vm390_vm2, %v7978_v39  ;;  %7109 = vmatprep.mubr.msk.f32.mxu0 %vm390_vm2, %v7978_v39 }
 0x15f   : > { %6968 = vmatprep.mubr.msk.f32.mxu1 %vm390_vm2, %v1309_v38  ;;  %v8214_v38 = vld [vmem:[#allocation2 + $0xf2] sm:$0xff] }
 0x161   : > { %7110 = vmatmul.mubr.msk.f32.gmra.mxu0 %vm390_vm2, %v7984_v40 }
 0x162   : > { %6969 = vmatmul.mubr.msk.f32.vlgmr.msra.gmra.mxu1 %vm390_vm2, %v7989_v41  ;;  %7168 = vmatprep.mubr.msk.f32.mxu0 %vm390_vm2, %v7991_v42 }
 0x163   : > { %6993 = vmatpush3.msra.mxu1 %v7853_v15  ;;  %6971 = vmatprep.mubr.msk.f32.mxu1 %vm390_vm2, %v7991_v42  ;;  %v5842_v15 = vld [vmem:[%s10545_s3 + $0xa0] sm:$0xff] }
 0x164   : > { %6994 = vmatprep.subr.mxu1 %v5844_v43 }
 0x165   : > { %7169 = vmatmul.mubr.msk.f32.vlgmr.msra.gmra.mxu0 %vm390_vm2, %v8003_v44  ;;  %6995 = vmatpush3.msra.mxu1 %v5844_v43  ;;  %v5862_v43 = vld [vmem:[%s10545_s3 + $0xc0] sm:$0xff] }
 0x166   : > { %6972 = vmatmul.mubr.msk.f32.gmra.mxu1 %vm390_vm2, %v8003_v44  ;;  %7171 = vmatprep.mubr.msk.f32.mxu0 %vm390_vm2, %v8010_v45 }
 0x167   : > { %6974 = vmatprep.mubr.msk.f32.mxu1 %vm390_vm2, %v8010_v45  ;;  %6996 = vmatprep.subr.mxu1 %v5843_v23 }
 0x168   : > { %6997 = vmatpush3.msra.mxu1 %v5843_v23  ;;  %7233 = vmatpush3.msra.mxu0 %v7877_v37  ;;  %v8040_v37 = vld [vmem:[#allocation2 + $0x70] sm:$0xff]  ;;  %v8223_v23 = vld [vmem:[#allocation2 + $0x102] sm:$0xff] }
 0x169   : > { %7172 = vmatmul.mubr.msk.f32.gmra.mxu0 %vm390_vm2, %v8021_v46  ;;  %6998 = vmatprep.subr.mxu1 %v5842_v15 }
 0x16a   : > { %6975 = vmatmul.mubr.msk.f32.gmra.mxu1 %vm390_vm2, %v8021_v46  ;;  %7174 = vmatprep.mubr.msk.f32.mxu0 %vm390_vm2, %v8026_v47 }
 0x16b   : > { %6977 = vmatprep.mubr.msk.f32.mxu1 %vm390_vm2, %v8026_v47  ;;  %6999 = vmatpush3.msra.mxu1 %v5842_v15  ;;  %v5917_v15 = vld [vmem:[%s10545_s3 + $0x178] sm:$0xff] }
 0x16c   : > { %7000 = vmatprep.subr.mxu1 %v5841_v48  ;;  %7234 = vmatprep.subr.mxu0 %v5988_v49 }
 0x16d   : > { %7175 = vmatmul.mubr.msk.f32.gmra.mxu0 %vm390_vm2, %v8040_v37  ;;  %7001 = vmatpush3.msra.mxu1 %v5841_v48  ;;  %v8232_v48 = vld [vmem:[#allocation2 + $0x112] sm:$0xff] }
 0x16e   : > { %6978 = vmatmul.mubr.msk.f32.gmra.mxu1 %vm390_vm2, %v8040_v37  ;;  %7177 = vmatprep.mubr.msk.f32.mxu0 %vm390_vm2, %v8047_v52 }
 0x16f   : > { %6980 = vmatprep.mubr.msk.f32.mxu1 %vm390_vm2, %v1317_v50  ;;  %7002 = vmatprep.subr.mxu1 %v5840_v51  ;;  %v3164_v50 = vld [vmem:[#allocation2 + $0x132] sm:$0xff] }
 0x170   : > { %7003 = vmatpush3.msra.mxu1 %v5840_v51  ;;  %7235 = vmatpush3.msra.mxu0 %v5988_v49  ;;  %v8234_v49 = vld [vmem:[#allocation2 + $0x122] sm:$0xff]  ;;  %v5916_v51 = vld [vmem:[%s10545_s3 + $0x170] sm:$0xff] }
 0x171   : > { %7178 = vmatmul.mubr.msk.f32.gmra.mxu0 %vm390_vm2, %v2688_v53  ;;  %7004 = vmatprep.subr.mxu1 %v5839_v54  ;;  %v5914_v53 = vld [vmem:[%s10545_s3 + $0x160] sm:$0xff] }
 0x172   : > { %6981 = vmatmul.mubr.msk.f32.gmra.mxu1 %vm390_vm2, %v8061_v56  ;;  %7180 = vmatprep.mubr.msk.f32.mxu0 %vm390_vm2, %v8063_v57 }
 0x173   : > { %6983 = vmatprep.mubr.msk.f32.mxu1 %vm390_vm2, %v8063_v57  ;;  %7236 = vmatprep.subr.mxu0 %v5987_v55 }
 0x174   : > { %7005 = vmatpush3.msra.mxu1 %v5839_v54  ;;  %7237 = vmatpush3.msra.mxu0 %v5987_v55  ;;  %v5962_v54 = vld [vmem:[%s10545_s3 + $0x1e0] sm:$0xff]  ;;  %v5961_v55 = vld [vmem:[%s10545_s3 + $0x1d8] sm:$0xff] }
 0x175   : > { %7181 = vmatmul.mubr.msk.f32.gmra.mxu0 %vm390_vm2, %v8074_v59  ;;  %7238 = vmatprep.subr.mxu0 %v5986_v58 }
 0x176   : > { %6984 = vmatmul.mubr.msk.f32.gmra.mxu1 %vm390_vm2, %v8074_v59  ;;  %7183 = vmatprep.mubr.msk.f32.mxu0 %vm390_vm2, %v8078_v60 }
 0x177   : > { %6986 = vmatprep.mubr.msk.f32.mxu1 %vm390_vm2, %v8078_v60  ;;  %7239 = vmatpush3.msra.mxu0 %v5986_v58  ;;  %v5958_v58 = vld [vmem:[%s10545_s3 + $0x1c0] sm:$0xff] }
 0x178   : > { %7006 = vmatprep.subr.mxu1 %v5838_v61  ;;  %7240 = vmatprep.subr.mxu0 %v5985_v62 }
 0x179   : > { %7184 = vmatmul.mubr.msk.f32.gmra.mxu0 %vm390_vm2, %v8092_v63  ;;  %7007 = vmatpush3.msra.mxu1 %v5838_v61  ;;  %v2917_v61 = vld [vmem:[#allocation2 + $0x41] sm:$0xff] }
 0x17a   : > { %6987 = vmatmul.mubr.msk.f32.gmra.mxu1 %vm390_vm2, %v8092_v63  ;;  %7186 = vmatprep.mubr.msk.f32.mxu0 %vm390_vm2, %v8096_v0 }
 0x17b   : > { %6989 = vmatprep.mubr.msk.f32.mxu1 %vm390_vm2, %v8096_v0  ;;  %7241 = vmatpush3.msra.mxu0 %v5985_v62  ;;  %v2918_v62 = vld [vmem:[#allocation2 + $0x51] sm:$0xff] }
 0x17c   : > { %7242 = vmatprep.subr.mxu0 %v5984_v1  ;;  %7032 = vmatprep.subr.mxu1 %v5869_v3 }
 0x17d   : > { %7187 = vmatmul.mubr.msk.f32.gmra.mxu0 %vm390_vm2, %v8112_v5 }
 0x17e   : > { %6990 = vmatmul.mubr.msk.f32.gmra.mxu1 %vm390_vm2, %v8112_v5  ;;  %7189 = vmatprep.mubr.msk.f32.mxu0 %vm390_vm2, %v8110_v24 }
 0x17f   : > { %7243 = vmatpush3.msra.mxu0 %v5984_v1  ;;  %7008 = vmatprep.mubr.msk.f32.mxu1 %vm390_vm2, %v1744_v6  ;;  %v2921_v1 = vld [vmem:[#allocation2 + $0x81] sm:$0xff] }
 0x180   : > { %7244 = vmatprep.subr.mxu0 %v5983_v7 }
 0x181   : > { %7190 = vmatmul.mubr.msk.f32.gmra.mxu0 %vm390_vm2, %v2696_v8 }
 0x182   : > { %7009 = vmatmul.mubr.msk.f32.vlgmr.msra.gmra.mxu1 %vm390_vm2, %v8125_v9  ;;  %7245 = vmatpush3.msra.mxu0 %v5983_v7 }
 0x183   : > { %7033 = vmatpush3.msra.mxu1 %v5869_v3  ;;  %7248 = vmatprep.mubr.msk.f32.mxu0 %vm390_vm2, %v8132_v11  ;;  %v2922_v3 = vld [vmem:[#allocation2 + $0x91] sm:$0xff] }
 0x184   : > { %7011 = vmatprep.mubr.msk.f32.mxu1 %vm390_vm2, %v8132_v11  ;;  %7246 = vmatprep.subr.mxu0 %v5982_v10 }
 0x185   : > { %7247 = vmatpush3.msra.mxu0 %v5982_v10  ;;  %7034 = vmatprep.subr.mxu1 %v5868_v12 }
 0x186   : > { %7249 = vmatmul.mubr.msk.f32.vlgmr.msra.gmra.mxu0 %vm390_vm2, %v8141_v13  ;;  %7012 = vmatmul.mubr.msk.f32.gmra.mxu1 %vm390_vm2, %v8141_v13 }
 0x187   : > { %7035 = vmatpush3.msra.mxu1 %v5868_v12  ;;  %7251 = vmatprep.mubr.msk.f32.mxu0 %vm390_vm2, %v8150_v16 }
 0x188   : > { %7014 = vmatprep.mubr.msk.f32.mxu1 %vm390_vm2, %v8150_v16  ;;  %7036 = vmatprep.subr.mxu1 %v5867_v14 }
 0x189   : > { %7037 = vmatpush3.msra.mxu1 %v5867_v14 }
 0x18a   : > { %7252 = vmatmul.mubr.msk.f32.gmra.mxu0 %vm390_vm2, %v8156_v17  ;;  %7015 = vmatmul.mubr.msk.f32.gmra.mxu1 %vm390_vm2, %v8156_v17 }
 0x18b   : > { %7254 = vmatprep.mubr.msk.f32.mxu0 %vm390_vm2, %v8165_v20  ;;  %7017 = vmatprep.mubr.msk.f32.mxu1 %vm390_vm2, %v8165_v20 }
 0x18c   : > { %7038 = vmatprep.subr.mxu1 %v5866_v18 }
 0x18d   : > { %7039 = vmatpush3.msra.mxu1 %v5866_v18  ;;  %v6038_v18 = vld [vmem:[%s10547_s5 + $0x1f8] sm:$0xff] }
 0x18e   : > { %7255 = vmatmul.mubr.msk.f32.gmra.mxu0 %vm390_vm2, %v8171_v22  ;;  %7018 = vmatmul.mubr.msk.f32.gmra.mxu1 %vm390_vm2, %v8171_v22 }
 0x18f   : > { %7257 = vmatprep.mubr.msk.f32.mxu0 %vm390_vm2, %v8180_v27  ;;  %7020 = vmatprep.mubr.msk.f32.mxu1 %vm390_vm2, %v1752_v21 }
 0x190   : > { %7040 = vmatprep.subr.mxu1 %v5865_v25 }
 0x191   : > { %7041 = vmatpush3.msra.mxu1 %v5865_v25  ;;  %v6037_v25 = vld [vmem:[%s10547_s5 + $0x1f0] sm:$0xff] }
 0x192   : > { %7258 = vmatmul.mubr.msk.f32.gmra.mxu0 %vm390_vm2, %v3156_v28  ;;  %7021 = vmatmul.mubr.msk.f32.gmra.mxu1 %vm390_vm2, %v8185_v29  ;;  %v6036_v28 = vld [vmem:[%s10547_s5 + $0x1e8] sm:$0xff] }
 0x193   : > { %7260 = vmatprep.mubr.msk.f32.mxu0 %vm390_vm2, %v8193_v26  ;;  %7023 = vmatprep.mubr.msk.f32.mxu1 %vm390_vm2, %v8193_v26 }
 0x194   : > { %7042 = vmatprep.subr.mxu1 %v5864_v30 }
 0x195   : > { %7043 = vmatpush3.msra.mxu1 %v5864_v30 }
 0x196   : > { %7261 = vmatmul.mubr.msk.f32.gmra.mxu0 %vm390_vm2, %v8199_v32  ;;  %7024 = vmatmul.mubr.msk.f32.gmra.mxu1 %vm390_vm2, %v8199_v32 }
 0x197   : > { %7263 = vmatprep.mubr.msk.f32.mxu0 %vm390_vm2, %v8208_v34  ;;  %7026 = vmatprep.mubr.msk.f32.mxu1 %vm390_vm2, %v8208_v34 }
 0x198   : > { %7044 = vmatprep.subr.mxu1 %v5863_v33 }
 0x199   : > { %7045 = vmatpush3.msra.mxu1 %v5863_v33  ;;  %v6034_v33 = vld [vmem:[%s10547_s5 + $0x1d8] sm:$0xff] }
 0x19a   : > { %7264 = vmatmul.mubr.msk.f32.gmra.mxu0 %vm390_vm2, %v8214_v38  ;;  %7027 = vmatmul.mubr.msk.f32.gmra.mxu1 %vm390_vm2, %v8214_v38 }
 0x19b   : > { %7266 = vmatprep.mubr.msk.f32.mxu0 %vm390_vm2, %v8223_v23  ;;  %7029 = vmatprep.mubr.msk.f32.mxu1 %vm390_vm2, %v8223_v23 }
 0x19c   : > { %7046 = vmatprep.subr.mxu1 %v5862_v43 }
 0x19d   : > { %7047 = vmatpush3.msra.mxu1 %v5862_v43 }
 0x19e   : > { %7267 = vmatmul.mubr.msk.f32.gmra.mxu0 %vm390_vm2, %v8232_v48  ;;  %7030 = vmatmul.mubr.msk.f32.gmra.mxu1 %vm390_vm2, %v8232_v48 }
 0x19f   : > { %7048 = vmatprep.mubr.msk.f32.mxu1 %vm390_vm2, %v7989_v41  ;;  %7112 = vmatprep.subr.mxu1 %v5917_v15  ;;  %v5915_v41 = vld [vmem:[%s10545_s3 + $0x168] sm:$0xff] }
 0x1a0   : > { %7269 = vmatprep.mubr.msk.f32.mxu0 %vm390_vm2, %v8234_v49 }
 0x1a2   : > { %7049 = vmatmul.mubr.msk.f32.vlgmr.msra.gmra.mxu1 %vm390_vm2, %v7991_v42  ;;  %7270 = vmatmul.mubr.msk.f32.gmra.mxu0 %vm390_vm2, %v3164_v50  ;;  %v5913_v42 = vld [vmem:[%s10545_s3 + $0x158] sm:$0xff] }
 0x1a3   : > { %7113 = vmatpush3.msra.mxu1 %v5917_v15  ;;  %7051 = vmatprep.mubr.msk.f32.mxu1 %vm390_vm2, %v8003_v44  ;;  %v5912_v44 = vld [vmem:[%s10545_s3 + $0x150] sm:$0xff] }
 0x1a4   : > { %7114 = vmatprep.subr.mxu1 %v5916_v51  ;;  %3715 = vmatprep.mubr.f32.mxu0 %v10554_v2  ;;  %v3491_v15 = vld [vmem:[%s10547_s5 + $0xd0] sm:$0xff] }
 0x1a5   : > { %7115 = vmatpush3.msra.mxu1 %v5916_v51 }
 0x1a6   : > { %7052 = vmatmul.mubr.msk.f32.gmra.mxu1 %vm390_vm2, %v8010_v45  ;;  %7116 = vmatprep.subr.mxu1 %v5915_v41  ;;  %v5911_v45 = vld [vmem:[%s10545_s3 + $0x148] sm:$0xff] }
 0x1a7   : > { %7054 = vmatprep.mubr.msk.f32.mxu1 %vm390_vm2, %v8021_v46  ;;  %7117 = vmatpush3.msra.mxu1 %v5915_v41  ;;  %v5910_v46 = vld [vmem:[%s10545_s3 + $0x140] sm:$0xff] }
 0x1a8   : > { %7118 = vmatprep.subr.mxu1 %v5914_v53  ;;  %v6031_v41 = vld [vmem:[%s10547_s5 + $0x1c0] sm:$0xff] }
 0x1a9   : > { %7119 = vmatpush3.msra.mxu1 %v5914_v53  ;;  %v3489_v53 = vld [vmem:[%s10547_s5 + $0xc0] sm:$0xff] }
 0x1aa   : > { %7055 = vmatmul.mubr.msk.f32.gmra.mxu1 %vm390_vm2, %v8026_v47  ;;  %7120 = vmatprep.subr.mxu1 %v5913_v42  ;;  %v5965_v47 = vld [vmem:[%s10545_s3 + $0x1f8] sm:$0xff] }
 0x1ab   : > { %7057 = vmatprep.mubr.msk.f32.mxu1 %vm390_vm2, %v8040_v37  ;;  %7121 = vmatpush3.msra.mxu1 %v5913_v42  ;;  %v5964_v37 = vld [vmem:[%s10545_s3 + $0x1f0] sm:$0xff]  ;;  %v6030_v42 = vld [vmem:[%s10547_s5 + $0x1b8] sm:$0xff] }
 0x1ac   : > { %7122 = vmatprep.subr.mxu1 %v5912_v44 }
 0x1ad   : > { %7123 = vmatpush3.msra.mxu1 %v5912_v44  ;;  %v3488_v44 = vld [vmem:[%s10547_s5 + $0xb8] sm:$0xff] }
 0x1ae   : > { %7058 = vmatmul.mubr.msk.f32.gmra.mxu1 %vm390_vm2, %v8047_v52  ;;  %7124 = vmatprep.subr.mxu1 %v5911_v45  ;;  %v5963_v52 = vld [vmem:[%s10545_s3 + $0x1e8] sm:$0xff] }
 0x1af   : > { %7060 = vmatprep.mubr.msk.f32.mxu1 %vm390_vm2, %v8061_v56  ;;  %7125 = vmatpush3.msra.mxu1 %v5911_v45  ;;  %v5960_v56 = vld [vmem:[%s10545_s3 + $0x1d0] sm:$0xff] }
 0x1b0   : > { %7126 = vmatprep.subr.mxu1 %v5910_v46 }
 0x1b1   : > { %7127 = vmatpush3.msra.mxu1 %v5910_v46  ;;  %v6029_v46 = vld [vmem:[%s10547_s5 + $0x1b0] sm:$0xff] }
 0x1b2   : > { %7061 = vmatmul.mubr.msk.f32.gmra.mxu1 %vm390_vm2, %v8063_v57  ;;  %7192 = vmatprep.subr.mxu1 %v5965_v47  ;;  %v5959_v57 = vld [vmem:[%s10545_s3 + $0x1c8] sm:$0xff] }
 0x1b3   : > { %7063 = vmatprep.mubr.msk.f32.mxu1 %vm390_vm2, %v8074_v59  ;;  %v2915_v59 = vld [vmem:[#allocation2 + $0x21] sm:$0xff] }
 0x1b6   : > { %7064 = vmatmul.mubr.msk.f32.gmra.mxu1 %vm390_vm2, %v8078_v60  ;;  %v2916_v60 = vld [vmem:[#allocation2 + $0x31] sm:$0xff] }
 0x1b7   : > { %7066 = vmatprep.mubr.msk.f32.mxu1 %vm390_vm2, %v8092_v63  ;;  %v2919_v63 = vld [vmem:[#allocation2 + $0x61] sm:$0xff] }
 0x1ba   : > { %7067 = vmatmul.mubr.msk.f32.gmra.mxu1 %vm390_vm2, %v8096_v0  ;;  %v2920_v0 = vld [vmem:[#allocation2 + $0x71] sm:$0xff] }
 0x1bb   : > { %7069 = vmatprep.mubr.msk.f32.mxu1 %vm390_vm2, %v8112_v5 }
 0x1be   : > { %7070 = vmatmul.mubr.msk.f32.gmra.mxu1 %vm390_vm2, %v8110_v24  ;;  %v8367_v24 = vpop.f32.mrf.mxu1 }
 0x1bf   : > { %7128 = vmatprep.mubr.msk.f32.mxu1 %vm390_vm2, %v8125_v9  ;;  %v8399_v9 = vpop.f32.mrf.mxu0 }
 0x1c0   : > { %v8373_v5 = vpop.f32.mrf.mxu1 }
 0x1c2   : > { %7129 = vmatmul.mubr.msk.f32.vlgmr.msra.gmra.mxu1 %vm390_vm2, %v8132_v11  ;;  %v8403_v11 = vpop.f32.mrf.mxu0 }
 0x1c3   : > { %7193 = vmatpush3.msra.mxu1 %v5965_v47  ;;  %7131 = vmatprep.mubr.msk.f32.mxu1 %vm390_vm2, %v8141_v13  ;;  %v3487_v47 = vld [vmem:[%s10547_s5 + $0xb0] sm:$0xff] }
 0x1c4   : > { %7194 = vmatprep.subr.mxu1 %v5964_v37 }
 0x1c5   : > { %7195 = vmatpush3.msra.mxu1 %v5964_v37  ;;  %v8375_v6 = vpop.f32.mrf.mxu1  ;;  %v6028_v37 = vld [vmem:[%s10547_s5 + $0x1a8] sm:$0xff] }
 0x1c6   : > { %7132 = vmatmul.mubr.msk.f32.gmra.mxu1 %vm390_vm2, %v8150_v16  ;;  %7196 = vmatprep.subr.mxu1 %v5963_v52 }
 0x1c7   : > { %7134 = vmatprep.mubr.msk.f32.mxu1 %vm390_vm2, %v8156_v17  ;;  %7197 = vmatpush3.msra.mxu1 %v5963_v52  ;;  %v3486_v52 = vld [vmem:[%s10547_s5 + $0xa8] sm:$0xff] }
 0x1c8   : > { %7198 = vmatprep.subr.mxu1 %v5962_v54 }
 0x1c9   : > { %7199 = vmatpush3.msra.mxu1 %v5962_v54 }
 0x1ca   : > { %7135 = vmatmul.mubr.msk.f32.gmra.mxu1 %vm390_vm2, %v8165_v20  ;;  %7200 = vmatprep.subr.mxu1 %v5961_v55  ;;  %v3496_v20 = vld [vmem:[%s10547_s5 + $0xf8] sm:$0xff] }
 0x1cb   : > { %7137 = vmatprep.mubr.msk.f32.mxu1 %vm390_vm2, %v8171_v22  ;;  %7201 = vmatpush3.msra.mxu1 %v5961_v55 }
 0x1cc   : > { %7202 = vmatprep.subr.mxu1 %v5960_v56  ;;  %3651 = vmatprep.subr.mxu0 %v3496_v20  ;;  %v6022_v20 = vld [vmem:[%s10547_s5 + $0x178] sm:$0xff] }
 0x1cd   : > { %7203 = vmatpush3.msra.mxu1 %v5960_v56  ;;  %v8407_v13 = vpop.f32.mrf.mxu0  ;;  %v6027_v56 = vld [vmem:[%s10547_s5 + $0x1a0] sm:$0xff] }
 0x1ce   : > { %7138 = vmatmul.mubr.msk.f32.gmra.mxu1 %vm390_vm2, %v8180_v27  ;;  %7204 = vmatprep.subr.mxu1 %v5959_v57  ;;  %v3495_v27 = vld [vmem:[%s10547_s5 + $0xf0] sm:$0xff] }
 0x1cf   : > { %7140 = vmatprep.mubr.msk.f32.mxu1 %vm390_vm2, %v8185_v29  ;;  %7205 = vmatpush3.msra.mxu1 %v5959_v57  ;;  %v8411_v16 = vpop.f32.mrf.mxu0  ;;  %v3494_v29 = vld [vmem:[%s10547_s5 + $0xe8] sm:$0xff]  ;;  %v3485_v57 = vld [vmem:[%s10547_s5 + $0xa0] sm:$0xff] }
 0x1d0   : > { %7206 = vmatprep.subr.mxu1 %v5958_v58  ;;  %3652 = vmatpush1.msra.mxu0 %v3495_v27 }
 0x1d1   : > { %7207 = vmatpush3.msra.mxu1 %v5958_v58  ;;  %3653 = vmatprep.subr.mxu0 %v3494_v29  ;;  %v6026_v58 = vld [vmem:[%s10547_s5 + $0x198] sm:$0xff]  ;;  %v6021_v29 = vld [vmem:[%s10547_s5 + $0x170] sm:$0xff] }
 0x1d2   : > { %7141 = vmatmul.mubr.msk.f32.gmra.mxu1 %vm390_vm2, %v8193_v26  ;;  %3538 = vmatprep.subr.mxu1 %v6038_v18  ;;  %v6035_v26 = vld [vmem:[%s10547_s5 + $0x1e0] sm:$0xff] }
 0x1d3   : > { %7143 = vmatprep.mubr.msk.f32.mxu1 %vm390_vm2, %v8199_v32  ;;  %v3493_v32 = vld [vmem:[%s10547_s5 + $0xe0] sm:$0xff] }
 0x1d4   : > { %3654 = vmatpush1.msra.mxu0 %v3493_v32  ;;  %v3481_v18 = vld [vmem:[%s10547_s5 + $0x80] sm:$0xff]  ;;  %v6020_v32 = vld [vmem:[%s10547_s5 + $0x168] sm:$0xff] }
 0x1d6   : > { %7144 = vmatmul.mubr.msk.f32.gmra.mxu1 %vm390_vm2, %v8208_v34  ;;  %v3492_v34 = vld [vmem:[%s10547_s5 + $0xd8] sm:$0xff] }
 0x1d7   : > { %7146 = vmatprep.mubr.msk.f32.mxu1 %vm390_vm2, %v8214_v38  ;;  %3655 = vmatprep.subr.mxu0 %v3492_v34 }
 0x1d8   : > { %3656 = vmatpush1.msra.mxu0 %v3491_v15  ;;  %v6019_v15 = vld [vmem:[%s10547_s5 + $0x160] sm:$0xff] }
 0x1da   : > { %7147 = vmatmul.mubr.msk.f32.gmra.mxu1 %vm390_vm2, %v8223_v23  ;;  %v6033_v23 = vld [vmem:[%s10547_s5 + $0x1d0] sm:$0xff] }
 0x1db   : > { %7149 = vmatprep.mubr.msk.f32.mxu1 %vm390_vm2, %v8232_v48  ;;  %v6032_v48 = vld [vmem:[%s10547_s5 + $0x1c8] sm:$0xff] }
 0x1dd   : > { %v8421_v21 = vpop.f32.mrf.mxu0 }
 0x1de   : > { %7150 = vmatmul.mubr.msk.f32.gmra.mxu1 %vm390_vm2, %v8234_v49  ;;  %v3490_v49 = vld [vmem:[%s10547_s5 + $0xc8] sm:$0xff] }
 0x1df   : > { %7208 = vmatprep.mubr.msk.f32.mxu1 %vm390_vm2, %v2915_v59  ;;  %v8451_v38 = vpop.f32.mrf.mxu0  ;;  %3657 = vmatprep.subr.mxu0 %v3490_v49  ;;  %v3484_v59 = vld [vmem:[%s10547_s5 + $0x98] sm:$0xff] }
 0x1e0   : > { %3658 = vmatpush1.msra.mxu0 %v3489_v53  ;;  %v3476_v53 = vld [vmem:[%s10547_s5 + $0x58] sm:$0xff] }
 0x1e1   : > { %3659 = vmatprep.subr.mxu0 %v3488_v44  ;;  %v6017_v44 = vld [vmem:[%s10547_s5 + $0x150] sm:$0xff] }
 0x1e2   : > { %7209 = vmatmul.mubr.msk.f32.vlgmr.msra.gmra.mxu1 %vm390_vm2, %v2916_v60  ;;  %3660 = vmatpush1.msra.mxu0 %v3487_v47  ;;  %v3474_v47 = vld [vmem:[%s10547_s5 + $0x48] sm:$0xff] }
 0x1e3   : > { %7211 = vmatprep.mubr.msk.f32.mxu1 %vm390_vm2, %v2917_v61  ;;  %3539 = vmatpush1.msra.mxu1 %v6037_v25  ;;  %v3480_v25 = vld [vmem:[%s10547_s5 + $0x78] sm:$0xff] }
 0x1e4   : > { %3540 = vmatprep.subr.mxu1 %v6036_v28  ;;  %3661 = vmatprep.subr.mxu0 %v3486_v52 }
 0x1e5   : > { %3541 = vmatpush1.msra.mxu1 %v6035_v26  ;;  %3662 = vmatpush1.msra.mxu0 %v3485_v57  ;;  %v3479_v26 = vld [vmem:[%s10547_s5 + $0x70] sm:$0xff]  ;;  %v3473_v57 = vld [vmem:[%s10547_s5 + $0x40] sm:$0xff] }
 0x1e6   : > { %7212 = vmatmul.mubr.msk.f32.gmra.mxu1 %vm390_vm2, %v2918_v62  ;;  %3542 = vmatprep.subr.mxu1 %v6034_v33  ;;  %v6025_v62 = vld [vmem:[%s10547_s5 + $0x190] sm:$0xff]  ;;  %v3478_v33 = vld [vmem:[%s10547_s5 + $0x68] sm:$0xff] }
 0x1e7   : > { %7214 = vmatprep.mubr.msk.f32.mxu1 %vm390_vm2, %v2919_v63  ;;  %3543 = vmatpush1.msra.mxu1 %v6033_v23  ;;  %v3483_v63 = vld [vmem:[%s10547_s5 + $0x90] sm:$0xff] }
 0x1e8   : > { %3544 = vmatprep.subr.mxu1 %v6032_v48  ;;  %3663 = vmatprep.subr.mxu0 %v3484_v59  ;;  %v3477_v48 = vld [vmem:[%s10547_s5 + $0x60] sm:$0xff]  ;;  %v6014_v59 = vld [vmem:[%s10547_s5 + $0x138] sm:$0xff] }
 0x1e9   : > { %3545 = vmatpush1.msra.mxu1 %v6031_v41  ;;  %3664 = vmatpush1.msra.mxu0 %v3483_v63  ;;  %v6018_v41 = vld [vmem:[%s10547_s5 + $0x158] sm:$0xff] }
 0x1ea   : > { %7215 = vmatmul.mubr.msk.f32.gmra.mxu1 %vm390_vm2, %v2920_v0  ;;  %3546 = vmatprep.subr.mxu1 %v6030_v42  ;;  %v6024_v0 = vld [vmem:[%s10547_s5 + $0x188] sm:$0xff] }
 0x1eb   : > { %7217 = vmatprep.mubr.msk.f32.mxu1 %vm390_vm2, %v2921_v1  ;;  %3547 = vmatpush1.msra.mxu1 %v6029_v46  ;;  %v3482_v1 = vld [vmem:[%s10547_s5 + $0x88] sm:$0xff] }
 0x1ec   : > { %3548 = vmatprep.subr.mxu1 %v6028_v37  ;;  %3665 = vmatprep.subr.mxu0 %v3482_v1  ;;  %v6016_v46 = vld [vmem:[%s10547_s5 + $0x148] sm:$0xff]  ;;  %v3471_v1 = vld [vmem:[%s10547_s5 + $0x30] sm:$0xff] }
 0x1ed   : > { %v8467_v50 = vpop.f32.mrf.mxu0  ;;  %3549 = vmatpush1.msra.mxu1 %v6027_v56  ;;  %3666 = vmatpush1.msra.mxu0 %v3481_v18  ;;  %v6015_v56 = vld [vmem:[%s10547_s5 + $0x140] sm:$0xff]  ;;  %v3470_v18 = vld [vmem:[%s10547_s5 + $0x28] sm:$0xff] }
 0x1ee   : > { %7218 = vmatmul.mubr.msk.f32.gmra.mxu1 %vm390_vm2, %v2922_v3  ;;  %3550 = vmatprep.subr.mxu1 %v6026_v58 }
 0x1ef   : > { %7220 = vmatprep.mubr.msk.f32.mxu1 %vm390_vm2, %v7934_v4  ;;  %v2930_v4 = vld [vmem:[#allocation2 + $0x131] sm:$0xff]  ;;  %v8497_v54 = vpop.f32.mrf.mxu0  ;;  %3551 = vmatpush1.msra.mxu1 %v6025_v62 }
 0x1f0   : > { %10557 = vst [vmem:[#allocation7_spill] sm:$0xff] %v8497_v54  ;;  %3552 = vmatprep.subr.mxu1 %v6024_v0  ;;  %3667 = vmatprep.subr.mxu0 %v3480_v25  ;;  %v3472_v62 = vld [vmem:[%s10547_s5 + $0x38] sm:$0xff]  ;;  %v6011_v25 = vld [vmem:[%s10547_s5 + $0x120] sm:$0xff] }
 0x1f1   : > { %3668 = vmatpush1.msra.mxu0 %v3479_v26 }
 0x1f2   : > { %7221 = vmatmul.mubr.msk.f32.gmra.mxu1 %vm390_vm2, %v7947_v19  ;;  %v8381_v19 = vpop.f32.mrf.mxu1  ;;  %3669 = vmatprep.subr.mxu0 %v3478_v33  ;;  %v3468_v33 = vld [vmem:[%s10547_s5 + $0x18] sm:$0xff] }
 0x1f3   : > { %7223 = vmatprep.mubr.msk.f32.mxu1 %vm390_vm2, %v7958_v31  ;;  %3670 = vmatpush1.msra.mxu0 %v3477_v48  ;;  %v3467_v48 = vld [vmem:[%s10547_s5 + $0x10] sm:$0xff] }
 0x1f4   : > { %v8385_v31 = vpop.f32.mrf.mxu1  ;;  %3671 = vmatprep.subr.mxu0 %v3476_v53  ;;  %v3466_v53 = vld [vmem:[%s10547_s5 + $0x8] sm:$0xff] }
 0x1f6   : > { %7224 = vmatmul.mubr.msk.f32.gmra.mxu1 %vm390_vm2, %v7965_v35  ;;  %v8387_v35 = vpop.f32.mrf.mxu1 }
 0x1f7   : > { %7226 = vmatprep.mubr.msk.f32.mxu1 %vm390_vm2, %v7972_v36 }
 0x1f8   : > { %v8389_v36 = vpop.f32.mrf.mxu1 }
 0x1fa   : > { %7227 = vmatmul.mubr.msk.f32.gmra.mxu1 %vm390_vm2, %v7978_v39  ;;  %v8391_v7 = vpop.f32.mrf.mxu1 }
 0x1fb   : > { %7229 = vmatprep.mubr.msk.f32.mxu1 %vm390_vm2, %v7984_v40 }
 0x1fc   : > { %v8393_v8 = vpop.f32.mrf.mxu1 }
 0x1fd   : > { %v8513_v60 = vpop.f32.mrf.mxu0 }
 0x1fe   : > { %7230 = vmatmul.mubr.msk.f32.gmra.mxu1 %vm390_vm2, %v2930_v4  ;;  %v8395_v39 = vpop.f32.mrf.mxu1  ;;  %10558 = vst [vmem:[#allocation8_spill] sm:$0xff] %v8513_v60  ;;  %v6023_v4 = vld [vmem:[%s10547_s5 + $0x180] sm:$0xff] }
 0x1ff   : > { %3602 = vmatprep.mubr.f32.mxu1 %v10554_v2  ;;  %3553 = vmatpush1.msra.mxu1 %v6023_v4  ;;  %v8543_v27 = vpop.f32.mrf.mxu0  ;;  %v6012_v4 = vld [vmem:[%s10547_s5 + $0x128] sm:$0xff] }
 0x200   : > { %10559 = vst [vmem:[#allocation9_spill] sm:$0xff] %v8543_v27  ;;  %3554 = vmatprep.subr.mxu1 %v6022_v20 }
 0x201   : > { %3555 = vmatpush1.msra.mxu1 %v6021_v29  ;;  %v3469_v29 = vld [vmem:[%s10547_s5 + $0x20] sm:$0xff] }
 0x202   : > { %3556 = vmatprep.subr.mxu1 %v6020_v32  ;;  %v6010_v32 = vld [vmem:[%s10547_s5 + $0x118] sm:$0xff] }
 0x203   : > { %3557 = vmatpush1.msra.mxu1 %v6019_v15 }
 0x204   : > { %3558 = vmatprep.subr.mxu1 %v6018_v41  ;;  %v6008_v41 = vld [vmem:[%s10547_s5 + $0x108] sm:$0xff] }
 0x205   : > { %v8397_v40 = vpop.f32.mrf.mxu1  ;;  %3559 = vmatpush1.msra.mxu1 %v6017_v44 }
 0x206   : > { %3560 = vmatprep.subr.mxu1 %v6016_v46  ;;  %v3465_v46 = vld [vmem:[%s10547_s5] sm:$0xff] }
 0x207   : > { %v8401_v10 = vpop.f32.mrf.mxu1  ;;  %3561 = vmatpush1.msra.mxu1 %v6015_v56  ;;  %v3457_v56 = vld [vmem:[#allocation3] sm:$0xff] }
 0x208   : > { %3562 = vmatprep.subr.mxu1 %v6014_v59 }
 0x20d   : > { %v8559_v34 = vpop.f32.mrf.mxu0 }
 0x20e   : > { %10560 = vst [vmem:[#allocation10_spill] sm:$0xff] %v8559_v34 }
 0x20f   : > { %v8590_v37 = vpop.f32.mrf.mxu0 }
 0x210   : > { %10561 = vst [vmem:[#allocation11_spill] sm:$0xff] %v8590_v37 }
 0x215   : > { %v8405_v12 = vpop.f32.mrf.mxu1 }
 0x217   : > { %v8409_v14 = vpop.f32.mrf.mxu1 }
 0x21d   : > { %v8607_v63 = vpop.f32.mrf.mxu0 }
 0x21e   : > { %v8413_v17 = vpop.f32.mrf.mxu1  ;;  %10562 = vst [vmem:[#allocation12_spill] sm:$0xff] %v8607_v63 }
 0x220   : > { %v8423_v22 = vpop.f32.mrf.mxu1 }
 0x222   : > { %v8437_v30 = vpop.f32.mrf.mxu1 }
 0x224   : > { %v8453_v43 = vpop.f32.mrf.mxu1 }
 0x226   : > { %v8469_v51 = vpop.f32.mrf.mxu1 }
 0x228   : > { %v8483_v45 = vpop.f32.mrf.mxu1 }
 0x22a   : > { %v8499_v55 = vpop.f32.mrf.mxu1 }
 0x22c   : > { %v8515_v61 = vpop.f32.mrf.mxu1 }
 0x22e   : > { %v8529_v3 = vpop.f32.mrf.mxu1 }
 0x230   : > { %v8545_v28 = vpop.f32.mrf.mxu1 }
 0x232   : > { %v6982_v23 = vpop.f32.mrf.mxu1 }
 0x233   : > { %v8568_v49 = vadd.f32 %v6982_v23, %v8393_v8  ;;  %v3475_v8 = vld [vmem:[%s10547_s5 + $0x50] sm:$0xff]  ;;  %v8638_v23 = vpop.f32.mrf.mxu0 }
 0x234   : > { %v8576_v42 = vpop.f32.mrf.mxu1  ;;  %3672 = vmatpush1.msra.mxu0 %v3475_v8  ;;  %10563 = vst [vmem:[#allocation13_spill] sm:$0xff] %v8638_v23  ;;  %v6007_v8 = vld [vmem:[%s10547_s5 + $0x100] sm:$0xff] }
 0x235   : > { %3673 = vmatprep.subr.mxu0 %v3474_v47 }
 0x236   : > { %v6985_v52 = vpop.f32.mrf.mxu1  ;;  %3674 = vmatpush1.msra.mxu0 %v3473_v57  ;;  %v8663_v57 = vpop.f32.mrf.mxu0 }
 0x237   : > { %v8599_v58 = vadd.f32 %v6985_v52, %v8397_v40  ;;  %3675 = vmatprep.subr.mxu0 %v3472_v62  ;;  %v6013_v40 = vld [vmem:[%s10547_s5 + $0x130] sm:$0xff]  ;;  %v3497_v52 = vld [vmem:[#allocation3 + $0x1] sm:$0xff]  ;;  %10564 = vst [vmem:[#allocation14_spill] sm:$0xff] %v8663_v57  ;;  %v1671_v62 = vadd.f32 %v8437_v30, %v8367_v24 }
 0x238   : > { %v8609_v0 = vpop.f32.mrf.mxu1  ;;  %3563 = vmatpush1.msra.mxu1 %v6013_v40  ;;  %3676 = vmatpush1.msra.mxu0 %v3471_v1  ;;  %v6070_v40 = vld [vmem:[%s10547_s5 + $0x2f8] sm:$0xff]  ;;  %v6101_v24 = vld [vmem:[%s10547_s5 + $0x3f0] sm:$0xff] }
 0x239   : > { %3564 = vmatprep.subr.mxu1 %v6012_v4  ;;  %3677 = vmatprep.subr.mxu0 %v3470_v18  ;;  %v6069_v4 = vld [vmem:[%s10547_s5 + $0x2f0] sm:$0xff]  ;;  %v6068_v18 = vld [vmem:[%s10547_s5 + $0x2e8] sm:$0xff] }
 0x23a   : > { %v6988_v20 = vpop.f32.mrf.mxu1  ;;  %3565 = vmatpush1.msra.mxu1 %v6011_v25  ;;  %3678 = vmatpush1.msra.mxu0 %v3469_v29  ;;  %v8691_v25 = vpop.f32.mrf.mxu0 }
 0x23b   : > { %v8630_v26 = vadd.f32 %v6988_v20, %v8405_v12  ;;  %3566 = vmatprep.subr.mxu1 %v6010_v32  ;;  %3679 = vmatprep.subr.mxu0 %v3468_v33  ;;  %v6009_v12 = vld [vmem:[%s10547_s5 + $0x110] sm:$0xff]  ;;  %v6100_v20 = vld [vmem:[%s10547_s5 + $0x3e8] sm:$0xff]  ;;  %10565 = vst [vmem:[#allocation15_spill] sm:$0xff] %v8691_v25  ;;  %v6067_v32 = vld [vmem:[%s10547_s5 + $0x2e0] sm:$0xff] }
 0x23c   : > { %v8640_v15 = vpop.f32.mrf.mxu1  ;;  %3567 = vmatpush1.msra.mxu1 %v6009_v12  ;;  %3680 = vmatpush1.msra.mxu0 %v3467_v48  ;;  %v6099_v33 = vld [vmem:[%s10547_s5 + $0x3e0] sm:$0xff]  ;;  %v1681_v12 = vadd.f32 %v8469_v51, %v8375_v6  ;;  %v6066_v48 = vld [vmem:[%s10547_s5 + $0x2d8] sm:$0xff]  ;;  %v6097_v6 = vld [vmem:[%s10547_s5 + $0x3d0] sm:$0xff] }
 0x23d   : > { %3568 = vmatprep.subr.mxu1 %v6008_v41  ;;  %3681 = vmatprep.subr.mxu0 %v3466_v53  ;;  %v6098_v41 = vld [vmem:[%s10547_s5 + $0x3d8] sm:$0xff] }
 0x23e   : > { %v6991_v44 = vpop.f32.mrf.mxu1  ;;  %3569 = vmatpush1.msra.mxu1 %v6007_v8  ;;  %3682 = vmatpush1.msra.mxu0 %v3465_v46  ;;  %v6064_v8 = vld [vmem:[%s10547_s5 + $0x2c8] sm:$0xff] }
 0x23f   : > { %v8661_v47 = vadd.f32 %v6991_v44, %v8413_v17  ;;  %3603 = vmatmul.mubr.f32.vlgmr.msra.gmra.mxu1 %v3497_v52  ;;  %3716 = vmatmul.mubr.f32.vlgmr.msra.gmra.mxu0 %v3457_v56  ;;  %v6102_v17 = vld [vmem:[%s10547_s5 + $0x3f8] sm:$0xff]  ;;  %v6065_v44 = vld [vmem:[%s10547_s5 + $0x2d0] sm:$0xff]  ;;  %v6096_v46 = vld [vmem:[%s10547_s5 + $0x3c8] sm:$0xff]  ;;  %v8723_v52 = vpop.f32.mrf.mxu0 }
 0x240   : > { %v8665_v59 = vpop.f32.mrf.mxu1  ;;  %3608 = vmatprep.mubr.f32.mxu1 %v10554_v2  ;;  %3721 = vmatprep.mubr.f32.mxu0 %v10554_v2 }
 0x241   : > { %3805 = vmatprep.subr.mxu1 %v6070_v40  ;;  %3975 = vmatprep.subr.mxu0 %v6102_v17  ;;  %v6095_v40 = vld [vmem:[%s10547_s5 + $0x3c0] sm:$0xff]  ;;  %v1691_v17 = vadd.f32 %v8499_v55, %v8385_v31  ;;  %v6093_v31 = vld [vmem:[%s10547_s5 + $0x3b0] sm:$0xff]  ;;  %v8749_v55 = vpop.f32.mrf.mxu0 }
 0x242   : > { %v7010_v1 = vpop.f32.mrf.mxu1  ;;  %3806 = vmatpush1.msra.mxu1 %v6069_v4  ;;  %3976 = vmatpush1.msra.mxu0 %v6101_v24  ;;  %v6094_v24 = vld [vmem:[%s10547_s5 + $0x3b8] sm:$0xff] }
 0x243   : > { %v8683_v30 = vadd.f32 %v7010_v1, %v1671_v62  ;;  %3807 = vmatprep.subr.mxu1 %v6068_v18  ;;  %3977 = vmatprep.subr.mxu0 %v6100_v20  ;;  %v6063_v62 = vld [vmem:[%s10547_s5 + $0x2c0] sm:$0xff]  ;;  %v6062_v1 = vld [vmem:[%s10547_s5 + $0x2b8] sm:$0xff]  ;;  %v6061_v20 = vld [vmem:[%s10547_s5 + $0x2b0] sm:$0xff] }
 0x244   : > { %v8693_v29 = vpop.f32.mrf.mxu1  ;;  %3808 = vmatpush1.msra.mxu1 %v6067_v32  ;;  %3978 = vmatpush1.msra.mxu0 %v6099_v33  ;;  %v6060_v33 = vld [vmem:[%s10547_s5 + $0x2a8] sm:$0xff] }
 0x245   : > { %3809 = vmatprep.subr.mxu1 %v6066_v48  ;;  %3979 = vmatprep.subr.mxu0 %v6098_v41  ;;  %v1701_v48 = vadd.f32 %v8529_v3, %v8389_v36  ;;  %v6059_v41 = vld [vmem:[%s10547_s5 + $0x2a0] sm:$0xff]  ;;  %v6090_v36 = vld [vmem:[%s10547_s5 + $0x398] sm:$0xff] }
 0x246   : > { %v7013_v53 = vpop.f32.mrf.mxu1  ;;  %3810 = vmatpush1.msra.mxu1 %v6065_v44  ;;  %3980 = vmatpush1.msra.mxu0 %v6097_v6  ;;  %v6058_v6 = vld [vmem:[%s10547_s5 + $0x298] sm:$0xff] }
 0x247   : > { %v8715_v51 = vadd.f32 %v7013_v53, %v1681_v12  ;;  %3811 = vmatprep.subr.mxu1 %v6064_v8  ;;  %3981 = vmatprep.subr.mxu0 %v6096_v46  ;;  %v6092_v12 = vld [vmem:[%s10547_s5 + $0x3a8] sm:$0xff]  ;;  %v6091_v53 = vld [vmem:[%s10547_s5 + $0x3a0] sm:$0xff]  ;;  %v6057_v8 = vld [vmem:[%s10547_s5 + $0x290] sm:$0xff] }
 0x248   : > { %v8725_v56 = vpop.f32.mrf.mxu1  ;;  %3812 = vmatpush1.msra.mxu1 %v6063_v62  ;;  %3982 = vmatpush1.msra.mxu0 %v6095_v40  ;;  %v6089_v46 = vld [vmem:[%s10547_s5 + $0x390] sm:$0xff]  ;;  %v8781_v62 = vpop.f32.mrf.mxu0 }
 0x249   : > { %3813 = vmatprep.subr.mxu1 %v6062_v1  ;;  %3983 = vmatprep.subr.mxu0 %v6094_v24  ;;  %v6055_v1 = vld [vmem:[%s10547_s5 + $0x280] sm:$0xff]  ;;  %v6054_v24 = vld [vmem:[%s10547_s5 + $0x278] sm:$0xff] }
 0x24a   : > { %v7016_v4 = vpop.f32.mrf.mxu1  ;;  %3814 = vmatpush1.msra.mxu1 %v6061_v20  ;;  %3984 = vmatpush1.msra.mxu0 %v6093_v31  ;;  %v6087_v20 = vld [vmem:[%s10547_s5 + $0x380] sm:$0xff] }
 0x24b   : > { %v8741_v18 = vadd.f32 %v7016_v4, %v1691_v17  ;;  %3815 = vmatprep.subr.mxu1 %v6060_v33  ;;  %3985 = vmatprep.subr.mxu0 %v6092_v12  ;;  %v6056_v17 = vld [vmem:[%s10547_s5 + $0x288] sm:$0xff]  ;;  %v6053_v33 = vld [vmem:[%s10547_s5 + $0x270] sm:$0xff]  ;;  %v6086_v12 = vld [vmem:[%s10547_s5 + $0x378] sm:$0xff] }
 0x24c   : > { %v8751_v32 = vpop.f32.mrf.mxu1  ;;  %3816 = vmatpush1.msra.mxu1 %v6059_v41  ;;  %3986 = vmatpush1.msra.mxu0 %v6091_v53  ;;  %v6088_v4 = vld [vmem:[%s10547_s5 + $0x388] sm:$0xff]  ;;  %v6085_v53 = vld [vmem:[%s10547_s5 + $0x370] sm:$0xff] }
 0x24d   : > { %3817 = vmatprep.subr.mxu1 %v6058_v6  ;;  %3987 = vmatprep.subr.mxu0 %v6090_v36  ;;  %v6052_v41 = vld [vmem:[%s10547_s5 + $0x268] sm:$0xff]  ;;  %v8818_v6 = vpop.f32.mrf.mxu0 }
 0x24e   : > { %v7019_v44 = vpop.f32.mrf.mxu1  ;;  %3818 = vmatpush1.msra.mxu1 %v6057_v8  ;;  %3988 = vmatpush1.msra.mxu0 %v6089_v46  ;;  %v6050_v8 = vld [vmem:[%s10547_s5 + $0x258] sm:$0xff]  ;;  %v6083_v46 = vld [vmem:[%s10547_s5 + $0x360] sm:$0xff] }
 0x24f   : > { %v8773_v3 = vadd.f32 %v7019_v44, %v1701_v48  ;;  %3819 = vmatprep.subr.mxu1 %v6056_v17  ;;  %3989 = vmatprep.subr.mxu0 %v6088_v4  ;;  %v6051_v44 = vld [vmem:[%s10547_s5 + $0x260] sm:$0xff]  ;;  %v6082_v4 = vld [vmem:[%s10547_s5 + $0x358] sm:$0xff] }
 0x250   : > { %v8783_v40 = vpop.f32.mrf.mxu1  ;;  %3820 = vmatpush1.msra.mxu1 %v6055_v1  ;;  %3990 = vmatpush1.msra.mxu0 %v6087_v20  ;;  %v6049_v1 = vld [vmem:[%s10547_s5 + $0x250] sm:$0xff] }
 0x251   : > { %3821 = vmatprep.subr.mxu1 %v6054_v24  ;;  %3991 = vmatprep.subr.mxu0 %v6086_v12  ;;  %v6048_v24 = vld [vmem:[%s10547_s5 + $0x248] sm:$0xff] }
 0x252   : > { %v7022_v31 = vpop.f32.mrf.mxu1  ;;  %3822 = vmatpush1.msra.mxu1 %v6053_v33  ;;  %3992 = vmatpush1.msra.mxu0 %v6085_v53  ;;  %v6047_v33 = vld [vmem:[%s10547_s5 + $0x240] sm:$0xff]  ;;  %v6080_v12 = vld [vmem:[%s10547_s5 + $0x348] sm:$0xff] }
 0x253   : > { %v8807_v48 = vadd.f32 %v7022_v31, %v8568_v49  ;;  %v6084_v49 = vld [vmem:[%s10547_s5 + $0x368] sm:$0xff]  ;;  %3823 = vmatprep.subr.mxu1 %v6052_v41  ;;  %v6081_v31 = vld [vmem:[%s10547_s5 + $0x350] sm:$0xff]  ;;  %v8852_v41 = vpop.f32.mrf.mxu0 }
 0x254   : > { %v8820_v36 = vpop.f32.mrf.mxu1  ;;  %3993 = vmatprep.subr.mxu0 %v6084_v49  ;;  %3824 = vmatpush1.msra.mxu1 %v6051_v44  ;;  %10567 = vst [vmem:[#allocation17_spill] sm:$0xff] %v8852_v41  ;;  %v6079_v44 = vld [vmem:[%s10547_s5 + $0x340] sm:$0xff] }
 0x255   : > { %3994 = vmatpush1.msra.mxu0 %v6083_v46  ;;  %3825 = vmatprep.subr.mxu1 %v6050_v8  ;;  %v6045_v8 = vld [vmem:[%s10547_s5 + $0x230] sm:$0xff]  ;;  %v6078_v46 = vld [vmem:[%s10547_s5 + $0x338] sm:$0xff] }
 0x256   : > { %v7025_v17 = vpop.f32.mrf.mxu1  ;;  %3995 = vmatprep.subr.mxu0 %v6082_v4  ;;  %3826 = vmatpush1.msra.mxu1 %v6049_v1  ;;  %v6077_v4 = vld [vmem:[%s10547_s5 + $0x330] sm:$0xff] }
 0x257   : > { %v8841_v20 = vadd.f32 %v7025_v17, %v8599_v58  ;;  %3996 = vmatpush1.msra.mxu0 %v6081_v31  ;;  %v6046_v58 = vld [vmem:[%s10547_s5 + $0x238] sm:$0xff]  ;;  %3827 = vmatprep.subr.mxu1 %v6048_v24  ;;  %v6044_v17 = vld [vmem:[%s10547_s5 + $0x228] sm:$0xff]  ;;  %v6043_v24 = vld [vmem:[%s10547_s5 + $0x220] sm:$0xff] }
 0x258   : > { %v8854_v53 = vpop.f32.mrf.mxu1  ;;  %3997 = vmatprep.subr.mxu0 %v6080_v12  ;;  %3828 = vmatpush1.msra.mxu1 %v6047_v33  ;;  %v6076_v31 = vld [vmem:[%s10547_s5 + $0x328] sm:$0xff]  ;;  %v8883_v33 = vpop.f32.mrf.mxu0 }
 0x259   : > { %10566 = vst [vmem:[#allocation16_spill] sm:$0xff] %v8841_v20  ;;  %10568 = vst [vmem:[#allocation18_spill] sm:$0xff] %v8854_v53  ;;  %3998 = vmatpush1.msra.mxu0 %v6079_v44  ;;  %3829 = vmatprep.subr.mxu1 %v6046_v58  ;;  %v6075_v58 = vld [vmem:[%s10547_s5 + $0x320] sm:$0xff] }
 0x25a   : > { %v7028_v49 = vpop.f32.mrf.mxu1  ;;  %3999 = vmatprep.subr.mxu0 %v6078_v46  ;;  %10570 = vst [vmem:[#allocation20_spill] sm:$0xff] %v8883_v33  ;;  %3830 = vmatpush1.msra.mxu1 %v6045_v8  ;;  %v6074_v8 = vld [vmem:[%s10547_s5 + $0x318] sm:$0xff]  ;;  %v6040_v46 = vld [vmem:[%s10547_s5 + $0x208] sm:$0xff] }
 0x25b   : > { %v8872_v1 = vadd.f32 %v7028_v49, %v8630_v26  ;;  %4000 = vmatpush1.msra.mxu0 %v6077_v4  ;;  %v6042_v26 = vld [vmem:[%s10547_s5 + $0x218] sm:$0xff]  ;;  %3831 = vmatprep.subr.mxu1 %v6044_v17  ;;  %v6041_v49 = vld [vmem:[%s10547_s5 + $0x210] sm:$0xff] }
 0x25c   : > { %v8885_v12 = vpop.f32.mrf.mxu1  ;;  %4001 = vmatprep.subr.mxu0 %v6076_v31  ;;  %3832 = vmatpush1.msra.mxu1 %v6043_v24  ;;  %v6073_v17 = vld [vmem:[%s10547_s5 + $0x310] sm:$0xff]  ;;  %v6039_v24 = vld [vmem:[%s10547_s5 + $0x200] sm:$0xff]  ;;  %v6072_v31 = vld [vmem:[%s10547_s5 + $0x308] sm:$0xff] }
 0x25d   : > { %10569 = vst [vmem:[#allocation19_spill] sm:$0xff] %v8872_v1  ;;  %10571 = vst [vmem:[#allocation21_spill] sm:$0xff] %v8885_v12  ;;  %4002 = vmatpush1.msra.mxu0 %v6075_v58  ;;  %3833 = vmatprep.subr.mxu1 %v6042_v26  ;;  %v8914_v58 = vpop.f32.mrf.mxu0  ;;  %v6134_v26 = vld [vmem:[%s10547_s5 + $0x4f8] sm:$0xff] }
 0x25e   : > { %v7031_v44 = vpop.f32.mrf.mxu1  ;;  %4003 = vmatprep.subr.mxu0 %v6074_v8  ;;  %10573 = vst [vmem:[#allocation23_spill] sm:$0xff] %v8914_v58  ;;  %3834 = vmatpush1.msra.mxu1 %v6041_v49  ;;  %v6166_v8 = vld [vmem:[%s10547_s5 + $0x5f8] sm:$0xff] }
 0x25f   : > { %v8903_v4 = vadd.f32 %v7031_v44, %v8661_v47  ;;  %4004 = vmatpush1.msra.mxu0 %v6073_v17  ;;  %v6071_v47 = vld [vmem:[%s10547_s5 + $0x300] sm:$0xff]  ;;  %3835 = vmatprep.subr.mxu1 %v6040_v46  ;;  %v8927_v49 = vpop.f32.mrf.mxu0 }
 0x260   : > { %v8916_v2 = vpop.f32.mrf.mxu1  ;;  %4005 = vmatprep.subr.mxu0 %v6072_v31  ;;  %3836 = vmatpush1.msra.mxu1 %v6039_v24  ;;  %10575 = vst [vmem:[#allocation25_spill] sm:$0xff] %v8927_v49 }
 0x261   : > { %10572 = vst [vmem:[#allocation22_spill] sm:$0xff] %v8903_v4  ;;  %10574 = vst [vmem:[#allocation24_spill] sm:$0xff] %v8916_v2  ;;  %4006 = vmatpush1.msra.mxu0 %v6071_v47  ;;  %4145 = vmatprep.subr.mxu1 %v6134_v26  ;;  %v8929_v57 = vpop.f32.mrf.mxu0 }
 0x262   : > { %v7050_v44 = vpop.f32.mrf.mxu1  ;;  %4315 = vmatprep.subr.mxu0 %v6166_v8  ;;  %10576 = vst [vmem:[#allocation26_spill] sm:$0xff] %v8929_v57 }
 0x263   : > { %v8931_v4 = vpop.f32.mrf.mxu0 }
 0x264   : > { %v2117_v17 = vpop.f32.mrf.mxu1  ;;  %10577 = vst [vmem:[#allocation27_spill] sm:$0xff] %v8931_v4 }
 0x265   : > { %v8933_v24 = vpop.f32.mrf.mxu0 }
 0x266   : > { %v7053_v25 = vpop.f32.mrf.mxu1  ;;  %10578 = vst [vmem:[#allocation28_spill] sm:$0xff] %v8933_v24 }
 0x267   : > { %v8939_v26 = vpop.f32.mrf.mxu0 }
 0x268   : > { %v2127_v23 = vpop.f32.mrf.mxu1  ;;  %10579 = vst [vmem:[#allocation29_spill] sm:$0xff] %v8939_v26 }
 0x269   : > { %v8945_v49 = vpop.f32.mrf.mxu0 }
 0x26a   : > { %v7056_v63 = vpop.f32.mrf.mxu1  ;;  %10582 = vst [vmem:[#allocation32_spill] sm:$0xff] %v8945_v49 }
 0x26b   : > { %v8951_v4 = vpop.f32.mrf.mxu0 }
 0x26c   : > { %v2137_v46 = vpop.f32.mrf.mxu1  ;;  %10585 = vst [vmem:[#allocation35_spill] sm:$0xff] %v8951_v4 }
 0x26d   : > { %v8957_v12 = vpop.f32.mrf.mxu0 }
 0x26e   : > { %v7059_v31 = vpop.f32.mrf.mxu1  ;;  %10588 = vst [vmem:[#allocation38_spill] sm:$0xff] %v8957_v12 }
 0x26f   : > { %v8961_v27 = vpop.f32.mrf.mxu0 }
 0x270   : > { %v8935_v47 = vpop.f32.mrf.mxu1  ;;  %10590 = vst [vmem:[#allocation40_spill] sm:$0xff] %v8961_v27  ;;  %v1666_v27 = vadd.f32 %v8453_v43, %v8373_v5  ;;  %v2199_v5 = vadd.f32 %v7053_v25, %v8715_v51 }
 0x271   : > { %v7250_v49 = vpop.f32.mrf.mxu0 }
 0x272   : > { %v8937_v2 = vpop.f32.mrf.mxu1  ;;  %v1962_v54 = vadd.f32 %v8693_v29, %v1666_v27  ;;  %v1686_v27 = vadd.f32 %v8515_v61, %v8387_v35  ;;  %v1696_v35 = vadd.f32 %v8545_v28, %v8391_v7  ;;  %v1706_v7 = vadd.f32 %v8576_v42, %v8395_v39 }
 0x273   : > { %v8963_v20 = vpop.f32.mrf.mxu0 }
 0x274   : > { %v8941_v8 = vpop.f32.mrf.mxu1 }
 0x275   : > { %10580 = vst [vmem:[#allocation30_spill] sm:$0xff] %v8941_v8  ;;  %v2197_v8 = vadd.f32 %v7050_v44, %v8683_v30 }
 0x276   : > { %v8943_v37 = vpop.f32.mrf.mxu1 }
 0x277   : > { %10581 = vst [vmem:[#allocation31_spill] sm:$0xff] %v8943_v37  ;;  %v2431_v43 = vadd.f32 %v8399_v9, %v2197_v8  ;;  %v2433_v9 = vadd.f32 %v8407_v13, %v2199_v5 }
 0x278   : > { %v8947_v57 = vpop.f32.mrf.mxu1 }
 0x279   : > { %10583 = vst [vmem:[#allocation33_spill] sm:$0xff] %v8947_v57 }
 0x27a   : > { %v8949_v34 = vpop.f32.mrf.mxu1 }
 0x27b   : > { %10584 = vst [vmem:[#allocation34_spill] sm:$0xff] %v8949_v34 }
 0x27c   : > { %v8953_v1 = vpop.f32.mrf.mxu1 }
 0x27d   : > { %10586 = vst [vmem:[#allocation36_spill] sm:$0xff] %v8953_v1  ;;  %v8967_v1 = vpop.f32.mrf.mxu0 }
 0x27e   : > { %v8955_v24 = vpop.f32.mrf.mxu1  ;;  %10592 = vst [vmem:[#allocation42_spill] sm:$0xff] %v8967_v1 }
 0x27f   : > { %10587 = vst [vmem:[#allocation37_spill] sm:$0xff] %v8955_v24 }
 0x280   : > { %v8959_v58 = vpop.f32.mrf.mxu1 }
 0x281   : > { %10589 = vst [vmem:[#allocation39_spill] sm:$0xff] %v8959_v58  ;;  %v8973_v58 = vpop.f32.mrf.mxu0 }
 0x282   : > { %v7130_v26 = vpop.f32.mrf.mxu1  ;;  %10595 = vst [vmem:[#allocation45_spill] sm:$0xff] %v8973_v58 }
 0x284   : > { %v2585_v33 = vpop.f32.mrf.mxu1 }
 0x286   : > { %v7133_v60 = vpop.f32.mrf.mxu1 }
 0x288   : > { %v2595_v37 = vpop.f32.mrf.mxu1 }
 0x28a   : > { %v7136_v57 = vpop.f32.mrf.mxu1 }
 0x28c   : > { %v2605_v34 = vpop.f32.mrf.mxu1 }
 0x28e   : > { %v8965_v4 = vpop.f32.mrf.mxu1 }
 0x28f   : > { %10591 = vst [vmem:[#allocation41_spill] sm:$0xff] %v8965_v4  ;;  %v8983_v4 = vpop.f32.mrf.mxu0 }
 0x290   : > { %v8969_v24 = vpop.f32.mrf.mxu1 }
 0x291   : > { %10593 = vst [vmem:[#allocation43_spill] sm:$0xff] %v8969_v24  ;;  %v2196_v24 = vadd.f32 %v2117_v17, %v1962_v54  ;;  %v8996_v30 = vpop.f32.mrf.mxu0  ;;  %v2201_v54 = vadd.f32 %v7056_v63, %v8741_v18  ;;  %v1968_v63 = vadd.f32 %v8783_v40, %v1696_v35  ;;  %v2203_v18 = vadd.f32 %v7059_v31, %v8773_v3  ;;  %v10600_v31 = vld [vmem:[#allocation7_spill] sm:$0xff]  ;;  %v10607_v35 = vld [vmem:[#allocation20_spill] sm:$0xff] }
 0x292   : > { %v8971_v12 = vpop.f32.mrf.mxu1 }
 0x293   : > { %10594 = vst [vmem:[#allocation44_spill] sm:$0xff] %v8971_v12  ;;  %v1676_v12 = vadd.f32 %v8483_v45, %v8381_v19  ;;  %v2430_v19 = vadd.f32 %v8403_v11, %v2196_v24  ;;  %v1966_v45 = vadd.f32 %v8751_v32, %v1686_v27  ;;  %v9008_v61 = vpop.f32.mrf.mxu0  ;;  %v10603_v27 = vld [vmem:[#allocation18_spill] sm:$0xff] }
 0x294   : > { %v8975_v53 = vpop.f32.mrf.mxu1 }
 0x295   : > { %10596 = vst [vmem:[#allocation46_spill] sm:$0xff] %v8975_v53  ;;  %v1964_v53 = vadd.f32 %v8725_v56, %v1676_v12  ;;  %v2664_v25 = vadd.f32 %v2585_v33, %v2430_v19  ;;  %v2200_v51 = vadd.f32 %v2137_v46, %v1966_v45  ;;  %v10605_v19 = vld [vmem:[#allocation31_spill] sm:$0xff] }
 0x296   : > { %v8979_v41 = vpop.f32.mrf.mxu1 }
 0x297   : > { %v2198_v44 = vadd.f32 %v2127_v23, %v1964_v53  ;;  %v2667_v23 = vadd.f32 %v7133_v60, %v2433_v9  ;;  %v2435_v53 = vadd.f32 %v8421_v21, %v2201_v54  ;;  %v2899_v17 = vadd.f32 %v8749_v55, %v2664_v25  ;;  %v10606_v54 = vld [vmem:[#allocation8_spill] sm:$0xff] }
 0x298   : > { %v8985_v1 = vpop.f32.mrf.mxu1  ;;  %v1716_v60 = vadd.f32 %v8609_v0, %v8401_v10  ;;  %v2434_v3 = vadd.f32 %v8451_v38, %v2200_v51  ;;  %v1726_v21 = vadd.f32 %v8640_v15, %v8409_v14  ;;  %v2205_v10 = vadd.f32 %v8937_v2, %v8807_v48  ;;  %v9036_v38 = vld [vmem:[%s10546_s4] ss:$0 sm:$0xff]  ;;  %v10598_v2 = vld [vmem:[#allocation30_spill] sm:$0xff]  ;;  %v10599_v48 = vld [vmem:[#allocation41_spill] sm:$0xff] }
 0x299   : > { %10597 = vst [vmem:[#allocation47_spill] sm:$0xff] %v8985_v1  ;;  %v2665_v1 = vadd.f32 %v7130_v26, %v2431_v43  ;;  %v2432_v11 = vadd.f32 %v8411_v16, %v2198_v44  ;;  %v9022_v16 = vpop.f32.mrf.mxu0  ;;  %v2669_v40 = vadd.f32 %v7136_v57, %v2435_v53  ;;  %v2902_v42 = vadd.f32 %v8781_v62, %v2667_v23  ;;  %v10601_v26 = vld [vmem:[#allocation17_spill] sm:$0xff]  ;;  %v10604_v44 = vld [vmem:[#allocation16_spill] sm:$0xff]  ;;  %v10608_v23 = vld [vmem:[#allocation43_spill] sm:$0xff] }
 0x29a   : > { %v8989_v58 = vpop.f32.mrf.mxu1  ;;  %v2668_v0 = vadd.f32 %v2605_v34, %v2434_v3  ;;  %v2437_v55 = vadd.f32 %v8467_v50, %v2203_v18  ;;  %v1736_v14 = vadd.f32 %v8665_v59, %v8423_v22  ;;  %v10602_v59 = vld [vmem:[#allocation42_spill] sm:$0xff]  ;;  %v2207_v45 = vadd.f32 %v10605_v19, %v10604_v44  ;;  %v10613_v3 = vld [vmem:[#allocation23_spill] sm:$0xff] }
 0x29b   : > { %v2900_v32 = vadd.f32 %v8723_v52, %v2665_v1  ;;  %v2666_v28 = vadd.f32 %v2595_v37, %v2432_v11  ;;  %v2202_v52 = vadd.f32 %v8935_v47, %v1968_v63  ;;  %v1970_v37 = vadd.f32 %v8820_v36, %v1706_v7  ;;  %v10609_v63 = vld [vmem:[#allocation45_spill] sm:$0xff] }
 0x29c   : > { %v8998_v29 = vpop.f32.mrf.mxu1  ;;  %v2671_v50 = vadd.f32 %v10599_v48, %v2437_v55  ;;  %v2904_v8 = vadd.f32 %v10601_v26, %v2669_v40  ;;  %v2439_v25 = vadd.f32 %v10606_v54, %v2205_v10  ;;  %v2903_v51 = vadd.f32 %v10607_v35, %v2668_v0  ;;  %v10610_v7 = vld [vmem:[#allocation33_spill] sm:$0xff]  ;;  %v10615_v55 = vld [vmem:[#allocation19_spill] sm:$0xff] }
 0x29d   : > { %v2901_v36 = vadd.f32 %v8818_v6, %v2666_v28  ;;  %v2204_v34 = vadd.f32 %v10598_v2, %v1970_v37  ;;  %v2436_v24 = vadd.f32 %v10600_v31, %v2202_v52  ;;  %v1972_v6 = vadd.f32 %v10603_v27, %v1716_v60  ;;  %v10612_v60 = vld [vmem:[#allocation9_spill] sm:$0xff]  ;;  %v10618_v2 = vld [vmem:[#allocation10_spill] sm:$0xff] }
 0x29e   : > { %v9003_v56 = vpop.f32.mrf.mxu1  ;;  %v10614_v10 = vld [vmem:[#allocation21_spill] sm:$0xff] }
 0x29f   : > { %v2670_v11 = vadd.f32 %v10608_v23, %v2436_v24  ;;  %v2206_v28 = vadd.f32 %v10610_v7, %v1972_v6  ;;  %v2438_v52 = vadd.f32 %v10612_v60, %v2204_v34  ;;  %v1974_v0 = vadd.f32 %v10614_v10, %v1726_v21  ;;  %v10621_v21 = vld [vmem:[#allocation11_spill] sm:$0xff]  ;;  %v10632_v10 = vld [vmem:[#allocation14_spill] sm:$0xff] }
 0x2a0   : > { %v9010_v12 = vpop.f32.mrf.mxu1  ;;  %v2441_v34 = vadd.f32 %v10618_v2, %v2207_v45  ;;  %v10623_v45 = vld [vmem:[#allocation24_spill] sm:$0xff] }
 0x2a1   : > { %v1976_v54 = vadd.f32 %v10623_v45, %v1736_v14  ;;  %v10630_v14 = vld [vmem:[#allocation13_spill] sm:$0xff] }
 0x2a2   : > { %v7210_v13 = vpop.f32.mrf.mxu1 }
 0x2a3   : > { %v3134_v33 = vadd.f32 %v7210_v13, %v2900_v32 }
 0x2a4   : > { %v3054_v1 = vpop.f32.mrf.mxu1 }
 0x2a5   : > { %v3368_v46 = vadd.f32 %v7250_v49, %v3134_v33  ;;  %v3133_v39 = vadd.f32 %v3054_v1, %v2899_v17  ;;  %v9042_v49 = vpop.f32.mrf.mxu0  ;;  %v10611_v33 = vld [vmem:[#allocation44_spill] sm:$0xff]  ;;  %v2906_v1 = vadd.f32 %v10613_v3, %v2671_v50 }
 0x2a6   : > { %v7213_v57 = vpop.f32.mrf.mxu1  ;;  %v2673_v17 = vadd.f32 %v10611_v33, %v2439_v25  ;;  %v10624_v25 = vld [vmem:[#allocation22_spill] sm:$0xff]  ;;  %v10631_v3 = vld [vmem:[#allocation28_spill] sm:$0xff] }
 0x2a7   : > { %v3367_v15 = vadd.f32 %v8963_v20, %v3133_v39  ;;  %v3136_v62 = vadd.f32 %v7213_v57, %v2902_v42  ;;  %v3391_v5 = vadd.f32 %v9036_v38, %v3368_v46  ;;  %v3328_v13 = vpop.f32.mrf.mxu0  ;;  %v10616_v57 = vld [vmem:[#allocation34_spill] sm:$0xff] }
 0x2a8   : > { %v3064_v47 = vpop.f32.mrf.mxu1 }
 0x2a9   : > { %v3390_v22 = vadd.f32 %v9036_v38, %v3367_v15  ;;  %v3370_v20 = vadd.f32 %v10602_v59, %v3136_v62  ;;  %v3135_v43 = vadd.f32 %v3064_v47, %v2901_v36  ;;  %v2209_v15 = vadd.f32 %v10616_v57, %v10615_v55  ;;  %v10617_v62 = vld [vmem:[#allocation46_spill] sm:$0xff]  ;;  %v10619_v47 = vld [vmem:[#allocation25_spill] sm:$0xff] }
 0x2aa   : > { %v7216_v9 = vpop.f32.mrf.mxu1  ;;  %v2672_v36 = vadd.f32 %v10617_v62, %v2438_v52  ;;  %v2905_v26 = vadd.f32 %v10619_v47, %v2670_v11  ;;  %v2440_v59 = vadd.f32 %v10621_v21, %v2206_v28  ;;  %v10627_v11 = vld [vmem:[#allocation27_spill] sm:$0xff]  ;;  %v10633_v62 = vld [vmem:[#allocation29_spill] sm:$0xff] }
 0x2ab   : > { %v3406_v32 = vmax.f32 %v3390_v22, %v3391_v5  ;;  %v3369_v18 = vadd.f32 %v10609_v63, %v3135_v43  ;;  %v3138_v53 = vadd.f32 %v7216_v9, %v2904_v8  ;;  %v3393_v46 = vadd.f32 %v9036_v38, %v3370_v20  ;;  %v7265_v8 = vpop.f32.mrf.mxu0  ;;  %v10620_v5 = vld [vmem:[#allocation36_spill] sm:$0xff]  ;;  %v10622_v43 = vld [vmem:[#allocation26_spill] sm:$0xff]  ;;  %v10625_v9 = vld [vmem:[#allocation37_spill] sm:$0xff] }
 0x2ac   : > { %v3074_v40 = vpop.f32.mrf.mxu1  ;;  %v2675_v22 = vadd.f32 %v8979_v41, %v2441_v34  ;;  %v2908_v27 = vadd.f32 %v10622_v43, %v2673_v17  ;;  %v2211_v35 = vadd.f32 %v10625_v9, %v10624_v25  ;;  %v10628_v63 = vld [vmem:[#allocation47_spill] sm:$0xff] }
 0x2ad   : > { %3414 = vst [vmem:[#allocation5] sm:$0xff] %v3406_v32  ;;  %v3392_v39 = vadd.f32 %v9036_v38, %v3369_v18  ;;  %v3372_v42 = vadd.f32 %v8983_v4, %v3138_v53  ;;  %v3137_v37 = vadd.f32 %v3074_v40, %v2903_v51  ;;  %v2208_v4 = vadd.f32 %v10620_v5, %v1974_v0  ;;  %v10626_v51 = vld [vmem:[#allocation12_spill] sm:$0xff]  ;;  %v3338_v33 = vpop.f32.mrf.mxu0  ;;  %v10629_v17 = vld [vmem:[#allocation39_spill] sm:$0xff] }
 0x2ae   : > { %v7219_v48 = vpop.f32.mrf.mxu1  ;;  %v2443_v41 = vadd.f32 %v10626_v51, %v2209_v15  ;;  %v2907_v32 = vadd.f32 %v10627_v11, %v2672_v36  ;;  %v2674_v18 = vadd.f32 %v10628_v63, %v2440_v59  ;;  %v2445_v0 = vadd.f32 %v10632_v10, %v2211_v35  ;;  %v10636_v59 = vld [vmem:[#allocation35_spill] sm:$0xff] }
 0x2af   : > { %v3407_v31 = vmax.f32 %v3392_v39, %v3393_v46  ;;  %v3371_v50 = vadd.f32 %v8996_v30, %v3137_v37  ;;  %v3140_v24 = vadd.f32 %v7219_v48, %v2906_v1  ;;  %v3395_v6 = vadd.f32 %v9036_v38, %v3372_v42  ;;  %v7268_v2 = vpop.f32.mrf.mxu0  ;;  %v10634_v48 = vld [vmem:[#allocation15_spill] sm:$0xff] }
 0x2b0   : > { %v3084_v20 = vpop.f32.mrf.mxu1  ;;  %v2677_v60 = vadd.f32 %v8989_v58, %v2443_v41  ;;  %v2442_v52 = vadd.f32 %v10630_v14, %v2208_v4  ;;  %v2910_v1 = vadd.f32 %v10631_v3, %v2675_v22  ;;  %v2909_v36 = vadd.f32 %v10633_v62, %v2674_v18 }
 0x2b1   : > { %3415 = vst [vmem:[#allocation5 + $0x8] sm:$0xff] %v3407_v31  ;;  %v3394_v44 = vadd.f32 %v9036_v38, %v3371_v50  ;;  %v3374_v30 = vadd.f32 %v9008_v61, %v3140_v24  ;;  %v3139_v19 = vadd.f32 %v3084_v20, %v2905_v26  ;;  %v2210_v61 = vadd.f32 %v10629_v17, %v1976_v54 }
 0x2b2   : > { %v7222_v23 = vpop.f32.mrf.mxu1  ;;  %v2679_v34 = vadd.f32 %v9003_v56, %v2445_v0 }
 0x2b3   : > { %v3408_v53 = vmax.f32 %v3394_v44, %v3395_v6  ;;  %v3373_v7 = vadd.f32 %v9022_v16, %v3139_v19  ;;  %v3142_v28 = vadd.f32 %v7222_v23, %v2908_v27  ;;  %v3397_v46 = vadd.f32 %v9036_v38, %v3374_v30  ;;  %v3348_v44 = vpop.f32.mrf.mxu0  ;;  %v10637_v19 = vld [vmem:[#allocation38_spill] sm:$0xff] }
 0x2b4   : > { %v3094_v40 = vpop.f32.mrf.mxu1  ;;  %v2676_v16 = vadd.f32 %v8998_v29, %v2442_v52  ;;  %v2444_v31 = vadd.f32 %v10634_v48, %v2210_v61  ;;  %v2914_v45 = vadd.f32 %v10637_v19, %v2679_v34  ;;  %v6161_v19 = vld [vmem:[%s10547_s5 + $0x5d0] sm:$0xff] }
 0x2b5   : > { %3416 = vst [vmem:[#allocation5 + $0x10] sm:$0xff] %v3408_v53  ;;  %v3396_v39 = vadd.f32 %v9036_v38, %v3373_v7  ;;  %v3376_v42 = vadd.f32 %v9042_v49, %v3142_v28  ;;  %v3141_v37 = vadd.f32 %v3094_v40, %v2907_v32  ;;  %v10635_v49 = vld [vmem:[#allocation32_spill] sm:$0xff]  ;;  %v7271_v41 = vpop.f32.mrf.mxu0 }
 0x2b6   : > { %v7225_v55 = vpop.f32.mrf.mxu1  ;;  %v2912_v47 = vadd.f32 %v10635_v49, %v2677_v60  ;;  %v2911_v20 = vadd.f32 %v10636_v59, %v2676_v16  ;;  %v2678_v56 = vadd.f32 %v9010_v12, %v2444_v31  ;;  %v10638_v32 = vld [vmem:[#allocation40_spill] sm:$0xff]  ;;  %v10639_v16 = vmov 0.0  }
 0x2b7   : > { %v3409_v57 = vmax.f32 %v3396_v39, %v3397_v46  ;;  %v3375_v58 = vadd.f32 %v3328_v13, %v3141_v37  ;;  %v3144_v15 = vadd.f32 %v7225_v55, %v2910_v1  ;;  %v3399_v50 = vadd.f32 %v9036_v38, %v3376_v42  ;;  %v3358_v14 = vpop.f32.mrf.mxu0  ;;  %v6164_v59 = vld [vmem:[%s10547_s5 + $0x5e8] sm:$0xff] }
 0x2b8   : > { %v3104_v24 = vpop.f32.mrf.mxu1  ;;  %v3422_v26 = vld [vmem:[#allocation5] ss:$2 sm:$0xff]  ;;  %v3430_v29 = vld [vmem:[#allocation5 + $0x1] ss:$2 sm:$0xff]  ;;  %v2913_v63 = vadd.f32 %v10638_v32, %v2678_v56  ;;  %v6130_v56 = vld [vmem:[%s10547_s5 + $0x4d8] sm:$0xff] }
 0x2b9   : > { %3417 = vst [vmem:[#allocation5 + $0x18] sm:$0xff] %v3409_v57  ;;  %v3398_v5 = vadd.f32 %v9036_v38, %v3375_v58  ;;  %v3378_v4 = vadd.f32 %v7265_v8, %v3144_v15  ;;  %v3143_v13 = vadd.f32 %v3104_v24, %v2909_v36  ;;  %v3437_v22 = vmax.f32 %v3422_v26, %v3430_v29  ;;  %v3501_v36 = vld [vmem:[#allocation3 + $0x61] sm:$0xff]  ;;  %v6122_v32 = vld [vmem:[%s10547_s5 + $0x498] sm:$0xff] }
 0x2ba   : > { %v7228_v21 = vpop.f32.mrf.mxu1 }
 0x2bb   : > { %v3410_v43 = vmax.f32 %v3398_v5, %v3399_v50  ;;  %v3377_v27 = vadd.f32 %v3338_v33, %v3143_v13  ;;  %v3146_v6 = vadd.f32 %v7228_v21, %v2912_v47  ;;  %v3441_v54 = vmax.f32 %v3437_v22, 0.0  ;;  %v6133_v13 = vld [vmem:[%s10547_s5 + $0x4f0] sm:$0xff]  ;;  %v6132_v21 = vld [vmem:[%s10547_s5 + $0x4e8] sm:$0xff] }
 0x2bc   : > { %v3114_v30 = vpop.f32.mrf.mxu1  ;;  %v3401_v25 = vadd.f32 %v9036_v38, %v3378_v4  ;;  %v3764_v4 = vld [vmem:[#allocation3 + $0x2] sm:$0xff]  ;;  %v6165_v22 = vld [vmem:[%s10547_s5 + $0x5f0] sm:$0xff] }
 0x2bd   : > { %3418 = vst [vmem:[#allocation5 + $0x20] sm:$0xff] %v3410_v43  ;;  %v3400_v8 = vadd.f32 %v9036_v38, %v3377_v27  ;;  %v3380_v9 = vadd.f32 %v7268_v2, %v3146_v6  ;;  %v3145_v35 = vadd.f32 %v3114_v30, %v2911_v20  ;;  %3446 = vst [vmem:[#allocation3 + $0x11] ss:$16 sps:$4 sm:$0xff] %v3441_v54   ;;  %v3461_v2 = vld [vmem:[#allocation3 + $0x60] sm:$0xff]  ;;  %v6129_v27 = vld [vmem:[%s10547_s5 + $0x4d0] sm:$0xff] }
 0x2be   : > { %v7231_v51 = vpop.f32.mrf.mxu1  ;;  %v6131_v20 = vld [vmem:[%s10547_s5 + $0x4e0] sm:$0xff]  ;;  %v6128_v30 = vld [vmem:[%s10547_s5 + $0x4c8] sm:$0xff] }
 0x2bf   : > { %v3411_v23 = vmax.f32 %v3400_v8, %v3401_v25  ;;  %v3379_v12 = vadd.f32 %v3348_v44, %v3145_v35  ;;  %v3148_v11 = vadd.f32 %v7231_v51, %v2914_v45  ;;  %v3403_v18 = vadd.f32 %v9036_v38, %v3380_v9  ;;  %v6163_v43 = vld [vmem:[%s10547_s5 + $0x5e0] sm:$0xff]  ;;  %v6162_v44 = vld [vmem:[%s10547_s5 + $0x5d8] sm:$0xff]  ;;  %v6160_v54 = vld [vmem:[%s10547_s5 + $0x5c8] sm:$0xff] }
 0x2c0   : > { %v3124_v53 = vpop.f32.mrf.mxu1  ;;  %v3424_v7 = vld [vmem:[#allocation5 + $0x10] ss:$2 sm:$0xff]  ;;  %v3432_v28 = vld [vmem:[#allocation5 + $0x11] ss:$2 sm:$0xff]  ;;  %v6127_v45 = vld [vmem:[%s10547_s5 + $0x4c0] sm:$0xff] }
 0x2c1   : > { %3419 = vst [vmem:[#allocation5 + $0x28] sm:$0xff] %v3411_v23  ;;  %v3402_v33 = vadd.f32 %v9036_v38, %v3379_v12  ;;  %v3382_v17 = vadd.f32 %v7271_v41, %v3148_v11  ;;  %v3147_v61 = vadd.f32 %v3124_v53, %v2913_v63  ;;  %v3438_v60 = vmax.f32 %v3424_v7, %v3432_v28  ;;  %v6126_v25 = vld [vmem:[%s10547_s5 + $0x4b8] sm:$0xff]  ;;  %v6159_v8 = vld [vmem:[%s10547_s5 + $0x5c0] sm:$0xff]  ;;  %v6125_v9 = vld [vmem:[%s10547_s5 + $0x4b0] sm:$0xff] }
 0x2c2   : > { %v6158_v51 = vld [vmem:[%s10547_s5 + $0x5b8] sm:$0xff]  ;;  %v6124_v41 = vld [vmem:[%s10547_s5 + $0x4a8] sm:$0xff]  ;;  %v6157_v23 = vld [vmem:[%s10547_s5 + $0x5b0] sm:$0xff] }
 0x2c3   : > { %v3412_v52 = vmax.f32 %v3402_v33, %v3403_v18  ;;  %v3381_v40 = vadd.f32 %v3358_v14, %v3147_v61  ;;  %v3442_v3 = vmax.f32 %v3438_v60, 0.0  ;;  %v3405_v1 = vadd.f32 %v9036_v38, %v3382_v17  ;;  %v6123_v12 = vld [vmem:[%s10547_s5 + $0x4a0] sm:$0xff]  ;;  %v6156_v11 = vld [vmem:[%s10547_s5 + $0x5a8] sm:$0xff]  ;;  %v6121_v18 = vld [vmem:[%s10547_s5 + $0x490] sm:$0xff] }
 0x2c4   : > { %v9111_v39 = vld [vmem:[#allocation3 + $0x11] sm:$0xff]  ;;  %v9116_v55 = vld [vmem:[#allocation3 + $0x21] sm:$0xff] }
 0x2c5   : > { %3420 = vst [vmem:[#allocation5 + $0x30] sm:$0xff] %v3412_v52  ;;  %v3404_v46 = vadd.f32 %v9036_v38, %v3381_v40  ;;  %v3458_v42 = vld [vmem:[#allocation3 + $0x10] sm:$0xff]  ;;  %3452 = vst [vmem:[#allocation3 + $0x31] ss:$16 sps:$4 sm:$0xff] %v3442_v3   ;;  %3609 = vmatmul.mubr.f32.gmra.mxu1 %v9111_v39  ;;  %v9118_v57 = vld [vmem:[#allocation3 + $0x20] sm:$0xff] }
 0x2c6   : > { %3722 = vmatmul.mubr.f32.gmra.mxu0 %v3458_v42  ;;  %3614 = vmatprep.mubr.f32.mxu1 %v10639_v16  ;;  %v9184_v6 = vld [vmem:[#allocation3 + $0x12] sm:$0xff]  ;;  %v9214_v35 = vld [vmem:[#allocation3 + $0x22] sm:$0xff] }
 0x2c7   : > { %v3413_v37 = vmax.f32 %v3404_v46, %v3405_v1  ;;  %3727 = vmatprep.mubr.f32.mxu0 %v10639_v16  ;;  %v6155_v63 = vld [vmem:[%s10547_s5 + $0x5a0] sm:$0xff]  ;;  %v6154_v7 = vld [vmem:[%s10547_s5 + $0x598] sm:$0xff]  ;;  %v6120_v28 = vld [vmem:[%s10547_s5 + $0x488] sm:$0xff] }
 0x2c8   : > { %v3426_v10 = vld [vmem:[#allocation5 + $0x20] ss:$2 sm:$0xff]  ;;  %v3434_v0 = vld [vmem:[#allocation5 + $0x21] ss:$2 sm:$0xff]  ;;  %v6153_v17 = vld [vmem:[%s10547_s5 + $0x590] sm:$0xff] }
 0x2c9   : > { %3421 = vst [vmem:[#allocation5 + $0x38] sm:$0xff] %v3413_v37  ;;  %v3439_v38 = vmax.f32 %v3426_v10, %v3434_v0  ;;  %3615 = vmatmul.mubr.f32.gmra.mxu1 %v9116_v55  ;;  %v6119_v61 = vld [vmem:[%s10547_s5 + $0x480] sm:$0xff]  ;;  %v6152_v60 = vld [vmem:[%s10547_s5 + $0x588] sm:$0xff]  ;;  %v6118_v14 = vld [vmem:[%s10547_s5 + $0x478] sm:$0xff] }
 0x2ca   : > { %3728 = vmatmul.mubr.f32.gmra.mxu0 %v9118_v57  ;;  %3620 = vmatprep.mubr.f32.mxu1 %v10639_v16  ;;  %v6151_v52 = vld [vmem:[%s10547_s5 + $0x580] sm:$0xff]  ;;  %v6117_v3 = vld [vmem:[%s10547_s5 + $0x470] sm:$0xff]  ;;  %v6150_v1 = vld [vmem:[%s10547_s5 + $0x578] sm:$0xff] }
 0x2cb   : > { %3733 = vmatprep.mubr.f32.mxu0 %v10639_v16  ;;  %v3443_v58 = vmax.f32 %v3439_v38, 0.0  ;;  %v3768_v40 = vld [vmem:[#allocation3 + $0x62] sm:$0xff]  ;;  %v6114_v0 = vld [vmem:[%s10547_s5 + $0x458] sm:$0xff] }
 0x2cc   : > { %v9124_v15 = vld [vmem:[#allocation3 + $0x31] sm:$0xff]  ;;  %v9253_v33 = vld [vmem:[#allocation3 + $0x40] sm:$0xff]  ;;  %v6116_v46 = vld [vmem:[%s10547_s5 + $0x468] sm:$0xff] }
 0x2cd   : > { %v9126_v62 = vld [vmem:[#allocation3 + $0x30] sm:$0xff]  ;;  %3447 = vst [vmem:[#allocation3 + $0x71] ss:$16 sps:$4 sm:$0xff] %v3443_v58   ;;  %3621 = vmatmul.mubr.f32.gmra.mxu1 %v9124_v15  ;;  %v6115_v37 = vld [vmem:[%s10547_s5 + $0x460] sm:$0xff]  ;;  %v6148_v10 = vld [vmem:[%s10547_s5 + $0x568] sm:$0xff] }
 0x2ce   : > { %3734 = vmatmul.mubr.f32.gmra.mxu0 %v9126_v62  ;;  %3626 = vmatprep.mubr.f32.mxu1 %v10639_v16  ;;  %v9244_v53 = vld [vmem:[#allocation3 + $0x32] sm:$0xff]  ;;  %v6147_v38 = vld [vmem:[%s10547_s5 + $0x560] sm:$0xff] }
 0x2cf   : > { %3739 = vmatprep.mubr.f32.mxu0 %v10639_v16  ;;  %v6113_v58 = vld [vmem:[%s10547_s5 + $0x450] sm:$0xff] }
 0x2d0   : > { %v3428_v34 = vld [vmem:[#allocation5 + $0x30] ss:$2 sm:$0xff]  ;;  %v3436_v48 = vld [vmem:[#allocation5 + $0x31] ss:$2 sm:$0xff] }
 0x2d1   : > { %v3440_v31 = vmax.f32 %v3428_v34, %v3436_v48  ;;  %3627 = vmatmul.mubr.f32.gmra.mxu1 %v3501_v36  ;;  %v6112_v34 = vld [vmem:[%s10547_s5 + $0x448] sm:$0xff]  ;;  %v6145_v48 = vld [vmem:[%s10547_s5 + $0x550] sm:$0xff] }
 0x2d2   : > { %3740 = vmatmul.mubr.f32.gmra.mxu0 %v3461_v2  ;;  %3632 = vmatprep.mubr.f32.mxu1 %v10639_v16  ;;  %v6146_v2 = vld [vmem:[%s10547_s5 + $0x558] sm:$0xff] }
 0x2d3   : > { %3745 = vmatprep.mubr.f32.mxu0 %v10639_v16  ;;  %v3444_v50 = vmax.f32 %v3440_v31, 0.0  ;;  %v6111_v31 = vld [vmem:[%s10547_s5 + $0x440] sm:$0xff] }
 0x2d4   : > { %v9134_v24 = vld [vmem:[#allocation3 + $0x71] sm:$0xff]  ;;  %v9142_v47 = vld [vmem:[#allocation3 + $0x81] sm:$0xff] }
 0x2d5   : > { %v9136_v49 = vld [vmem:[#allocation3 + $0x70] sm:$0xff]  ;;  %3453 = vst [vmem:[#allocation3 + $0x91] ss:$16 sps:$4 sm:$0xff] %v3444_v50   ;;  %3633 = vmatmul.mubr.f32.gmra.mxu1 %v9134_v24  ;;  %v9144_v26 = vld [vmem:[#allocation3 + $0x80] sm:$0xff]  ;;  %v6144_v50 = vld [vmem:[%s10547_s5 + $0x548] sm:$0xff] }
 0x2d6   : > { %3746 = vmatmul.mubr.f32.gmra.mxu0 %v9136_v49  ;;  %3638 = vmatprep.mubr.f32.mxu1 %v10639_v16  ;;  %v9303_v36 = vld [vmem:[#allocation3 + $0x72] sm:$0xff] }
 0x2d7   : > { %3751 = vmatprep.mubr.f32.mxu0 %v10639_v16 }
 0x2d9   : > { %3639 = vmatmul.mubr.f32.gmra.mxu1 %v9142_v47 }
 0x2da   : > { %3752 = vmatmul.mubr.f32.gmra.mxu0 %v9144_v26  ;;  %3644 = vmatprep.mubr.f32.mxu1 %v10639_v16 }
 0x2db   : > { %3757 = vmatprep.mubr.f32.mxu0 %v10639_v16 }
 0x2dc   : > { %v9150_v29 = vld [vmem:[#allocation3 + $0x91] sm:$0xff] }
 0x2dd   : > { %v9152_v5 = vld [vmem:[#allocation3 + $0x90] sm:$0xff]  ;;  %3645 = vmatmul.mubr.f32.gmra.mxu1 %v9150_v29 }
 0x2de   : > { %3758 = vmatmul.mubr.f32.gmra.mxu0 %v9152_v5  ;;  %3869 = vmatprep.mubr.f32.mxu1 %v10639_v16 }
 0x2df   : > { %4039 = vmatprep.mubr.f32.mxu0 %v10639_v16 }
 0x2e1   : > { %3870 = vmatmul.mubr.f32.vlgmr.msra.gmra.mxu1 %v3764_v4 }
 0x2e2   : > { %4040 = vmatmul.mubr.f32.vlgmr.msra.gmra.mxu0 %v3458_v42  ;;  %4146 = vmatpush1.msra.mxu1 %v6133_v13  ;;  %v6149_v42 = vld [vmem:[%s10547_s5 + $0x570] sm:$0xff]  ;;  %v6110_v13 = vld [vmem:[%s10547_s5 + $0x438] sm:$0xff] }
 0x2e3   : > { %4316 = vmatpush1.msra.mxu0 %v6165_v22  ;;  %4147 = vmatprep.subr.mxu1 %v6132_v21  ;;  %v6143_v21 = vld [vmem:[%s10547_s5 + $0x540] sm:$0xff] }
 0x2e4   : > { %4317 = vmatprep.subr.mxu0 %v6164_v59  ;;  %4148 = vmatpush1.msra.mxu1 %v6131_v20  ;;  %v6109_v59 = vld [vmem:[%s10547_s5 + $0x430] sm:$0xff]  ;;  %v9335_v20 = vld [vmem:[#allocation3 + $0x82] sm:$0xff] }
 0x2e5   : > { %3875 = vmatprep.mubr.f32.mxu1 %v10639_v16  ;;  %4045 = vmatprep.mubr.f32.mxu0 %v10639_v16 }
 0x2e6   : > { %4149 = vmatprep.subr.mxu1 %v6130_v56  ;;  %4318 = vmatpush1.msra.mxu0 %v6163_v43  ;;  %v6142_v56 = vld [vmem:[%s10547_s5 + $0x538] sm:$0xff]  ;;  %v6108_v43 = vld [vmem:[%s10547_s5 + $0x428] sm:$0xff] }
 0x2e7   : > { %3876 = vmatmul.mubr.f32.gmra.mxu1 %v9184_v6  ;;  %4046 = vmatmul.mubr.f32.gmra.mxu0 %v9118_v57 }
 0x2e8   : > { %4150 = vmatpush1.msra.mxu1 %v6129_v27  ;;  %4319 = vmatprep.subr.mxu0 %v6162_v44  ;;  %v6141_v27 = vld [vmem:[%s10547_s5 + $0x530] sm:$0xff]  ;;  %v6107_v44 = vld [vmem:[%s10547_s5 + $0x420] sm:$0xff] }
 0x2e9   : > { %4151 = vmatprep.subr.mxu1 %v6128_v30  ;;  %4320 = vmatpush1.msra.mxu0 %v6161_v19  ;;  %v6140_v30 = vld [vmem:[%s10547_s5 + $0x528] sm:$0xff]  ;;  %v6106_v19 = vld [vmem:[%s10547_s5 + $0x418] sm:$0xff] }
 0x2ea   : > { %4152 = vmatpush1.msra.mxu1 %v6127_v45  ;;  %4321 = vmatprep.subr.mxu0 %v6160_v54  ;;  %v6139_v45 = vld [vmem:[%s10547_s5 + $0x520] sm:$0xff]  ;;  %v6105_v54 = vld [vmem:[%s10547_s5 + $0x410] sm:$0xff] }
 0x2eb   : > { %3881 = vmatprep.mubr.f32.mxu1 %v10639_v16  ;;  %4051 = vmatprep.mubr.f32.mxu0 %v10639_v16 }
 0x2ec   : > { %4153 = vmatprep.subr.mxu1 %v6126_v25  ;;  %4322 = vmatpush1.msra.mxu0 %v6159_v8  ;;  %v9365_v25 = vld [vmem:[#allocation3 + $0x92] sm:$0xff] }
 0x2ed   : > { %3882 = vmatmul.mubr.f32.gmra.mxu1 %v9214_v35  ;;  %4052 = vmatmul.mubr.f32.gmra.mxu0 %v9126_v62  ;;  %v6138_v8 = vld [vmem:[%s10547_s5 + $0x518] sm:$0xff] }
 0x2ee   : > { %4154 = vmatpush1.msra.mxu1 %v6125_v9  ;;  %4323 = vmatprep.subr.mxu0 %v6158_v51  ;;  %v6104_v9 = vld [vmem:[%s10547_s5 + $0x408] sm:$0xff]  ;;  %v9374_v51 = vld [vmem:[#allocation3 + $0xa0] sm:$0xff] }
 0x2ef   : > { %4155 = vmatprep.subr.mxu1 %v6124_v41  ;;  %4324 = vmatpush1.msra.mxu0 %v6157_v23  ;;  %v6137_v41 = vld [vmem:[%s10547_s5 + $0x510] sm:$0xff]  ;;  %v6103_v23 = vld [vmem:[%s10547_s5 + $0x400] sm:$0xff] }
 0x2f0   : > { %4156 = vmatpush1.msra.mxu1 %v6123_v12  ;;  %4325 = vmatprep.subr.mxu0 %v6156_v11  ;;  %v6136_v12 = vld [vmem:[%s10547_s5 + $0x508] sm:$0xff]  ;;  %v6135_v11 = vld [vmem:[%s10547_s5 + $0x500] sm:$0xff] }
 0x2f1   : > { %3887 = vmatprep.mubr.f32.mxu1 %v10639_v16  ;;  %4057 = vmatprep.mubr.f32.mxu0 %v10639_v16 }
 0x2f2   : > { %4157 = vmatprep.subr.mxu1 %v6122_v32  ;;  %4326 = vmatpush1.msra.mxu0 %v6155_v63  ;;  %v6198_v32 = vld [vmem:[%s10547_s5 + $0x6f8] sm:$0xff]  ;;  %v6197_v63 = vld [vmem:[%s10547_s5 + $0x6f0] sm:$0xff] }
 0x2f3   : > { %3888 = vmatmul.mubr.f32.gmra.mxu1 %v9244_v53  ;;  %4058 = vmatmul.mubr.f32.gmra.mxu0 %v9253_v33 }
 0x2f4   : > { %4158 = vmatpush1.msra.mxu1 %v6121_v18  ;;  %4327 = vmatprep.subr.mxu0 %v6154_v7  ;;  %v6230_v18 = vld [vmem:[%s10547_s5 + $0x7f8] sm:$0xff]  ;;  %v6196_v7 = vld [vmem:[%s10547_s5 + $0x6e8] sm:$0xff] }
 0x2f5   : > { %4159 = vmatprep.subr.mxu1 %v6120_v28  ;;  %4328 = vmatpush1.msra.mxu0 %v6153_v17  ;;  %v6229_v28 = vld [vmem:[%s10547_s5 + $0x7f0] sm:$0xff]  ;;  %v6195_v17 = vld [vmem:[%s10547_s5 + $0x6e0] sm:$0xff] }
 0x2f6   : > { %4160 = vmatpush1.msra.mxu1 %v6119_v61  ;;  %4329 = vmatprep.subr.mxu0 %v6152_v60  ;;  %v6228_v61 = vld [vmem:[%s10547_s5 + $0x7e8] sm:$0xff]  ;;  %v6227_v60 = vld [vmem:[%s10547_s5 + $0x7e0] sm:$0xff] }
 0x2f7   : > { %3893 = vmatprep.mubr.f32.mxu1 %v10639_v16  ;;  %4063 = vmatprep.mubr.f32.mxu0 %v10639_v16 }
 0x2f8   : > { %4161 = vmatprep.subr.mxu1 %v6118_v14  ;;  %4330 = vmatpush1.msra.mxu0 %v6151_v52  ;;  %v6226_v14 = vld [vmem:[%s10547_s5 + $0x7d8] sm:$0xff]  ;;  %v6192_v52 = vld [vmem:[%s10547_s5 + $0x6c8] sm:$0xff] }
 0x2f9   : > { %3894 = vmatmul.mubr.f32.gmra.mxu1 %v3768_v40  ;;  %4064 = vmatmul.mubr.f32.gmra.mxu0 %v9136_v49  ;;  %v6225_v40 = vld [vmem:[%s10547_s5 + $0x7d0] sm:$0xff] }
 0x2fa   : > { %4162 = vmatpush1.msra.mxu1 %v6117_v3  ;;  %4331 = vmatprep.subr.mxu0 %v6150_v1  ;;  %v6191_v3 = vld [vmem:[%s10547_s5 + $0x6c0] sm:$0xff]  ;;  %v6224_v1 = vld [vmem:[%s10547_s5 + $0x7c8] sm:$0xff] }
 0x2fb   : > { %4163 = vmatprep.subr.mxu1 %v6116_v46  ;;  %4332 = vmatpush1.msra.mxu0 %v6149_v42  ;;  %v6190_v46 = vld [vmem:[%s10547_s5 + $0x6b8] sm:$0xff]  ;;  %v6223_v42 = vld [vmem:[%s10547_s5 + $0x7c0] sm:$0xff] }
 0x2fc   : > { %4164 = vmatpush1.msra.mxu1 %v6115_v37  ;;  %4333 = vmatprep.subr.mxu0 %v6148_v10  ;;  %v6189_v37 = vld [vmem:[%s10547_s5 + $0x6b0] sm:$0xff]  ;;  %v6222_v10 = vld [vmem:[%s10547_s5 + $0x7b8] sm:$0xff] }
 0x2fd   : > { %3899 = vmatprep.mubr.f32.mxu1 %v10639_v16  ;;  %4069 = vmatprep.mubr.f32.mxu0 %v10639_v16 }
 0x2fe   : > { %4165 = vmatprep.subr.mxu1 %v6114_v0  ;;  %4334 = vmatpush1.msra.mxu0 %v6147_v38  ;;  %v6188_v0 = vld [vmem:[%s10547_s5 + $0x6a8] sm:$0xff]  ;;  %v6221_v38 = vld [vmem:[%s10547_s5 + $0x7b0] sm:$0xff] }
 0x2ff   : > { %3900 = vmatmul.mubr.f32.gmra.mxu1 %v9303_v36  ;;  %4070 = vmatmul.mubr.f32.gmra.mxu0 %v9144_v26  ;;  %v3604_v49 = vpop.f32.mrf.mxu1  ;;  %v3717_v4 = vpop.f32.mrf.mxu0 }
 0x300   : > { %4166 = vmatpush1.msra.mxu1 %v6113_v58  ;;  %4335 = vmatprep.subr.mxu0 %v6146_v2  ;;  %v9325_v22 = vadd.f32 %v3717_v4, %v3604_v49  ;;  %v6187_v58 = vld [vmem:[%s10547_s5 + $0x6a0] sm:$0xff]  ;;  %v6220_v2 = vld [vmem:[%s10547_s5 + $0x7a8] sm:$0xff]  ;;  %v6218_v49 = vld [vmem:[%s10547_s5 + $0x798] sm:$0xff] }
 0x301   : > { %4167 = vmatprep.subr.mxu1 %v6112_v34  ;;  %4336 = vmatpush1.msra.mxu0 %v6145_v48  ;;  %v6186_v34 = vld [vmem:[%s10547_s5 + $0x698] sm:$0xff]  ;;  %v6219_v48 = vld [vmem:[%s10547_s5 + $0x7a0] sm:$0xff]  ;;  %v6184_v4 = vld [vmem:[%s10547_s5 + $0x688] sm:$0xff] }
 0x302   : > { %4168 = vmatpush1.msra.mxu1 %v6111_v31  ;;  %4337 = vmatprep.subr.mxu0 %v6144_v50  ;;  %v6185_v31 = vld [vmem:[%s10547_s5 + $0x690] sm:$0xff]  ;;  %v9481_v50 = vld [vmem:[#allocation3 + $0x41] sm:$0xff] }
 0x303   : > { %3905 = vmatprep.mubr.f32.mxu1 %v10639_v16  ;;  %4075 = vmatprep.mubr.f32.mxu0 %v10639_v16 }
 0x304   : > { %4169 = vmatprep.subr.mxu1 %v6110_v13  ;;  %4338 = vmatpush1.msra.mxu0 %v6143_v21  ;;  %v9490_v13 = vld [vmem:[#allocation3 + $0x42] sm:$0xff]  ;;  %v6217_v21 = vld [vmem:[%s10547_s5 + $0x790] sm:$0xff] }
 0x305   : > { %3906 = vmatmul.mubr.f32.gmra.mxu1 %v9335_v20  ;;  %4076 = vmatmul.mubr.f32.gmra.mxu0 %v9152_v5 }
 0x306   : > { %4170 = vmatpush1.msra.mxu1 %v6109_v59  ;;  %4339 = vmatprep.subr.mxu0 %v6142_v56  ;;  %v6183_v59 = vld [vmem:[%s10547_s5 + $0x680] sm:$0xff]  ;;  %v6216_v56 = vld [vmem:[%s10547_s5 + $0x788] sm:$0xff] }
 0x307   : > { %4171 = vmatprep.subr.mxu1 %v6108_v43  ;;  %4340 = vmatpush1.msra.mxu0 %v6141_v27  ;;  %v6182_v43 = vld [vmem:[%s10547_s5 + $0x678] sm:$0xff]  ;;  %v6215_v27 = vld [vmem:[%s10547_s5 + $0x780] sm:$0xff] }
 0x308   : > { %4172 = vmatpush1.msra.mxu1 %v6107_v44  ;;  %4341 = vmatprep.subr.mxu0 %v6140_v30  ;;  %v6181_v44 = vld [vmem:[%s10547_s5 + $0x670] sm:$0xff]  ;;  %v6214_v30 = vld [vmem:[%s10547_s5 + $0x778] sm:$0xff] }
 0x309   : > { %3911 = vmatprep.mubr.f32.mxu1 %v10639_v16  ;;  %4081 = vmatprep.mubr.f32.mxu0 %v10639_v16 }
 0x30a   : > { %4173 = vmatprep.subr.mxu1 %v6106_v19  ;;  %4342 = vmatpush1.msra.mxu0 %v6139_v45  ;;  %v6180_v19 = vld [vmem:[%s10547_s5 + $0x668] sm:$0xff]  ;;  %v6213_v45 = vld [vmem:[%s10547_s5 + $0x770] sm:$0xff] }
 0x30b   : > { %3912 = vmatmul.mubr.f32.gmra.mxu1 %v9365_v25  ;;  %4082 = vmatmul.mubr.f32.gmra.mxu0 %v9374_v51 }
 0x30c   : > { %4174 = vmatpush1.msra.mxu1 %v6105_v54  ;;  %4343 = vmatprep.subr.mxu0 %v6138_v8  ;;  %v6179_v54 = vld [vmem:[%s10547_s5 + $0x660] sm:$0xff]  ;;  %v6212_v8 = vld [vmem:[%s10547_s5 + $0x768] sm:$0xff] }
 0x30d   : > { %4175 = vmatprep.subr.mxu1 %v6104_v9  ;;  %4344 = vmatpush1.msra.mxu0 %v6137_v41  ;;  %v6211_v9 = vld [vmem:[%s10547_s5 + $0x760] sm:$0xff]  ;;  %v6210_v41 = vld [vmem:[%s10547_s5 + $0x758] sm:$0xff] }
 0x30e   : > { %4176 = vmatpush1.msra.mxu1 %v6103_v23  ;;  %4345 = vmatprep.subr.mxu0 %v6136_v12  ;;  %v6176_v23 = vld [vmem:[%s10547_s5 + $0x648] sm:$0xff]  ;;  %v6209_v12 = vld [vmem:[%s10547_s5 + $0x750] sm:$0xff] }
 0x30f   : > { %4209 = vmatprep.mubr.f32.mxu1 %v10639_v16  ;;  %4346 = vmatpush1.msra.mxu0 %v6135_v11  ;;  %v6175_v11 = vld [vmem:[%s10547_s5 + $0x640] sm:$0xff] }
 0x310   : > { %4379 = vmatprep.mubr.f32.mxu0 %v10639_v16  ;;  %4485 = vmatprep.subr.mxu1 %v6198_v32  ;;  %v6208_v32 = vld [vmem:[%s10547_s5 + $0x748] sm:$0xff] }
 0x311   : > { %4210 = vmatmul.mubr.f32.vlgmr.msra.gmra.mxu1 %v9111_v39  ;;  %4380 = vmatmul.mubr.f32.vlgmr.msra.gmra.mxu0 %v9184_v6  ;;  %v6194_v39 = vld [vmem:[%s10547_s5 + $0x6d8] sm:$0xff]  ;;  %v6193_v6 = vld [vmem:[%s10547_s5 + $0x6d0] sm:$0xff] }
 0x312   : > { %4486 = vmatpush1.msra.mxu1 %v6197_v63  ;;  %4655 = vmatprep.subr.mxu0 %v6230_v18  ;;  %v6174_v63 = vld [vmem:[%s10547_s5 + $0x638] sm:$0xff]  ;;  %v6207_v18 = vld [vmem:[%s10547_s5 + $0x740] sm:$0xff] }
 0x313   : > { %4487 = vmatprep.subr.mxu1 %v6196_v7  ;;  %4656 = vmatpush1.msra.mxu0 %v6229_v28  ;;  %v6173_v7 = vld [vmem:[%s10547_s5 + $0x630] sm:$0xff]  ;;  %v6206_v28 = vld [vmem:[%s10547_s5 + $0x738] sm:$0xff] }
 0x314   : > { %4488 = vmatpush1.msra.mxu1 %v6195_v17  ;;  %4657 = vmatprep.subr.mxu0 %v6228_v61  ;;  %v6172_v17 = vld [vmem:[%s10547_s5 + $0x628] sm:$0xff]  ;;  %v6205_v61 = vld [vmem:[%s10547_s5 + $0x730] sm:$0xff] }
 0x315   : > { %4215 = vmatprep.mubr.f32.mxu1 %v10639_v16  ;;  %4385 = vmatprep.mubr.f32.mxu0 %v10639_v16 }
 0x316   : > { %4489 = vmatprep.subr.mxu1 %v6194_v39  ;;  %4658 = vmatpush1.msra.mxu0 %v6227_v60  ;;  %v6171_v39 = vld [vmem:[%s10547_s5 + $0x620] sm:$0xff]  ;;  %v6204_v60 = vld [vmem:[%s10547_s5 + $0x728] sm:$0xff] }
 0x317   : > { %4216 = vmatmul.mubr.f32.gmra.mxu1 %v9116_v55  ;;  %4386 = vmatmul.mubr.f32.gmra.mxu0 %v9214_v35 }
 0x318   : > { %4490 = vmatpush1.msra.mxu1 %v6193_v6  ;;  %4659 = vmatprep.subr.mxu0 %v6226_v14  ;;  %v6170_v6 = vld [vmem:[%s10547_s5 + $0x618] sm:$0xff]  ;;  %v6203_v14 = vld [vmem:[%s10547_s5 + $0x720] sm:$0xff] }
 0x319   : > { %4491 = vmatprep.subr.mxu1 %v6192_v52  ;;  %4660 = vmatpush1.msra.mxu0 %v6225_v40  ;;  %v6169_v52 = vld [vmem:[%s10547_s5 + $0x610] sm:$0xff]  ;;  %v9597_v40 = vld [vmem:[#allocation3 + $0xa1] sm:$0xff] }
 0x31a   : > { %4492 = vmatpush1.msra.mxu1 %v6191_v3  ;;  %4661 = vmatprep.subr.mxu0 %v6224_v1  ;;  %v6202_v3 = vld [vmem:[%s10547_s5 + $0x718] sm:$0xff]  ;;  %v6168_v1 = vld [vmem:[%s10547_s5 + $0x608] sm:$0xff] }
 0x31b   : > { %4221 = vmatprep.mubr.f32.mxu1 %v10639_v16  ;;  %4391 = vmatprep.mubr.f32.mxu0 %v10639_v16 }
 0x31c   : > { %4493 = vmatprep.subr.mxu1 %v6190_v46  ;;  %4662 = vmatpush1.msra.mxu0 %v6223_v42  ;;  %v9606_v46 = vld [vmem:[#allocation3 + $0xa2] sm:$0xff]  ;;  %v6201_v42 = vld [vmem:[%s10547_s5 + $0x710] sm:$0xff] }
 0x31d   : > { %4222 = vmatmul.mubr.f32.gmra.mxu1 %v9124_v15  ;;  %4392 = vmatmul.mubr.f32.gmra.mxu0 %v9244_v53 }
 0x31e   : > { %4494 = vmatpush1.msra.mxu1 %v6189_v37  ;;  %4663 = vmatprep.subr.mxu0 %v6222_v10  ;;  %v6167_v37 = vld [vmem:[%s10547_s5 + $0x600] sm:$0xff]  ;;  %v6200_v10 = vld [vmem:[%s10547_s5 + $0x708] sm:$0xff] }
 0x31f   : > { %4495 = vmatprep.subr.mxu1 %v6188_v0  ;;  %4664 = vmatpush1.msra.mxu0 %v6221_v38  ;;  %v6199_v0 = vld [vmem:[%s10547_s5 + $0x700] sm:$0xff]  ;;  %v6262_v38 = vld [vmem:[%s10547_s5 + $0x8f8] sm:$0xff] }
 0x320   : > { %4496 = vmatpush1.msra.mxu1 %v6187_v58  ;;  %4665 = vmatprep.subr.mxu0 %v6220_v2  ;;  %v6261_v58 = vld [vmem:[%s10547_s5 + $0x8f0] sm:$0xff]  ;;  %v6260_v2 = vld [vmem:[%s10547_s5 + $0x8e8] sm:$0xff] }
 0x321   : > { %4227 = vmatprep.mubr.f32.mxu1 %v10639_v16  ;;  %4397 = vmatprep.mubr.f32.mxu0 %v10639_v16 }
 0x322   : > { %4497 = vmatprep.subr.mxu1 %v6186_v34  ;;  %4666 = vmatpush1.msra.mxu0 %v6219_v48  ;;  %v6259_v34 = vld [vmem:[%s10547_s5 + $0x8e0] sm:$0xff]  ;;  %v6258_v48 = vld [vmem:[%s10547_s5 + $0x8d8] sm:$0xff] }
 0x323   : > { %4228 = vmatmul.mubr.f32.gmra.mxu1 %v9481_v50  ;;  %4398 = vmatmul.mubr.f32.gmra.mxu0 %v9490_v13 }
 0x324   : > { %4498 = vmatpush1.msra.mxu1 %v6185_v31  ;;  %4667 = vmatprep.subr.mxu0 %v6218_v49  ;;  %v6257_v31 = vld [vmem:[%s10547_s5 + $0x8d0] sm:$0xff]  ;;  %v6254_v49 = vld [vmem:[%s10547_s5 + $0x8b8] sm:$0xff] }
 0x325   : > { %4499 = vmatprep.subr.mxu1 %v6184_v4  ;;  %4668 = vmatpush1.msra.mxu0 %v6217_v21  ;;  %v6253_v4 = vld [vmem:[%s10547_s5 + $0x8b0] sm:$0xff]  ;;  %v6250_v21 = vld [vmem:[%s10547_s5 + $0x898] sm:$0xff] }
 0x326   : > { %4500 = vmatpush1.msra.mxu1 %v6183_v59  ;;  %4669 = vmatprep.subr.mxu0 %v6216_v56  ;;  %v4447_v59 = vld [vmem:[#allocation3 + $0x50] sm:$0xff] }
 0x327   : > { %4233 = vmatprep.mubr.f32.mxu1 %v10639_v16  ;;  %4403 = vmatprep.mubr.f32.mxu0 %v10639_v16  ;;  %v4617_v56 = vld [vmem:[#allocation3 + $0x51] sm:$0xff] }
 0x328   : > { %4501 = vmatprep.subr.mxu1 %v6182_v43  ;;  %4670 = vmatpush1.msra.mxu0 %v6215_v27  ;;  %v6247_v43 = vld [vmem:[%s10547_s5 + $0x880] sm:$0xff]  ;;  %v6246_v27 = vld [vmem:[%s10547_s5 + $0x878] sm:$0xff] }
 0x329   : > { %4234 = vmatmul.mubr.f32.gmra.mxu1 %v9134_v24  ;;  %4404 = vmatmul.mubr.f32.gmra.mxu0 %v9303_v36  ;;  %v6178_v24 = vld [vmem:[%s10547_s5 + $0x658] sm:$0xff]  ;;  %v6177_v36 = vld [vmem:[%s10547_s5 + $0x650] sm:$0xff] }
 0x32a   : > { %4502 = vmatpush1.msra.mxu1 %v6181_v44  ;;  %4671 = vmatprep.subr.mxu0 %v6214_v30  ;;  %v6245_v44 = vld [vmem:[%s10547_s5 + $0x870] sm:$0xff]  ;;  %v6244_v30 = vld [vmem:[%s10547_s5 + $0x868] sm:$0xff] }
 0x32b   : > { %4503 = vmatprep.subr.mxu1 %v6180_v19  ;;  %4672 = vmatpush1.msra.mxu0 %v6213_v45  ;;  %v6243_v19 = vld [vmem:[%s10547_s5 + $0x860] sm:$0xff]  ;;  %v6242_v45 = vld [vmem:[%s10547_s5 + $0x858] sm:$0xff] }
 0x32c   : > { %4504 = vmatpush1.msra.mxu1 %v6179_v54  ;;  %4673 = vmatprep.subr.mxu0 %v6212_v8  ;;  %v6241_v54 = vld [vmem:[%s10547_s5 + $0x850] sm:$0xff]  ;;  %v6238_v8 = vld [vmem:[%s10547_s5 + $0x838] sm:$0xff] }
 0x32d   : > { %4239 = vmatprep.mubr.f32.mxu1 %v10639_v16  ;;  %4409 = vmatprep.mubr.f32.mxu0 %v10639_v16 }
 0x32e   : > { %4505 = vmatprep.subr.mxu1 %v6178_v24  ;;  %4674 = vmatpush1.msra.mxu0 %v6211_v9  ;;  %v6237_v24 = vld [vmem:[%s10547_s5 + $0x830] sm:$0xff]  ;;  %v6234_v9 = vld [vmem:[%s10547_s5 + $0x818] sm:$0xff] }
 0x32f   : > { %4240 = vmatmul.mubr.f32.gmra.mxu1 %v9142_v47  ;;  %4410 = vmatmul.mubr.f32.gmra.mxu0 %v9335_v20 }
 0x330   : > { %4506 = vmatpush1.msra.mxu1 %v6177_v36  ;;  %4675 = vmatprep.subr.mxu0 %v6210_v41  ;;  %v4451_v36 = vld [vmem:[#allocation3 + $0xb0] sm:$0xff] }
 0x331   : > { %4507 = vmatprep.subr.mxu1 %v6176_v23  ;;  %4676 = vmatpush1.msra.mxu0 %v6209_v12  ;;  %v6233_v41 = vld [vmem:[%s10547_s5 + $0x810] sm:$0xff]  ;;  %v6232_v23 = vld [vmem:[%s10547_s5 + $0x808] sm:$0xff]  ;;  %v6231_v12 = vld [vmem:[%s10547_s5 + $0x800] sm:$0xff] }
 0x332   : > { %4508 = vmatpush1.msra.mxu1 %v6175_v11  ;;  %4677 = vmatprep.subr.mxu0 %v6208_v32  ;;  %v4787_v11 = vld [vmem:[#allocation3 + $0x52] sm:$0xff] }
 0x333   : > { %4245 = vmatprep.mubr.f32.mxu1 %v10639_v16  ;;  %4415 = vmatprep.mubr.f32.mxu0 %v10639_v16 }
 0x334   : > { %4509 = vmatprep.subr.mxu1 %v6174_v63  ;;  %4678 = vmatpush1.msra.mxu0 %v6207_v18 }
 0x335   : > { %4246 = vmatmul.mubr.f32.gmra.mxu1 %v9150_v29  ;;  %4416 = vmatmul.mubr.f32.gmra.mxu0 %v9365_v25 }
 0x336   : > { %4510 = vmatpush1.msra.mxu1 %v6173_v7  ;;  %4679 = vmatprep.subr.mxu0 %v6206_v28 }
 0x337   : > { %4511 = vmatprep.subr.mxu1 %v6172_v17  ;;  %4680 = vmatpush1.msra.mxu0 %v6205_v61 }
 0x338   : > { %4512 = vmatpush1.msra.mxu1 %v6171_v39  ;;  %4681 = vmatprep.subr.mxu0 %v6204_v60 }
 0x339   : > { %4251 = vmatprep.mubr.f32.mxu1 %v10639_v16  ;;  %4421 = vmatprep.mubr.f32.mxu0 %v10639_v16 }
 0x33a   : > { %4513 = vmatprep.subr.mxu1 %v6170_v6  ;;  %4682 = vmatpush1.msra.mxu0 %v6203_v14 }
 0x33b   : > { %4252 = vmatmul.mubr.f32.gmra.mxu1 %v9597_v40  ;;  %4422 = vmatmul.mubr.f32.gmra.mxu0 %v9606_v46 }
 0x33c   : > { %4514 = vmatpush1.msra.mxu1 %v6169_v52  ;;  %4683 = vmatprep.subr.mxu0 %v6202_v3 }
 0x33d   : > { %4515 = vmatprep.subr.mxu1 %v6168_v1  ;;  %4684 = vmatpush1.msra.mxu0 %v6201_v42 }
 0x33e   : > { %4516 = vmatpush1.msra.mxu1 %v6167_v37  ;;  %4685 = vmatprep.subr.mxu0 %v6200_v10 }
 0x33f   : > { %4549 = vmatprep.mubr.f32.mxu1 %v10639_v16  ;;  %4686 = vmatpush1.msra.mxu0 %v6199_v0 }
 0x340   : > { %4719 = vmatprep.mubr.f32.mxu0 %v10639_v16  ;;  %4825 = vmatprep.subr.mxu1 %v6262_v38 }
 0x341   : > { %4550 = vmatmul.mubr.f32.vlgmr.msra.gmra.mxu1 %v9118_v57  ;;  %4720 = vmatmul.mubr.f32.vlgmr.msra.gmra.mxu0 %v9116_v55  ;;  %v6256_v57 = vld [vmem:[%s10547_s5 + $0x8c8] sm:$0xff]  ;;  %v6255_v55 = vld [vmem:[%s10547_s5 + $0x8c0] sm:$0xff] }
 0x342   : > { %4826 = vmatpush1.msra.mxu1 %v6261_v58  ;;  %4555 = vmatprep.mubr.f32.mxu1 %v10639_v16 }
 0x343   : > { %4827 = vmatprep.subr.mxu1 %v6260_v2  ;;  %4725 = vmatprep.mubr.f32.mxu0 %v10639_v16 }
 0x344   : > { %4828 = vmatpush1.msra.mxu1 %v6259_v34 }
 0x345   : > { %4829 = vmatprep.subr.mxu1 %v6258_v48  ;;  %4556 = vmatmul.mubr.f32.gmra.mxu1 %v9126_v62  ;;  %v6252_v62 = vld [vmem:[%s10547_s5 + $0x8a8] sm:$0xff] }
 0x346   : > { %4726 = vmatmul.mubr.f32.gmra.mxu0 %v9124_v15  ;;  %4830 = vmatpush1.msra.mxu1 %v6257_v31  ;;  %v6251_v15 = vld [vmem:[%s10547_s5 + $0x8a0] sm:$0xff] }
 0x347   : > { %4831 = vmatprep.subr.mxu1 %v6256_v57  ;;  %4561 = vmatprep.mubr.f32.mxu1 %v10639_v16 }
 0x348   : > { %4832 = vmatpush1.msra.mxu1 %v6255_v55  ;;  %4731 = vmatprep.mubr.f32.mxu0 %v10639_v16 }
 0x349   : > { %4833 = vmatprep.subr.mxu1 %v6254_v49  ;;  %4562 = vmatmul.mubr.f32.gmra.mxu1 %v9253_v33  ;;  %v6249_v33 = vld [vmem:[%s10547_s5 + $0x890] sm:$0xff] }
 0x34a   : > { %4732 = vmatmul.mubr.f32.gmra.mxu0 %v9481_v50  ;;  %4834 = vmatpush1.msra.mxu1 %v6253_v4  ;;  %v6248_v50 = vld [vmem:[%s10547_s5 + $0x888] sm:$0xff] }
 0x34b   : > { %4835 = vmatprep.subr.mxu1 %v6252_v62  ;;  %4567 = vmatprep.mubr.f32.mxu1 %v10639_v16 }
 0x34c   : > { %4836 = vmatpush1.msra.mxu1 %v6251_v15  ;;  %4737 = vmatprep.mubr.f32.mxu0 %v10639_v16 }
 0x34d   : > { %4837 = vmatprep.subr.mxu1 %v6250_v21  ;;  %4568 = vmatmul.mubr.f32.gmra.mxu1 %v4447_v59 }
 0x34e   : > { %4738 = vmatmul.mubr.f32.gmra.mxu0 %v4617_v56  ;;  %4838 = vmatpush1.msra.mxu1 %v6249_v33 }
 0x34f   : > { %4839 = vmatprep.subr.mxu1 %v6248_v50  ;;  %4573 = vmatprep.mubr.f32.mxu1 %v10639_v16 }
 0x350   : > { %4840 = vmatpush1.msra.mxu1 %v6247_v43  ;;  %4743 = vmatprep.mubr.f32.mxu0 %v10639_v16 }
 0x351   : > { %4841 = vmatprep.subr.mxu1 %v6246_v27  ;;  %4574 = vmatmul.mubr.f32.gmra.mxu1 %v9144_v26  ;;  %v6240_v26 = vld [vmem:[%s10547_s5 + $0x848] sm:$0xff] }
 0x352   : > { %4744 = vmatmul.mubr.f32.gmra.mxu0 %v9142_v47  ;;  %4842 = vmatpush1.msra.mxu1 %v6245_v44  ;;  %v6239_v47 = vld [vmem:[%s10547_s5 + $0x840] sm:$0xff] }
 0x353   : > { %4843 = vmatprep.subr.mxu1 %v6244_v30  ;;  %4579 = vmatprep.mubr.f32.mxu1 %v10639_v16 }
 0x354   : > { %4844 = vmatpush1.msra.mxu1 %v6243_v19  ;;  %4749 = vmatprep.mubr.f32.mxu0 %v10639_v16 }
 0x355   : > { %4845 = vmatprep.subr.mxu1 %v6242_v45  ;;  %4580 = vmatmul.mubr.f32.gmra.mxu1 %v9152_v5  ;;  %v6236_v5 = vld [vmem:[%s10547_s5 + $0x828] sm:$0xff] }
 0x356   : > { %4750 = vmatmul.mubr.f32.gmra.mxu0 %v9150_v29  ;;  %4846 = vmatpush1.msra.mxu1 %v6241_v54  ;;  %v6235_v29 = vld [vmem:[%s10547_s5 + $0x820] sm:$0xff] }
 0x357   : > { %4847 = vmatprep.subr.mxu1 %v6240_v26  ;;  %4585 = vmatprep.mubr.f32.mxu1 %v10639_v16 }
 0x358   : > { %4848 = vmatpush1.msra.mxu1 %v6239_v47  ;;  %4755 = vmatprep.mubr.f32.mxu0 %v10639_v16 }
 0x359   : > { %4849 = vmatprep.subr.mxu1 %v6238_v8  ;;  %4586 = vmatmul.mubr.f32.gmra.mxu1 %v9374_v51  ;;  %v4621_v51 = vld [vmem:[#allocation3 + $0xb1] sm:$0xff] }
 0x35a   : > { %4756 = vmatmul.mubr.f32.gmra.mxu0 %v9597_v40  ;;  %4850 = vmatpush1.msra.mxu1 %v6237_v24 }
 0x35b   : > { %4851 = vmatprep.subr.mxu1 %v6236_v5  ;;  %4591 = vmatprep.mubr.f32.mxu1 %v10639_v16 }
 0x35c   : > { %4852 = vmatpush1.msra.mxu1 %v6235_v29  ;;  %4761 = vmatprep.mubr.f32.mxu0 %v10639_v16 }
 0x35d   : > { %4853 = vmatprep.subr.mxu1 %v6234_v9  ;;  %4592 = vmatmul.mubr.f32.gmra.mxu1 %v4451_v36 }
 0x35e   : > { %4854 = vmatpush1.msra.mxu1 %v6233_v41  ;;  %4762 = vmatmul.mubr.f32.gmra.mxu0 %v4621_v51 }
 0x35f   : > { %4855 = vmatprep.subr.mxu1 %v6232_v23  ;;  %4889 = vmatprep.mubr.f32.mxu1 %v10639_v16 }
 0x360   : > { %4856 = vmatpush1.msra.mxu1 %v6231_v12 }
 0x361   : > { %4890 = vmatmul.mubr.f32.vlgmr.msra.gmra.mxu1 %v9214_v35  ;;  %v4791_v35 = vld [vmem:[#allocation3 + $0xb2] sm:$0xff] }
 0x362   : > { %4895 = vmatprep.mubr.f32.mxu1 %v10639_v16 }
 0x365   : > { %4896 = vmatmul.mubr.f32.gmra.mxu1 %v9244_v53  ;;  %v9759_v53 = vpop.f32.mrf.mxu1 }
 0x366   : > { %4901 = vmatprep.mubr.f32.mxu1 %v10639_v16 }
 0x369   : > { %4902 = vmatmul.mubr.f32.gmra.mxu1 %v9490_v13  ;;  %v9761_v13 = vpop.f32.mrf.mxu0 }
 0x36a   : > { %4907 = vmatprep.mubr.f32.mxu1 %v10639_v16 }
 0x36d   : > { %4908 = vmatmul.mubr.f32.gmra.mxu1 %v4787_v11  ;;  %v6294_v11 = vld [vmem:[%s10549_s7 + $0x1f8] sm:$0xff] }
 0x36e   : > { %4913 = vmatprep.mubr.f32.mxu1 %v10639_v16  ;;  %6649 = vmatprep.subr.mxu0 %v6294_v11  ;;  %v6287_v11 = vld [vmem:[%s10549_s7 + $0x1c0] sm:$0xff] }
 0x371   : > { %4914 = vmatmul.mubr.f32.gmra.mxu1 %v9335_v20 }
 0x372   : > { %4919 = vmatprep.mubr.f32.mxu1 %v10639_v16 }
 0x375   : > { %4920 = vmatmul.mubr.f32.gmra.mxu1 %v9365_v25 }
 0x376   : > { %4925 = vmatprep.mubr.f32.mxu1 %v10639_v16 }
 0x379   : > { %4926 = vmatmul.mubr.f32.gmra.mxu1 %v9606_v46 }
 0x37a   : > { %4931 = vmatprep.mubr.f32.mxu1 %v10639_v16 }
 0x37d   : > { %4932 = vmatmul.mubr.f32.gmra.mxu1 %v4791_v35  ;;  %v5040_v35 = vld [vmem:[%s10549_s7 + $0xf8] sm:$0xff] }
 0x37e   : > { %6684 = vmatprep.subr.mxu1 %v5040_v35  ;;  %v5033_v35 = vld [vmem:[%s10549_s7 + $0xc0] sm:$0xff] }
 0x385   : > { %v3610_v32 = vpop.f32.mrf.mxu1 }
 0x386   : > { %v3723_v63 = vpop.f32.mrf.mxu0 }
 0x387   : > { %v3724_v18 = vadd.f32 %v3723_v63, %v3610_v32  ;;  %v3612_v20 = vpop.f32.mrf.mxu1  ;;  %v6278_v63 = vld [vmem:[%s10549_s7 + $0x178] sm:$0xff] }
 0x388   : > { %v3725_v7 = vpop.f32.mrf.mxu0  ;;  %6650 = vmatpush3.msra.mxu0 %v6278_v63  ;;  %v5017_v63 = vld [vmem:[%s10549_s7 + $0x40] sm:$0xff] }
 0x389   : > { %v3726_v28 = vadd.f32 %v3725_v7, %v3612_v20  ;;  %v3616_v17 = vpop.f32.mrf.mxu1 }
 0x38a   : > { %v3729_v25 = vpop.f32.mrf.mxu0 }
 0x38b   : > { %v3730_v61 = vadd.f32 %v3729_v25, %v3616_v17  ;;  %v3618_v39 = vpop.f32.mrf.mxu1  ;;  %v5039_v17 = vld [vmem:[%s10549_s7 + $0xf0] sm:$0xff] }
 0x38c   : > { %v3731_v60 = vpop.f32.mrf.mxu0 }
 0x38d   : > { %v3732_v6 = vadd.f32 %v3731_v60, %v3618_v39  ;;  %v3622_v14 = vpop.f32.mrf.mxu1  ;;  %v5023_v39 = vld [vmem:[%s10549_s7 + $0x70] sm:$0xff] }
 0x38e   : > { %v3735_v52 = vpop.f32.mrf.mxu0 }
 0x38f   : > { %v3736_v40 = vadd.f32 %v3735_v52, %v3622_v14  ;;  %v3624_v3 = vpop.f32.mrf.mxu1  ;;  %v6292_v14 = vld [vmem:[%s10549_s7 + $0x1e8] sm:$0xff] }
 0x390   : > { %v3737_v1 = vpop.f32.mrf.mxu0  ;;  %v5038_v52 = vld [vmem:[%s10549_s7 + $0xe8] sm:$0xff] }
 0x391   : > { %v3738_v46 = vadd.f32 %v3737_v1, %v3624_v3  ;;  %v3628_v42 = vpop.f32.mrf.mxu1  ;;  %v5022_v3 = vld [vmem:[%s10549_s7 + $0x68] sm:$0xff]  ;;  %v6291_v1 = vld [vmem:[%s10549_s7 + $0x1e0] sm:$0xff] }
 0x392   : > { %v3741_v37 = vpop.f32.mrf.mxu0 }
 0x393   : > { %v9763_v10 = vadd.f32 %v3741_v37, %v3628_v42  ;;  %v3630_v0 = vpop.f32.mrf.mxu1  ;;  %v6275_v37 = vld [vmem:[%s10549_s7 + $0x160] sm:$0xff] }
 0x394   : > { %v3743_v38 = vpop.f32.mrf.mxu0 }
 0x395   : > { %v9765_v58 = vadd.f32 %v3743_v38, %v3630_v0  ;;  %v3634_v2 = vpop.f32.mrf.mxu1  ;;  %v5021_v0 = vld [vmem:[%s10549_s7 + $0x60] sm:$0xff] }
 0x396   : > { %v3747_v34 = vpop.f32.mrf.mxu0 }
 0x397   : > { %v9767_v48 = vadd.f32 %v3747_v34, %v3634_v2  ;;  %v3636_v31 = vpop.f32.mrf.mxu1  ;;  %v6290_v34 = vld [vmem:[%s10549_s7 + $0x1d8] sm:$0xff] }
 0x398   : > { %v3749_v57 = vpop.f32.mrf.mxu0 }
 0x399   : > { %v9769_v55 = vadd.f32 %v3749_v57, %v3636_v31  ;;  %v3640_v49 = vpop.f32.mrf.mxu1  ;;  %v5036_v31 = vld [vmem:[%s10549_s7 + $0xd8] sm:$0xff] }
 0x39a   : > { %v3753_v4 = vpop.f32.mrf.mxu0 }
 0x39b   : > { %v9771_v62 = vadd.f32 %v3753_v4, %v3640_v49  ;;  %v3642_v15 = vpop.f32.mrf.mxu1  ;;  %v5020_v49 = vld [vmem:[%s10549_s7 + $0x58] sm:$0xff] }
 0x39c   : > { %v3755_v21 = vpop.f32.mrf.mxu0 }
 0x39d   : > { %v9773_v59 = vadd.f32 %v3755_v21, %v3642_v15  ;;  %v3646_v56 = vpop.f32.mrf.mxu1  ;;  %v6289_v21 = vld [vmem:[%s10549_s7 + $0x1d0] sm:$0xff] }
 0x39e   : > { %v3759_v33 = vpop.f32.mrf.mxu0 }
 0x39f   : > { %v9775_v50 = vadd.f32 %v3759_v33, %v3646_v56  ;;  %v3648_v43 = vpop.f32.mrf.mxu1  ;;  %v5035_v56 = vld [vmem:[%s10549_s7 + $0xd0] sm:$0xff] }
 0x3a0   : > { %v3761_v27 = vpop.f32.mrf.mxu0  ;;  %v6273_v33 = vld [vmem:[%s10549_s7 + $0x150] sm:$0xff] }
 0x3a1   : > { %v9777_v44 = vadd.f32 %v3761_v27, %v3648_v43  ;;  %v3871_v30 = vpop.f32.mrf.mxu1  ;;  %v6288_v43 = vld [vmem:[%s10549_s7 + $0x1c8] sm:$0xff] }
 0x3a2   : > { %v9779_v19 = vpop.f32.mrf.mxu0  ;;  %v9782_v45 = vadd.f32 %v3871_v30, %v9325_v22  ;;  %v5034_v27 = vld [vmem:[%s10549_s7 + $0xc8] sm:$0xff] }
 0x3a3   : > { %v9784_v54 = vpop.f32.mrf.mxu1 }
 0x3a4   : > { %v9786_v26 = vpop.f32.mrf.mxu0 }
 0x3a7   : > { %v3877_v47 = vpop.f32.mrf.mxu1  ;;  %v9790_v24 = vpop.f32.mrf.mxu0 }
 0x3a8   : > { %v9788_v8 = vadd.f32 %v3877_v47, %v3724_v18  ;;  %v5024_v18 = vld [vmem:[%s10549_s7 + $0x78] sm:$0xff]  ;;  %v6272_v47 = vld [vmem:[%s10549_s7 + $0x148] sm:$0xff] }
 0x3a9   : > { %v3879_v5 = vpop.f32.mrf.mxu1  ;;  %v9794_v9 = vpop.f32.mrf.mxu0  ;;  %6685 = vmatpush3.msra.mxu1 %v5024_v18 }
 0x3aa   : > { %v9792_v29 = vadd.f32 %v3879_v5, %v3726_v28  ;;  %v6293_v28 = vld [vmem:[%s10549_s7 + $0x1f0] sm:$0xff]  ;;  %6686 = vmatprep.subr.mxu1 %v5039_v17  ;;  %v5018_v5 = vld [vmem:[%s10549_s7 + $0x48] sm:$0xff]  ;;  %v6286_v17 = vld [vmem:[%s10549_s7 + $0x1b8] sm:$0xff] }
 0x3ab   : > { %6651 = vmatprep.subr.mxu0 %v6293_v28  ;;  %6687 = vmatpush3.msra.mxu1 %v5023_v39  ;;  %v6285_v39 = vld [vmem:[%s10549_s7 + $0x1b0] sm:$0xff] }
 0x3ac   : > { %6688 = vmatprep.subr.mxu1 %v5038_v52 }
 0x3ad   : > { %v3883_v36 = vpop.f32.mrf.mxu1  ;;  %v9798_v51 = vpop.f32.mrf.mxu0  ;;  %6689 = vmatpush3.msra.mxu1 %v5022_v3  ;;  %v5015_v3 = vld [vmem:[%s10549_s7 + $0x30] sm:$0xff] }
 0x3ae   : > { %v9796_v41 = vadd.f32 %v3883_v36, %v3730_v61  ;;  %v6277_v61 = vld [vmem:[%s10549_s7 + $0x170] sm:$0xff] }
 0x3af   : > { %v3885_v22 = vpop.f32.mrf.mxu1  ;;  %v9802_v12 = vpop.f32.mrf.mxu0  ;;  %6652 = vmatpush3.msra.mxu0 %v6277_v61  ;;  %v6270_v61 = vld [vmem:[%s10549_s7 + $0x138] sm:$0xff] }
 0x3b0   : > { %v9800_v23 = vadd.f32 %v3885_v22, %v3732_v6  ;;  %6653 = vmatprep.subr.mxu0 %v6292_v14  ;;  %v5031_v14 = vld [vmem:[%s10549_s7 + $0xb0] sm:$0xff] }
 0x3b3   : > { %v3889_v32 = vpop.f32.mrf.mxu1  ;;  %v9818_v7 = vpop.f32.mrf.mxu0 }
 0x3b4   : > { %v9816_v20 = vadd.f32 %v3889_v32, %v3736_v40  ;;  %v6276_v40 = vld [vmem:[%s10549_s7 + $0x168] sm:$0xff] }
 0x3b5   : > { %v3891_v25 = vpop.f32.mrf.mxu1  ;;  %v9834_v6 = vpop.f32.mrf.mxu0  ;;  %6654 = vmatpush3.msra.mxu0 %v6276_v40  ;;  %v6269_v40 = vld [vmem:[%s10549_s7 + $0x130] sm:$0xff] }
 0x3b6   : > { %v9832_v60 = vadd.f32 %v3891_v25, %v3738_v46  ;;  %v5037_v46 = vld [vmem:[%s10549_s7 + $0xe0] sm:$0xff]  ;;  %6655 = vmatprep.subr.mxu0 %v6291_v1  ;;  %v5032_v25 = vld [vmem:[%s10549_s7 + $0xb8] sm:$0xff] }
 0x3b7   : > { %6690 = vmatprep.subr.mxu1 %v5037_v46  ;;  %6656 = vmatpush3.msra.mxu0 %v6275_v37  ;;  %v5030_v37 = vld [vmem:[%s10549_s7 + $0xa8] sm:$0xff] }
 0x3b8   : > { %6691 = vmatpush3.msra.mxu1 %v5021_v0  ;;  %6657 = vmatprep.subr.mxu0 %v6290_v34  ;;  %v6268_v0 = vld [vmem:[%s10549_s7 + $0x128] sm:$0xff] }
 0x3b9   : > { %v3895_v42 = vpop.f32.mrf.mxu1  ;;  %v9863_v2 = vpop.f32.mrf.mxu0  ;;  %6692 = vmatprep.subr.mxu1 %v5036_v31  ;;  %v6283_v31 = vld [vmem:[%s10549_s7 + $0x1a0] sm:$0xff] }
 0x3ba   : > { %v9861_v38 = vadd.f32 %v3895_v42, %v9763_v10  ;;  %v6274_v10 = vld [vmem:[%s10549_s7 + $0x158] sm:$0xff]  ;;  %6693 = vmatpush3.msra.mxu1 %v5020_v49  ;;  %v6284_v42 = vld [vmem:[%s10549_s7 + $0x1a8] sm:$0xff] }
 0x3bb   : > { %v3897_v57 = vpop.f32.mrf.mxu1  ;;  %v9880_v15 = vpop.f32.mrf.mxu0  ;;  %6658 = vmatpush3.msra.mxu0 %v6274_v10  ;;  %6694 = vmatprep.subr.mxu1 %v5035_v56  ;;  %v5013_v56 = vld [vmem:[%s10549_s7 + $0x20] sm:$0xff] }
 0x3bc   : > { %v9878_v4 = vadd.f32 %v3897_v57, %v9765_v58  ;;  %6659 = vmatprep.subr.mxu0 %v6289_v21  ;;  %v5019_v58 = vld [vmem:[%s10549_s7 + $0x50] sm:$0xff]  ;;  %v5029_v57 = vld [vmem:[%s10549_s7 + $0xa0] sm:$0xff] }
 0x3bd   : > { %6660 = vmatpush3.msra.mxu0 %v6273_v33  ;;  %6695 = vmatpush3.msra.mxu1 %v5019_v58  ;;  %v6267_v21 = vld [vmem:[%s10549_s7 + $0x120] sm:$0xff]  ;;  %v6282_v33 = vld [vmem:[%s10549_s7 + $0x198] sm:$0xff] }
 0x3be   : > { %6661 = vmatprep.subr.mxu0 %v6288_v43  ;;  %6696 = vmatprep.subr.mxu1 %v5034_v27  ;;  %v6266_v58 = vld [vmem:[%s10549_s7 + $0x118] sm:$0xff]  ;;  %v6281_v27 = vld [vmem:[%s10549_s7 + $0x190] sm:$0xff] }
 0x3bf   : > { %v3901_v30 = vpop.f32.mrf.mxu1  ;;  %v9909_v22 = vpop.f32.mrf.mxu0  ;;  %6662 = vmatpush3.msra.mxu0 %v6272_v47  ;;  %6697 = vmatpush3.msra.mxu1 %v5018_v5  ;;  %v5012_v43 = vld [vmem:[%s10549_s7 + $0x18] sm:$0xff]  ;;  %v6265_v5 = vld [vmem:[%s10549_s7 + $0x110] sm:$0xff] }
 0x3c0   : > { %v9907_v36 = vadd.f32 %v3901_v30, %v9767_v48  ;;  %6663 = vmatprep.subr.mxu0 %v6287_v11  ;;  %6698 = vmatprep.subr.mxu1 %v5033_v35  ;;  %v6271_v48 = vld [vmem:[%s10549_s7 + $0x140] sm:$0xff]  ;;  %v5027_v30 = vld [vmem:[%s10549_s7 + $0x90] sm:$0xff] }
 0x3c1   : > { %v3903_v32 = vpop.f32.mrf.mxu1  ;;  %v9926_v28 = vpop.f32.mrf.mxu0  ;;  %6664 = vmatpush3.msra.mxu0 %v6271_v48  ;;  %6699 = vmatpush3.msra.mxu1 %v5017_v63  ;;  %v5011_v11 = vld [vmem:[%s10549_s7 + $0x10] sm:$0xff]  ;;  %v6280_v48 = vld [vmem:[%s10549_s7 + $0x188] sm:$0xff] }
 0x3c2   : > { %v9924_v18 = vadd.f32 %v3903_v32, %v9769_v55  ;;  %6665 = vmatprep.subr.mxu0 %v6286_v17  ;;  %6700 = vmatprep.subr.mxu1 %v5032_v25  ;;  %v5016_v55 = vld [vmem:[%s10549_s7 + $0x38] sm:$0xff]  ;;  %v5026_v63 = vld [vmem:[%s10549_s7 + $0x88] sm:$0xff] }
 0x3c3   : > { %6666 = vmatpush3.msra.mxu0 %v6270_v61  ;;  %6701 = vmatpush3.msra.mxu1 %v5016_v55  ;;  %v5010_v25 = vld [vmem:[%s10549_s7 + $0x8] sm:$0xff] }
 0x3c4   : > { %6667 = vmatprep.subr.mxu0 %v6285_v39  ;;  %6702 = vmatprep.subr.mxu1 %v5031_v14  ;;  %v6279_v39 = vld [vmem:[%s10549_s7 + $0x180] sm:$0xff] }
 0x3c5   : > { %v3907_v52 = vpop.f32.mrf.mxu1  ;;  %v9955_v46 = vpop.f32.mrf.mxu0  ;;  %6668 = vmatpush3.msra.mxu0 %v6269_v40  ;;  %6703 = vmatpush3.msra.mxu1 %v5015_v3  ;;  %v5025_v14 = vld [vmem:[%s10549_s7 + $0x80] sm:$0xff] }
 0x3c6   : > { %v9953_v1 = vadd.f32 %v3907_v52, %v9771_v62  ;;  %10641 = vst [vmem:[#allocation41_spill] sm:$0xff] %v9955_v46  ;;  %6669 = vmatprep.subr.mxu0 %v6284_v42  ;;  %6704 = vmatprep.subr.mxu1 %v5030_v37  ;;  %v5014_v62 = vld [vmem:[%s10549_s7 + $0x28] sm:$0xff]  ;;  %v6263_v52 = vld [vmem:[%s10549_s7 + $0x100] sm:$0xff]  ;;  %v6326_v42 = vld [vmem:[%s10549_s7 + $0x2f8] sm:$0xff] }
 0x3c7   : > { %v3909_v34 = vpop.f32.mrf.mxu1  ;;  %v9978_v49 = vpop.f32.mrf.mxu0  ;;  %6670 = vmatpush3.msra.mxu0 %v6268_v0  ;;  %6705 = vmatpush3.msra.mxu1 %v5014_v62  ;;  %v6358_v37 = vld [vmem:[%s10549_s7 + $0x3f8] sm:$0xff] }
 0x3c8   : > { %10640 = vst [vmem:[#allocation30_spill] sm:$0xff] %v9953_v1  ;;  %v9976_v10 = vadd.f32 %v3909_v34, %v9773_v59  ;;  %10643 = vst [vmem:[#allocation17_spill] sm:$0xff] %v9978_v49  ;;  %6671 = vmatprep.subr.mxu0 %v6283_v31  ;;  %6706 = vmatprep.subr.mxu1 %v5029_v57  ;;  %v5028_v59 = vld [vmem:[%s10549_s7 + $0x98] sm:$0xff] }
 0x3c9   : > { %6672 = vmatpush3.msra.mxu0 %v6267_v21  ;;  %6707 = vmatpush3.msra.mxu1 %v5013_v56 }
 0x3ca   : > { %10642 = vst [vmem:[#allocation7_spill] sm:$0xff] %v9976_v10  ;;  %6673 = vmatprep.subr.mxu0 %v6282_v33  ;;  %6708 = vmatprep.subr.mxu1 %v5028_v59 }
 0x3cb   : > { %v3913_v47 = vpop.f32.mrf.mxu1  ;;  %v10013_v32 = vpop.f32.mrf.mxu0  ;;  %6674 = vmatpush3.msra.mxu0 %v6266_v58  ;;  %6709 = vmatpush3.msra.mxu1 %v5012_v43 }
 0x3cc   : > { %v10011_v35 = vadd.f32 %v3913_v47, %v9775_v50  ;;  %10645 = vst [vmem:[#allocation18_spill] sm:$0xff] %v10013_v32  ;;  %6675 = vmatprep.subr.mxu0 %v6281_v27  ;;  %6710 = vmatprep.subr.mxu1 %v5027_v30  ;;  %v6264_v50 = vld [vmem:[%s10549_s7 + $0x108] sm:$0xff] }
 0x3cd   : > { %v3915_v17 = vpop.f32.mrf.mxu1  ;;  %v10030_v55 = vpop.f32.mrf.mxu0  ;;  %6676 = vmatpush3.msra.mxu0 %v6265_v5  ;;  %6711 = vmatpush3.msra.mxu1 %v5011_v11 }
 0x3ce   : > { %10644 = vst [vmem:[#allocation42_spill] sm:$0xff] %v10011_v35  ;;  %v10028_v61 = vadd.f32 %v3915_v17, %v9777_v44  ;;  %10647 = vst [vmem:[#allocation31_spill] sm:$0xff] %v10030_v55  ;;  %6677 = vmatprep.subr.mxu0 %v6280_v48  ;;  %6712 = vmatprep.subr.mxu1 %v5026_v63  ;;  %v5009_v44 = vld [vmem:[%s10549_s7] sm:$0xff] }
 0x3cf   : > { %6678 = vmatpush3.msra.mxu0 %v6264_v50  ;;  %6713 = vmatpush3.msra.mxu1 %v5010_v25 }
 0x3d0   : > { %10646 = vst [vmem:[#allocation16_spill] sm:$0xff] %v10028_v61  ;;  %6679 = vmatprep.subr.mxu0 %v6279_v39  ;;  %6714 = vmatprep.subr.mxu1 %v5025_v14 }
 0x3d1   : > { %v10044_v40 = vpop.f32.mrf.mxu1  ;;  %v10046_v3 = vpop.f32.mrf.mxu0  ;;  %6680 = vmatpush3.msra.mxu0 %v6263_v52  ;;  %6715 = vmatpush3.msra.mxu1 %v5009_v44 }
 0x3d2   : > { %6719 = vmatprep.subr.mxu0 %v6326_v42  ;;  %6754 = vmatprep.subr.mxu1 %v6358_v37 }
 0x3d3   : > { %v4213_v0 = vpop.f32.mrf.mxu1  ;;  %v10054_v34 = vpop.f32.mrf.mxu0 }
 0x3d7   : > { %v4217_v62 = vpop.f32.mrf.mxu1  ;;  %v10056_v31 = vpop.f32.mrf.mxu0 }
 0x3d9   : > { %v4219_v57 = vpop.f32.mrf.mxu1  ;;  %v10058_v21 = vpop.f32.mrf.mxu0 }
 0x3dd   : > { %v10060_v56 = vpop.f32.mrf.mxu1  ;;  %v10062_v33 = vpop.f32.mrf.mxu0 }
 0x3df   : > { %v10064_v59 = vpop.f32.mrf.mxu1  ;;  %v10066_v58 = vpop.f32.mrf.mxu0 }
 0x3e3   : > { %v10068_v43 = vpop.f32.mrf.mxu1  ;;  %v10070_v27 = vpop.f32.mrf.mxu0 }
 0x3e5   : > { %v10072_v30 = vpop.f32.mrf.mxu1  ;;  %v10074_v47 = vpop.f32.mrf.mxu0 }
 0x3e9   : > { %v10076_v5 = vpop.f32.mrf.mxu1  ;;  %v10078_v11 = vpop.f32.mrf.mxu0 }
 0x3ea   : > { %10648 = vst [vmem:[#allocation8_spill] sm:$0xff] %v10078_v11 }
 0x3eb   : > { %v10080_v48 = vpop.f32.mrf.mxu1  ;;  %v10082_v63 = vpop.f32.mrf.mxu0 }
 0x3ec   : > { %10649 = vst [vmem:[#allocation20_spill] sm:$0xff] %v10080_v48  ;;  %10650 = vst [vmem:[#allocation43_spill] sm:$0xff] %v10082_v63 }
 0x3ef   : > { %v10084_v17 = vpop.f32.mrf.mxu1  ;;  %v10086_v50 = vpop.f32.mrf.mxu0 }
 0x3f0   : > { %10651 = vst [vmem:[#allocation45_spill] sm:$0xff] %v10084_v17  ;;  %10652 = vst [vmem:[#allocation33_spill] sm:$0xff] %v10086_v50  ;;  %v4088_v17 = vadd.f32 %v9779_v19, %v9782_v45 }
 0x3f1   : > { %v10088_v25 = vpop.f32.mrf.mxu1  ;;  %v10090_v39 = vpop.f32.mrf.mxu0 }
 0x3f2   : > { %10653 = vst [vmem:[#allocation44_spill] sm:$0xff] %v10088_v25  ;;  %10654 = vst [vmem:[#allocation9_spill] sm:$0xff] %v10090_v39 }
 0x3f5   : > { %v10092_v14 = vpop.f32.mrf.mxu1  ;;  %v10094_v52 = vpop.f32.mrf.mxu0 }
 0x3f6   : > { %10655 = vst [vmem:[#allocation23_spill] sm:$0xff] %v10092_v14  ;;  %10656 = vst [vmem:[#allocation21_spill] sm:$0xff] %v10094_v52 }
 0x3f7   : > { %v10096_v44 = vpop.f32.mrf.mxu1  ;;  %v10098_v42 = vpop.f32.mrf.mxu0 }
 0x3f8   : > { %10657 = vst [vmem:[#allocation19_spill] sm:$0xff] %v10096_v44  ;;  %10658 = vst [vmem:[#allocation34_spill] sm:$0xff] %v10098_v42 }
 0x3fb   : > { %v10100_v37 = vpop.f32.mrf.mxu1  ;;  %v10102_v16 = vpop.f32.mrf.mxu0 }
 0x3fc   : > { %10659 = vst [vmem:[#allocation46_spill] sm:$0xff] %v10100_v37  ;;  %10660 = vst [vmem:[#allocation10_spill] sm:$0xff] %v10102_v16 }
 0x3fd   : > { %v10104_v55 = vpop.f32.mrf.mxu1  ;;  %v10106_v61 = vpop.f32.mrf.mxu0 }
 0x3fe   : > { %10661 = vst [vmem:[#allocation25_spill] sm:$0xff] %v10104_v55  ;;  %10662 = vst [vmem:[#allocation36_spill] sm:$0xff] %v10106_v61  ;;  %v3720_v61 = vadd.f32 %v9761_v13, %v9759_v53  ;;  %v4258_v53 = vadd.f32 %v10044_v40, %v4088_v17 }
 0x400   : > { %v3919_v1 = vadd.f32 %v9784_v54, %v3720_v61  ;;  %v4091_v61 = vadd.f32 %v9794_v9, %v9792_v29  ;;  %v4093_v9 = vadd.f32 %v9802_v12, %v9800_v23  ;;  %v4095_v23 = vadd.f32 %v9834_v6, %v9832_v60 }
 0x401   : > { %v4551_v32 = vpop.f32.mrf.mxu1  ;;  %v4721_v35 = vpop.f32.mrf.mxu0  ;;  %v4096_v6 = vadd.f32 %v9863_v2, %v9861_v38 }
 0x402   : > { %v4263_v12 = vadd.f32 %v10064_v59, %v4093_v9  ;;  %v4097_v59 = vadd.f32 %v9880_v15, %v9878_v4 }
 0x403   : > { %v4553_v50 = vpop.f32.mrf.mxu1  ;;  %v4723_v39 = vpop.f32.mrf.mxu0  ;;  %v4266_v2 = vadd.f32 %v10076_v5, %v4096_v6 }
 0x405   : > { %v4557_v63 = vpop.f32.mrf.mxu1 }
 0x406   : > { %v4727_v49 = vpop.f32.mrf.mxu0 }
 0x407   : > { %v4559_v14 = vpop.f32.mrf.mxu1 }
 0x408   : > { %v10110_v44 = vpop.f32.mrf.mxu0 }
 0x409   : > { %v4563_v52 = vpop.f32.mrf.mxu1 }
 0x40a   : > { %v10116_v16 = vpop.f32.mrf.mxu0 }
 0x40b   : > { %v10108_v10 = vpop.f32.mrf.mxu1  ;;  %10664 = vst [vmem:[#allocation26_spill] sm:$0xff] %v10116_v16  ;;  %v4089_v16 = vadd.f32 %v9786_v26, %v3919_v1  ;;  %v4428_v26 = vadd.f32 %v10046_v3, %v4258_v53  ;;  %v4261_v1 = vadd.f32 %v4219_v57, %v4091_v61 }
 0x40c   : > { %v10125_v25 = vpop.f32.mrf.mxu0 }
 0x40d   : > { %v10112_v42 = vpop.f32.mrf.mxu1 }
 0x40e   : > { %v10137_v13 = vpop.f32.mrf.mxu0 }
 0x40f   : > { %v10114_v37 = vpop.f32.mrf.mxu1 }
 0x410   : > { %10663 = vst [vmem:[#allocation11_spill] sm:$0xff] %v10114_v37  ;;  %v4956_v37 = vlaneseq }
 0x411   : > { %v10118_v55 = vpop.f32.mrf.mxu1 }
 0x412   : > { %10665 = vst [vmem:[#allocation24_spill] sm:$0xff] %v10118_v55  ;;  %v4090_v55 = vadd.f32 %v9790_v24, %v9788_v8  ;;  %v10145_v45 = vshrl.u32 %v4956_v37, 7  ;;  %v4092_v8 = vadd.f32 %v9798_v51, %v9796_v41  ;;  %v10150_v24 = vpop.f32.mrf.mxu0  ;;  %v4094_v51 = vadd.f32 %v9818_v7, %v9816_v20 }
 0x413   : > { %v10122_v46 = vpop.f32.mrf.mxu1 }
 0x414   : > { %10666 = vst [vmem:[#allocation22_spill] sm:$0xff] %v10122_v46  ;;  %v4260_v46 = vadd.f32 %v4217_v62, %v4090_v55  ;;  %v4262_v55 = vadd.f32 %v10060_v56, %v4092_v8  ;;  %v4958_v3 = vsub.s32 0, %v10145_v45  ;;  %v4962_v41 = vsub.s32 1, %v10145_v45 }
 0x415   : > { %v10127_v11 = vpop.f32.mrf.mxu1  ;;  %v4431_v62 = vadd.f32 %v10058_v21, %v4261_v1  ;;  %v4264_v56 = vadd.f32 %v10068_v43, %v4094_v51  ;;  %v4265_v21 = vadd.f32 %v10072_v30, %v4095_v23  ;;  %v4098_v1 = vadd.f32 %v9909_v22, %v9907_v36  ;;  %v10669_v36 = vld [vmem:[#allocation45_spill] sm:$0xff]  ;;  %v10672_v51 = vld [vmem:[#allocation8_spill] sm:$0xff] }
 0x416   : > { %10667 = vst [vmem:[#allocation37_spill] sm:$0xff] %v10127_v11  ;;  %v4259_v11 = vadd.f32 %v4213_v0, %v4089_v16  ;;  %v4430_v29 = vadd.f32 %v10056_v31, %v4260_v46  ;;  %v4598_v16 = vadd.f32 %v4551_v32, %v4428_v26  ;;  %v4954_v46 = vld [vmem:[%s10548_s6] sm:$0x3]  ;;  %v10172_v32 = vpop.f32.mrf.mxu0  ;;  %v4432_v7 = vadd.f32 %v10062_v33, %v4262_v55 }
 0x417   : > { %v10131_v48 = vpop.f32.mrf.mxu1  ;;  %v4601_v20 = vadd.f32 %v4559_v14, %v4431_v62  ;;  %v10179_v60 = vrot.slane %v4954_v46, %v4962_v41  ;;  %v4434_v14 = vadd.f32 %v10070_v27, %v4264_v56  ;;  %v4435_v38 = vadd.f32 %v10074_v47, %v4265_v21  ;;  %v10670_v47 = vld [vmem:[#allocation26_spill] sm:$0xff]  ;;  %v10675_v56 = vld [vmem:[#allocation41_spill] sm:$0xff] }
 0x418   : > { %v4429_v17 = vadd.f32 %v10054_v34, %v4259_v11  ;;  %v4600_v57 = vadd.f32 %v4557_v63, %v4430_v29  ;;  %v4768_v11 = vadd.f32 %v4721_v35, %v4598_v16  ;;  %v10177_v63 = vrot.slane %v4954_v46, %v4958_v3  ;;  %v10186_v33 = vpop.f32.mrf.mxu0 }
 0x419   : > { %v10139_v54 = vpop.f32.mrf.mxu1  ;;  %v4433_v35 = vadd.f32 %v10066_v58, %v4263_v12  ;;  %v4602_v43 = vadd.f32 %v4563_v52, %v4432_v7  ;;  %v4604_v58 = vadd.f32 %v10112_v42, %v4434_v14  ;;  %v4268_v22 = vadd.f32 %v10669_v36, %v4098_v1  ;;  %v10677_v7 = vld [vmem:[#allocation17_spill] sm:$0xff]  ;;  %v10681_v14 = vld [vmem:[#allocation42_spill] sm:$0xff] }
 0x41a   : > { %v4599_v34 = vadd.f32 %v4553_v50, %v4429_v17  ;;  %v4770_v53 = vadd.f32 %v4727_v49, %v4600_v57  ;;  %v10668_v17 = vld [vmem:[#allocation20_spill] sm:$0xff]  ;;  %v4751_v5 = vpop.f32.mrf.mxu0  ;;  %v4436_v62 = vadd.f32 %v10672_v51, %v4266_v2 }
 0x41b   : > { %v10143_v19 = vpop.f32.mrf.mxu1  ;;  %v4603_v4 = vadd.f32 %v10108_v10, %v4433_v35  ;;  %v4267_v29 = vadd.f32 %v10668_v17, %v4097_v59  ;;  %v4772_v16 = vadd.f32 %v10670_v47, %v4602_v43  ;;  %v10671_v10 = vld [vmem:[#allocation11_spill] sm:$0xff]  ;;  %v4774_v46 = vadd.f32 %v10137_v13, %v4604_v58  ;;  %v10680_v35 = vld [vmem:[#allocation33_spill] sm:$0xff]  ;;  %v10687_v17 = vld [vmem:[#allocation16_spill] sm:$0xff] }
 0x41c   : > { %v4769_v37 = vadd.f32 %v4723_v39, %v4599_v34  ;;  %v4771_v39 = vadd.f32 %v10110_v44, %v4601_v20  ;;  %v4099_v44 = vadd.f32 %v9926_v28, %v9924_v18  ;;  %v4605_v55 = vadd.f32 %v10671_v10, %v4435_v38  ;;  %v10673_v34 = vld [vmem:[#allocation44_spill] sm:$0xff]  ;;  %v10676_v20 = vld [vmem:[#allocation7_spill] sm:$0xff]  ;;  %v4753_v6 = vpop.f32.mrf.mxu0 }
 0x41d   : > { %v10152_v40 = vpop.f32.mrf.mxu1  ;;  %v4773_v28 = vadd.f32 %v10125_v25, %v4603_v4  ;;  %v4101_v21 = vadd.f32 %v10677_v7, %v10676_v20  ;;  %v4438_v43 = vadd.f32 %v10680_v35, %v4268_v22  ;;  %v10684_v38 = vld [vmem:[#allocation23_spill] sm:$0xff]  ;;  %v10685_v4 = vld [vmem:[#allocation22_spill] sm:$0xff] }
 0x41e   : > { %v4269_v57 = vadd.f32 %v10673_v34, %v4099_v44  ;;  %v4775_v25 = vadd.f32 %v10150_v24, %v4605_v55  ;;  %v10689_v22 = vld [vmem:[#allocation19_spill] sm:$0xff]  ;;  %v4757_v55 = vpop.f32.mrf.mxu0  ;;  %v10691_v34 = vld [vmem:[#allocation21_spill] sm:$0xff] }
 0x41f   : > { %v10159_v0 = vpop.f32.mrf.mxu1  ;;  %v4271_v47 = vadd.f32 %v10689_v22, %v4101_v21  ;;  %v10694_v21 = vld [vmem:[#allocation10_spill] sm:$0xff] }
 0x420   : > { %v4759_v20 = vpop.f32.mrf.mxu0 }
 0x421   : > { %v4891_v31 = vpop.f32.mrf.mxu1 }
 0x422   : > { %v4938_v61 = vadd.f32 %v4891_v31, %v4768_v11  ;;  %v10674_v31 = vld [vmem:[#allocation30_spill] sm:$0xff] }
 0x423   : > { %v4893_v50 = vpop.f32.mrf.mxu1  ;;  %v4100_v11 = vadd.f32 %v10675_v56, %v10674_v31  ;;  %v10693_v56 = vld [vmem:[#allocation34_spill] sm:$0xff] }
 0x424   : > { %v4939_v49 = vadd.f32 %v4893_v50, %v4769_v37  ;;  %v4966_v52 = vadd.f32 %v10177_v63, %v4938_v61  ;;  %v10678_v50 = vld [vmem:[#allocation43_spill] sm:$0xff] }
 0x425   : > { %v4897_v30 = vpop.f32.mrf.mxu1  ;;  %v4437_v37 = vadd.f32 %v10678_v50, %v4267_v29  ;;  %v4270_v2 = vadd.f32 %v10684_v38, %v4100_v11  ;;  %v10688_v29 = vld [vmem:[#allocation31_spill] sm:$0xff]  ;;  %v4441_v11 = vadd.f32 %v10693_v56, %v4271_v47 }
 0x426   : > { %v4940_v26 = vadd.f32 %v4897_v30, %v4770_v53  ;;  %v4967_v42 = vadd.f32 %v10179_v60, %v4939_v49  ;;  %v10679_v53 = vld [vmem:[#allocation24_spill] sm:$0xff]  ;;  %v4103_v36 = vadd.f32 %v10688_v29, %v10687_v17 }
 0x427   : > { %v4899_v15 = vpop.f32.mrf.mxu1  ;;  %v4606_v61 = vadd.f32 %v10679_v53, %v4436_v62 }
 0x428   : > { %v4968_v27 = vadd.f32 %v10177_v63, %v4940_v26  ;;  %v4941_v8 = vadd.f32 %v4899_v15, %v4771_v39  ;;  %v10682_v39 = vld [vmem:[#allocation18_spill] sm:$0xff]  ;;  %v10683_v26 = vld [vmem:[#allocation9_spill] sm:$0xff]  ;;  %v4607_v15 = vadd.f32 %v10685_v4, %v4437_v37 }
 0x429   : > { %v4903_v9 = vpop.f32.mrf.mxu1  ;;  %v4102_v49 = vadd.f32 %v10682_v39, %v10681_v14  ;;  %v4439_v1 = vadd.f32 %v10683_v26, %v4269_v57  ;;  %v4776_v10 = vadd.f32 %v10172_v32, %v4606_v61  ;;  %v4440_v57 = vadd.f32 %v10691_v34, %v4270_v2 }
 0x42a   : > { %v4982_v3 = vmax.f32 %v4966_v52, %v4968_v27  ;;  %v4969_v41 = vadd.f32 %v10179_v60, %v4941_v8  ;;  %v4942_v12 = vadd.f32 %v4903_v9, %v4772_v16  ;;  %v10686_v52 = vld [vmem:[#allocation37_spill] sm:$0xff]  ;;  %v10690_v16 = vld [vmem:[#allocation46_spill] sm:$0xff] }
 0x42b   : > { %v4905_v18 = vpop.f32.mrf.mxu1  ;;  %v4608_v27 = vadd.f32 %v10686_v52, %v4438_v43  ;;  %v4272_v9 = vadd.f32 %v10690_v16, %v4102_v49 }
 0x42c   : > { %4990 = vst [vmem:[#allocation6] sm:$0xff] %v4982_v3  ;;  %v4983_v23 = vmax.f32 %v4967_v42, %v4969_v41  ;;  %v4943_v13 = vadd.f32 %v4905_v18, %v4773_v28  ;;  %v4970_v8 = vadd.f32 %v10177_v63, %v4942_v12  ;;  %v4609_v3 = vadd.f32 %v10131_v48, %v4439_v1  ;;  %v10692_v18 = vld [vmem:[#allocation25_spill] sm:$0xff] }
 0x42d   : > { %v4909_v59 = vpop.f32.mrf.mxu1  ;;  %v4273_v28 = vadd.f32 %v10692_v18, %v4103_v36  ;;  %v4778_v12 = vadd.f32 %v4751_v5, %v4608_v27  ;;  %v4610_v48 = vadd.f32 %v10139_v54, %v4440_v57  ;;  %v4442_v50 = vadd.f32 %v10694_v21, %v4272_v9  ;;  %v4763_v5 = vpop.f32.mrf.mxu0 }
 0x42e   : > { %4991 = vst [vmem:[#allocation6 + $0x8] sm:$0xff] %v4983_v23  ;;  %v4944_v30 = vadd.f32 %v4909_v59, %v4774_v46  ;;  %v4971_v41 = vadd.f32 %v10179_v60, %v4943_v13  ;;  %v4777_v23 = vadd.f32 %v10186_v33, %v4607_v15  ;;  %v4779_v37 = vadd.f32 %v4753_v6, %v4609_v3  ;;  %v10695_v59 = vld [vmem:[#allocation36_spill] sm:$0xff] }
 0x42f   : > { %v4911_v58 = vpop.f32.mrf.mxu1  ;;  %v4443_v35 = vadd.f32 %v10695_v59, %v4273_v28  ;;  %v4611_v33 = vadd.f32 %v10143_v19, %v4441_v11  ;;  %v4780_v14 = vadd.f32 %v4757_v55, %v4610_v48  ;;  %v4765_v38 = vpop.f32.mrf.mxu0 }
 0x430   : > { %v4972_v44 = vadd.f32 %v10177_v63, %v4944_v30  ;;  %v4945_v24 = vadd.f32 %v4911_v58, %v4775_v25  ;;  %v4612_v25 = vadd.f32 %v10152_v40, %v4442_v50 }
 0x431   : > { %v4915_v42 = vpop.f32.mrf.mxu1  ;;  %v4613_v6 = vadd.f32 %v10159_v0, %v4443_v35  ;;  %v4781_v2 = vadd.f32 %v4759_v20, %v4611_v33 }
 0x432   : > { %v4984_v51 = vmax.f32 %v4970_v8, %v4972_v44  ;;  %v4973_v62 = vadd.f32 %v10179_v60, %v4945_v24  ;;  %v4946_v32 = vadd.f32 %v4915_v42, %v4776_v10  ;;  %v4782_v4 = vadd.f32 %v4763_v5, %v4612_v25 }
 0x433   : > { %v4917_v46 = vpop.f32.mrf.mxu1  ;;  %v4783_v52 = vadd.f32 %v4765_v38, %v4613_v6  ;;  %v7337_v24 = vmov 1966171168  }
 0x434   : > { %4992 = vst [vmem:[#allocation6 + $0x10] sm:$0xff] %v4984_v51  ;;  %v4985_v31 = vmax.f32 %v4971_v41, %v4973_v62  ;;  %v4947_v53 = vadd.f32 %v4917_v46, %v4777_v23  ;;  %v4974_v13 = vadd.f32 %v10177_v63, %v4946_v32  ;;  %v5090_v0 = vunpack.c.l.s4 %v7337_v24  ;;  %v6308_v24 = vld [vmem:[%s10549_s7 + $0x268] sm:$0xff] }
 0x435   : > { %v4921_v7 = vpop.f32.mrf.mxu1  ;;  %v5042_v22 = vld [vmem:[#allocation6 + $0x2] ss:$8 sm:$0x3]  ;;  %v5046_v47 = vld [vmem:[#allocation6 + $0x3] ss:$8 sm:$0x3] }
 0x436   : > { %4993 = vst [vmem:[#allocation6 + $0x18] sm:$0xff] %v4985_v31  ;;  %v4948_v61 = vadd.f32 %v4921_v7, %v4778_v12  ;;  %v4975_v49 = vadd.f32 %v10179_v60, %v4947_v53  ;;  %v4998_v55 = vld [vmem:[#allocation6] ss:$8 sm:$0x3]  ;;  %v5091_v3 = vunpack.c.0.s8 %v5090_v0  ;;  %v5049_v51 = vmax.f32 %v5042_v22, %v5046_v47 }
 0x437   : > { %v4923_v43 = vpop.f32.mrf.mxu1  ;;  %v5002_v42 = vld [vmem:[#allocation6 + $0x1] ss:$8 sm:$0x3] }
 0x438   : > { %v4976_v54 = vadd.f32 %v10177_v63, %v4948_v61  ;;  %v4949_v30 = vadd.f32 %v4923_v43, %v4779_v37  ;;  %v5005_v57 = vmax.f32 %v4998_v55, %v5002_v42  ;;  %v10253_v23 = vsub.s32 %v5091_v3, %v10145_v45  ;;  %v6355_v22 = vld [vmem:[%s10549_s7 + $0x3e0] sm:$0xff]  ;;  %v6354_v42 = vld [vmem:[%s10549_s7 + $0x3d8] sm:$0xff] }
 0x439   : > { %v4927_v39 = vpop.f32.mrf.mxu1  ;;  %v5051_v12 = vmax.f32 %v5049_v51, 0.0  ;;  %v6307_v47 = vld [vmem:[%s10549_s7 + $0x260] sm:$0xff]  ;;  %v6338_v51 = vld [vmem:[%s10549_s7 + $0x358] sm:$0xff] }
 0x43a   : > { %v4986_v26 = vmax.f32 %v4974_v13, %v4976_v54  ;;  %v4977_v1 = vadd.f32 %v10179_v60, %v4949_v30  ;;  %v4950_v15 = vadd.f32 %v4927_v39, %v4780_v14  ;;  %v5007_v32 = vmax.f32 %v5005_v57, 0.0  ;;  %v6305_v57 = vld [vmem:[%s10549_s7 + $0x250] sm:$0xff] }
 0x43b   : > { %v4929_v19 = vpop.f32.mrf.mxu1 }
 0x43c   : > { %4994 = vst [vmem:[#allocation6 + $0x20] sm:$0xff] %v4986_v26  ;;  %v4987_v40 = vmax.f32 %v4975_v49, %v4977_v1  ;;  %v4951_v27 = vadd.f32 %v4929_v19, %v4781_v2  ;;  %v4978_v17 = vadd.f32 %v10177_v63, %v4950_v15  ;;  %v6310_v49 = vld [vmem:[%s10549_s7 + $0x278] sm:$0xff]  ;;  %v6325_v2 = vld [vmem:[%s10549_s7 + $0x2f0] sm:$0xff] }
 0x43d   : > { %v4933_v58 = vpop.f32.mrf.mxu1  ;;  %v5285_v11 = vld [vmem:[#allocation6 + $0x11] ss:$8 sm:$0x3]  ;;  %v5424_v20 = vld [vmem:[#allocation6 + $0x12] ss:$8 sm:$0x3] }
 0x43e   : > { %4995 = vst [vmem:[#allocation6 + $0x28] sm:$0xff] %v4987_v40  ;;  %v4952_v8 = vadd.f32 %v4933_v58, %v4782_v4  ;;  %v4979_v16 = vadd.f32 %v10179_v60, %v4951_v27  ;;  %v5428_v7 = vld [vmem:[#allocation6 + $0x13] ss:$8 sm:$0x3]  ;;  %v6324_v27 = vld [vmem:[%s10549_s7 + $0x2e8] sm:$0xff] }
 0x43f   : > { %v4935_v44 = vpop.f32.mrf.mxu1  ;;  %v5431_v35 = vmax.f32 %v5424_v20, %v5428_v7  ;;  %v6342_v19 = vld [vmem:[%s10549_s7 + $0x378] sm:$0xff]  ;;  %v6357_v40 = vld [vmem:[%s10549_s7 + $0x3f0] sm:$0xff] }
 0x440   : > { %v4980_v29 = vadd.f32 %v10177_v63, %v4952_v8  ;;  %v4953_v36 = vadd.f32 %v4935_v44, %v4783_v52  ;;  %v6309_v15 = vld [vmem:[%s10549_s7 + $0x270] sm:$0xff]  ;;  %v6356_v44 = vld [vmem:[%s10549_s7 + $0x3e8] sm:$0xff]  ;;  %v6302_v20 = vld [vmem:[%s10549_s7 + $0x238] sm:$0xff] }
 0x441   : > { %v5433_v26 = vmax.f32 %v5431_v35, 0.0  ;;  %v6341_v52 = vld [vmem:[%s10549_s7 + $0x370] sm:$0xff]  ;;  %v6334_v7 = vld [vmem:[%s10549_s7 + $0x338] sm:$0xff]  ;;  %v6300_v35 = vld [vmem:[%s10549_s7 + $0x228] sm:$0xff] }
 0x442   : > { %v4988_v9 = vmax.f32 %v4978_v17, %v4980_v29  ;;  %v4981_v10 = vadd.f32 %v10179_v60, %v4953_v36  ;;  %v5281_v60 = vld [vmem:[#allocation6 + $0x10] ss:$8 sm:$0x3]  ;;  %v6340_v17 = vld [vmem:[%s10549_s7 + $0x368] sm:$0xff]  ;;  %v6323_v29 = vld [vmem:[%s10549_s7 + $0x2e0] sm:$0xff] }
 0x443   : > { %v5288_v37 = vmax.f32 %v5281_v60, %v5285_v11  ;;  %v6351_v60 = vld [vmem:[%s10549_s7 + $0x3c0] sm:$0xff]  ;;  %v6318_v11 = vld [vmem:[%s10549_s7 + $0x2b8] sm:$0xff] }
 0x444   : > { %4996 = vst [vmem:[#allocation6 + $0x30] sm:$0xff] %v4988_v9  ;;  %v4989_v41 = vmax.f32 %v4979_v16, %v4981_v10  ;;  %v6339_v9 = vld [vmem:[%s10549_s7 + $0x360] sm:$0xff]  ;;  %v6322_v10 = vld [vmem:[%s10549_s7 + $0x2d8] sm:$0xff] }
 0x445   : > { %v5044_v62 = vld [vmem:[#allocation6 + $0x22] ss:$8 sm:$0x3]  ;;  %v5048_v34 = vld [vmem:[#allocation6 + $0x23] ss:$8 sm:$0x3] }
 0x446   : > { %4997 = vst [vmem:[#allocation6 + $0x38] sm:$0xff] %v4989_v41  ;;  %v5050_v18 = vmax.f32 %v5044_v62, %v5048_v34  ;;  %v5000_v63 = vld [vmem:[#allocation6 + $0x20] ss:$8 sm:$0x3]  ;;  %v5290_v30 = vmax.f32 %v5288_v37, 0.0  ;;  %v6306_v41 = vld [vmem:[%s10549_s7 + $0x258] sm:$0xff] }
 0x447   : > { %v5004_v28 = vld [vmem:[#allocation6 + $0x21] ss:$8 sm:$0x3]  ;;  %v6321_v62 = vld [vmem:[%s10549_s7 + $0x2d0] sm:$0xff] }
 0x448   : > { %v5006_v46 = vmax.f32 %v5000_v63, %v5004_v28  ;;  %v5052_v31 = vmax.f32 %v5050_v18, 0.0  ;;  %v6353_v34 = vld [vmem:[%s10549_s7 + $0x3d0] sm:$0xff]  ;;  %v6320_v63 = vld [vmem:[%s10549_s7 + $0x2c8] sm:$0xff] }
 0x449   : > { %v6337_v18 = vld [vmem:[%s10549_s7 + $0x350] sm:$0xff]  ;;  %v6352_v28 = vld [vmem:[%s10549_s7 + $0x3c8] sm:$0xff] }
 0x44a   : > { %v5008_v56 = vmax.f32 %v5006_v46, 0.0  ;;  %v5088_v48 = vcombine.low %v5051_v12, %v5052_v31  ;;  %v6304_v46 = vld [vmem:[%s10549_s7 + $0x248] sm:$0xff]  ;;  %v6319_v31 = vld [vmem:[%s10549_s7 + $0x2c0] sm:$0xff]  ;;  %v6301_v37 = vld [vmem:[%s10549_s7 + $0x230] sm:$0xff] }
 0x44b   : > { %v6336_v12 = vld [vmem:[%s10549_s7 + $0x348] sm:$0xff] }
 0x44c   : > { %v5185_v21 = vcombine.low %v5007_v32, %v5008_v56  ;;  %v5095_v50 = vrot.slane %v5088_v48, %v10253_v23  ;;  %v6303_v32 = vld [vmem:[%s10549_s7 + $0x240] sm:$0xff]  ;;  %v6350_v48 = vld [vmem:[%s10549_s7 + $0x3b8] sm:$0xff] }
 0x44d   : > { %v5283_v61 = vld [vmem:[#allocation6 + $0x30] ss:$8 sm:$0x3]  ;;  %v5287_v59 = vld [vmem:[#allocation6 + $0x31] ss:$8 sm:$0x3] }
 0x44e   : > { %v5192_v53 = vrot.slane %v5185_v21, %v10253_v23  ;;  %v5096_v45 = vcombine.high %v5095_v50, %v5095_v50  ;;  %v5289_v33 = vmax.f32 %v5283_v61, %v5287_v59  ;;  %v5426_v5 = vld [vmem:[#allocation6 + $0x32] ss:$8 sm:$0x3]  ;;  %v5430_v43 = vld [vmem:[#allocation6 + $0x33] ss:$8 sm:$0x3]  ;;  %v5103_v39 = vrot.slane %v5095_v50, %v10253_v23 }
 0x44f   : > { %v5432_v13 = vmax.f32 %v5426_v5, %v5430_v43  ;;  %v6335_v56 = vld [vmem:[%s10549_s7 + $0x340] sm:$0xff]  ;;  %v6317_v21 = vld [vmem:[%s10549_s7 + $0x2b0] sm:$0xff]  ;;  %v6316_v61 = vld [vmem:[%s10549_s7 + $0x2a8] sm:$0xff] }
 0x450   : > { %v5193_v25 = vcombine.high %v5192_v53, %v5192_v53  ;;  %v5110_v54 = vrot.slane %v5096_v45, %v10253_v23  ;;  %v5291_v14 = vmax.f32 %v5289_v33, 0.0  ;;  %v5200_v38 = vrot.slane %v5192_v53, %v10253_v23  ;;  %v6349_v50 = vld [vmem:[%s10549_s7 + $0x3b0] sm:$0xff]  ;;  %v6348_v59 = vld [vmem:[%s10549_s7 + $0x3a8] sm:$0xff]  ;;  %v6315_v33 = vld [vmem:[%s10549_s7 + $0x2a0] sm:$0xff] }
 0x451   : > { %v5434_v1 = vmax.f32 %v5432_v13, 0.0  ;;  %v6333_v53 = vld [vmem:[%s10549_s7 + $0x330] sm:$0xff]  ;;  %v6332_v45 = vld [vmem:[%s10549_s7 + $0x328] sm:$0xff]  ;;  %v6347_v5 = vld [vmem:[%s10549_s7 + $0x3a0] sm:$0xff] }
 0x452   : > { %v5207_v6 = vrot.slane %v5193_v25, %v10253_v23  ;;  %5177 = vmatprep.mubr.f32.mxu0 %v5110_v54  ;;  %v5327_v4 = vcombine.low %v5290_v30, %v5291_v14  ;;  %v6299_v43 = vld [vmem:[%s10549_s7 + $0x220] sm:$0xff]  ;;  %v6314_v13 = vld [vmem:[%s10549_s7 + $0x298] sm:$0xff] }
 0x453   : > { %5178 = vmatmul.mubr.f32.vlgmr.msra.gmra.mxu0 %v5103_v39  ;;  %v5470_v58 = vcombine.low %v5433_v26, %v5434_v1  ;;  %v6331_v25 = vld [vmem:[%s10549_s7 + $0x320] sm:$0xff]  ;;  %v6346_v54 = vld [vmem:[%s10549_s7 + $0x398] sm:$0xff]  ;;  %v6313_v39 = vld [vmem:[%s10549_s7 + $0x290] sm:$0xff] }
 0x454   : > { %5274 = vmatprep.mubr.f32.mxu1 %v5207_v6  ;;  %6720 = vmatpush3.msra.mxu0 %v6310_v49  ;;  %v10283_v8 = vrot.slane %v5327_v4, %v10253_v23  ;;  %v6298_v30 = vld [vmem:[%s10549_s7 + $0x218] sm:$0xff]  ;;  %v6345_v6 = vld [vmem:[%s10549_s7 + $0x390] sm:$0xff]  ;;  %v6312_v1 = vld [vmem:[%s10549_s7 + $0x288] sm:$0xff] }
 0x455   : > { %5275 = vmatmul.mubr.f32.vlgmr.msra.gmra.mxu1 %v5200_v38  ;;  %6721 = vmatprep.subr.mxu0 %v6325_v2  ;;  %v10292_v0 = vrot.slane %v5470_v58, %v10253_v23  ;;  %v6330_v14 = vld [vmem:[%s10549_s7 + $0x318] sm:$0xff]  ;;  %v6297_v49 = vld [vmem:[%s10549_s7 + $0x210] sm:$0xff]  ;;  %v6344_v38 = vld [vmem:[%s10549_s7 + $0x388] sm:$0xff] }
 0x456   : > { %6755 = vmatpush3.msra.mxu1 %v6342_v19  ;;  %6722 = vmatpush3.msra.mxu0 %v6309_v15  ;;  %v5335_v36 = vcombine.high %v10283_v8, %v10283_v8  ;;  %v6329_v26 = vld [vmem:[%s10549_s7 + $0x310] sm:$0xff]  ;;  %v6296_v19 = vld [vmem:[%s10549_s7 + $0x208] sm:$0xff]  ;;  %v6311_v4 = vld [vmem:[%s10549_s7 + $0x280] sm:$0xff] }
 0x457   : > { %6756 = vmatprep.subr.mxu1 %v6357_v40  ;;  %6723 = vmatprep.subr.mxu0 %v6324_v27  ;;  %v5478_v16 = vcombine.high %v10292_v0, %v10292_v0  ;;  %v6328_v2 = vld [vmem:[%s10549_s7 + $0x308] sm:$0xff]  ;;  %v6343_v40 = vld [vmem:[%s10549_s7 + $0x380] sm:$0xff]  ;;  %v5485_v27 = vrot.slane %v10292_v0, %v10253_v23 }
 0x458   : > { %6757 = vmatpush3.msra.mxu1 %v6341_v52  ;;  %6724 = vmatpush3.msra.mxu0 %v6308_v24  ;;  %v5349_v55 = vrot.slane %v5335_v36, %v10253_v23  ;;  %v6295_v15 = vld [vmem:[%s10549_s7 + $0x200] sm:$0xff]  ;;  %v5342_v52 = vrot.slane %v10283_v8, %v10253_v23  ;;  %v5590_v24 = vld [vmem:[%s10551_s9 + $0x78] sm:$0xff]  ;;  %v5589_v8 = vld [vmem:[%s10551_s9 + $0x70] sm:$0xff] }
 0x459   : > { %6758 = vmatprep.subr.mxu1 %v6356_v44  ;;  %6725 = vmatprep.subr.mxu0 %v6323_v29  ;;  %v5492_v3 = vrot.slane %v5478_v16, %v10253_v23  ;;  %v6327_v58 = vld [vmem:[%s10549_s7 + $0x300] sm:$0xff]  ;;  %v10696_v44 = vmov 0.0   ;;  %v5588_v23 = vld [vmem:[%s10551_s9 + $0x68] sm:$0xff]  ;;  %v5585_v29 = vld [vmem:[%s10551_s9 + $0x50] sm:$0xff] }
 0x45a   : > { %6759 = vmatpush3.msra.mxu1 %v6340_v17  ;;  %6726 = vmatpush3.msra.mxu0 %v6307_v47  ;;  %v5587_v0 = vld [vmem:[%s10551_s9 + $0x60] sm:$0xff]  ;;  %v5586_v17 = vld [vmem:[%s10551_s9 + $0x58] sm:$0xff]  ;;  %v5584_v36 = vld [vmem:[%s10551_s9 + $0x48] sm:$0xff] }
 0x45b   : > { %6760 = vmatprep.subr.mxu1 %v6355_v22  ;;  %6727 = vmatprep.subr.mxu0 %v6322_v10  ;;  %v5583_v22 = vld [vmem:[%s10551_s9 + $0x40] sm:$0xff]  ;;  %v5582_v47 = vld [vmem:[%s10551_s9 + $0x38] sm:$0xff]  ;;  %v5581_v16 = vld [vmem:[%s10551_s9 + $0x30] sm:$0xff] }
 0x45c   : > { %6761 = vmatpush3.msra.mxu1 %v6339_v9  ;;  %5416 = vmatprep.mubr.f32.mxu0 %v5349_v55  ;;  %v5580_v9 = vld [vmem:[%s10551_s9 + $0x28] sm:$0xff]  ;;  %v5579_v10 = vld [vmem:[%s10551_s9 + $0x20] sm:$0xff]  ;;  %v5578_v55 = vld [vmem:[%s10551_s9 + $0x18] sm:$0xff] }
 0x45d   : > { %6762 = vmatprep.subr.mxu1 %v6354_v42  ;;  %5559 = vmatprep.mubr.f32.mxu1 %v5492_v3  ;;  %v5577_v42 = vld [vmem:[%s10551_s9 + $0x10] sm:$0xff]  ;;  %v5576_v3 = vld [vmem:[%s10551_s9 + $0x8] sm:$0xff] }
 0x45e   : > { %6728 = vmatpush3.msra.mxu0 %v6306_v41  ;;  %6763 = vmatpush3.msra.mxu1 %v6338_v51  ;;  %v5575_v41 = vld [vmem:[%s10551_s9] sm:$0xff] }
 0x45f   : > { %6729 = vmatprep.subr.mxu0 %v6321_v62  ;;  %6764 = vmatprep.subr.mxu1 %v6353_v34 }
 0x460   : > { %6730 = vmatpush3.msra.mxu0 %v6305_v57  ;;  %6765 = vmatpush3.msra.mxu1 %v6337_v18 }
 0x461   : > { %6731 = vmatprep.subr.mxu0 %v6320_v63  ;;  %6766 = vmatprep.subr.mxu1 %v6352_v28 }
 0x462   : > { %6732 = vmatpush3.msra.mxu0 %v6304_v46  ;;  %6767 = vmatpush3.msra.mxu1 %v6336_v12 }
 0x463   : > { %6733 = vmatprep.subr.mxu0 %v6319_v31  ;;  %6768 = vmatprep.subr.mxu1 %v6351_v60 }
 0x464   : > { %6734 = vmatpush3.msra.mxu0 %v6303_v32  ;;  %6769 = vmatpush3.msra.mxu1 %v6335_v56 }
 0x465   : > { %6735 = vmatprep.subr.mxu0 %v6318_v11  ;;  %6770 = vmatprep.subr.mxu1 %v6350_v48  ;;  %v6359_v48 = vld [vmem:[%s10550_s8] ss:$0 sm:$0xff] }
 0x466   : > { %6736 = vmatpush3.msra.mxu0 %v6302_v20  ;;  %6771 = vmatpush3.msra.mxu1 %v6334_v7 }
 0x467   : > { %6737 = vmatprep.subr.mxu0 %v6317_v21  ;;  %6772 = vmatprep.subr.mxu1 %v6349_v50  ;;  %v6360_v50 = vld [vmem:[%s10552_s10] ss:$0 sm:$0xff] }
 0x468   : > { %6738 = vmatpush3.msra.mxu0 %v6301_v37  ;;  %6773 = vmatpush3.msra.mxu1 %v6333_v53 }
 0x469   : > { %6739 = vmatprep.subr.mxu0 %v6316_v61  ;;  %6774 = vmatprep.subr.mxu1 %v6348_v59 }
 0x46a   : > { %6740 = vmatpush3.msra.mxu0 %v6300_v35  ;;  %6775 = vmatpush3.msra.mxu1 %v6332_v45 }
 0x46b   : > { %6741 = vmatprep.subr.mxu0 %v6315_v33  ;;  %6776 = vmatprep.subr.mxu1 %v6347_v5 }
 0x46c   : > { %6742 = vmatpush3.msra.mxu0 %v6299_v43  ;;  %6777 = vmatpush3.msra.mxu1 %v6331_v25 }
 0x46d   : > { %6743 = vmatprep.subr.mxu0 %v6314_v13  ;;  %6778 = vmatprep.subr.mxu1 %v6346_v54 }
 0x46e   : > { %6744 = vmatpush3.msra.mxu0 %v6298_v30  ;;  %6779 = vmatpush3.msra.mxu1 %v6330_v14 }
 0x46f   : > { %6745 = vmatprep.subr.mxu0 %v6313_v39  ;;  %6780 = vmatprep.subr.mxu1 %v6345_v6 }
 0x470   : > { %6746 = vmatpush3.msra.mxu0 %v6297_v49  ;;  %6781 = vmatpush3.msra.mxu1 %v6329_v26 }
 0x471   : > { %6747 = vmatprep.subr.mxu0 %v6312_v1  ;;  %6782 = vmatprep.subr.mxu1 %v6344_v38 }
 0x472   : > { %6748 = vmatpush3.msra.mxu0 %v6296_v19  ;;  %6783 = vmatpush3.msra.mxu1 %v6328_v2 }
 0x473   : > { %6749 = vmatprep.subr.mxu0 %v6311_v4  ;;  %6784 = vmatprep.subr.mxu1 %v6343_v40 }
 0x474   : > { %6750 = vmatpush3.msra.mxu0 %v6295_v15  ;;  %6785 = vmatpush3.msra.mxu1 %v6327_v58 }
 0x475   : > { %5417 = vmatmul.mubr.f32.vlgmr.msra.gmra.mxu0 %v5342_v52  ;;  %5560 = vmatmul.mubr.f32.vlgmr.msra.gmra.mxu1 %v5485_v27 }
 0x476   : > { %7272 = vmatprep.subr.mxu0 %v10696_v44  ;;  %7304 = vmatprep.mubr.msk.f32.mxu0 %vm7338_vm5, %v10696_v44 }
 0x477   : > { %7273 = vmatpush3.msra.mxu0 %v5590_v24 }
 0x478   : > { %7274 = vmatprep.subr.mxu0 %v10696_v44 }
 0x479   : > { %7275 = vmatpush3.msra.mxu0 %v5589_v8 }
 0x47a   : > { %7276 = vmatprep.subr.mxu0 %v10696_v44 }
 0x47b   : > { %7277 = vmatpush3.msra.mxu0 %v5588_v23 }
 0x47c   : > { %7278 = vmatprep.subr.mxu0 %v10696_v44 }
 0x47d   : > { %7279 = vmatpush3.msra.mxu0 %v5587_v0 }
 0x47e   : > { %7280 = vmatprep.subr.mxu0 %v10696_v44 }
 0x47f   : > { %7281 = vmatpush3.msra.mxu0 %v5586_v17 }
 0x480   : > { %7282 = vmatprep.subr.mxu0 %v10696_v44 }
 0x481   : > { %7283 = vmatpush3.msra.mxu0 %v5585_v29 }
 0x482   : > { %7284 = vmatprep.subr.mxu0 %v10696_v44 }
 0x483   : > { %7285 = vmatpush3.msra.mxu0 %v5584_v36 }
 0x484   : > { %7286 = vmatprep.subr.mxu0 %v10696_v44 }
 0x485   : > { %7287 = vmatpush3.msra.mxu0 %v5583_v22 }
 0x486   : > { %7288 = vmatprep.subr.mxu0 %v10696_v44 }
 0x487   : > { %7289 = vmatpush3.msra.mxu0 %v5582_v47 }
 0x488   : > { %7290 = vmatprep.subr.mxu0 %v10696_v44 }
 0x489   : > { %7291 = vmatpush3.msra.mxu0 %v5581_v16 }
 0x48a   : > { %7292 = vmatprep.subr.mxu0 %v10696_v44 }
 0x48b   : > { %7293 = vmatpush3.msra.mxu0 %v5580_v9 }
 0x48c   : > { %7294 = vmatprep.subr.mxu0 %v10696_v44 }
 0x48d   : > { %7295 = vmatpush3.msra.mxu0 %v5579_v10 }
 0x48e   : > { %7296 = vmatprep.subr.mxu0 %v10696_v44 }
 0x48f   : > { %7297 = vmatpush3.msra.mxu0 %v5578_v55 }
 0x490   : > { %7298 = vmatprep.subr.mxu0 %v10696_v44 }
 0x491   : > { %7299 = vmatpush3.msra.mxu0 %v5577_v42 }
 0x492   : > { %7300 = vmatprep.subr.mxu0 %v10696_v44 }
 0x493   : > { %7301 = vmatpush3.msra.mxu0 %v5576_v3 }
 0x494   : > { %7302 = vmatprep.subr.mxu0 %v10696_v44 }
 0x495   : > { %7303 = vmatpush3.msra.mxu0 %v5575_v41 }
 0x513   : > { %v6681_v51 = vpop.f32.mrf.mxu0 }
 0x515   : > { %v6716_v62 = vpop.f32.mrf.mxu1  ;;  %v6682_v34 = vpop.f32.mrf.mxu0 }
 0x516   : > { %v6683_v18 = vadd.f32 %v6682_v34, %v6681_v51 }
 0x517   : > { %v6717_v57 = vpop.f32.mrf.mxu1 }
 0x518   : > { %v6718_v63 = vadd.f32 %v6717_v57, %v6716_v62 }
 0x51a   : > { %v5277_v31 = vadd.f32 %v6718_v63, %v6683_v18 }
 0x535   : > { %v6751_v28 = vpop.f32.mrf.mxu0  ;;  %v6786_v46 = vpop.f32.mrf.mxu1 }
 0x537   : > { %v6752_v12 = vpop.f32.mrf.mxu0  ;;  %v6787_v32 = vpop.f32.mrf.mxu1 }
 0x538   : > { %v6753_v60 = vadd.f32 %v6752_v12, %v6751_v28  ;;  %v6788_v11 = vadd.f32 %v6787_v32, %v6786_v46 }
 0x53a   : > { %v5422_v56 = vadd.f32 %v6753_v60, %v5277_v31 }
 0x53c   : > { %v5565_v20 = vadd.f32 %v6788_v11, %v5422_v56 }
 0x53e   : > { %v5573_v7 = vadd.f32 %v6359_v48, %v5565_v20 }
 0x540   : > { %v5574_v21 = vmax.f32 %v5573_v7, 0.0 }
 0x542   : > { %7305 = vmatmul.mubr.f32.vlgmr.msra.gmra.mxu0 %v5574_v21 }
 0x602   : > { %v5664_v37 = vpop.f32.mrf.mxu0 }
 0x603   : > { %v5665_v53 = vadd.f32 %v6360_v50, %v5664_v37 }
 0x604   : > { %v7306_v61 = vpop.f32.mrf.mxu0 }
 0x605   : > { %5669 = vst.msk [vmem:[%s389_s20] sm:$0x3] %vm5668_vm6, %v5665_v53 }
 0x606 PF: > { %s21_s17 = sadd.s32 1, %s7334_s17  }
 0x607   : > { %p18_p5 = scmp.ge.s32.totalorder %s21_s17, 4  }
 0x609   :  { %20 = sbr.rel (!%p18_p5) target bundleno = 1 (0x1), region = 174 }

</bundles_post_ra>
